<compile_context>
chip_gen: v5e
topology: v5e:2x2
jax: 0.10.0
libtpu: 0.0.40
codegen_flags: <defaults>
</compile_context>

<pallas_src>
import functools
import math

import jax
import jax.numpy as jnp
from jax.experimental import pallas as pl
from jax.experimental.pallas import tpu as pltpu

# ----- scaled-down config (real BERT-base: 768 / 12 / 3072 / 12 layers) -----
HIDDEN = 128
NUM_HEADS = 4
HEAD_DIM = HIDDEN // NUM_HEADS
INTERMEDIATE = 256
NUM_LAYERS = 2
VOCAB = 100
MAX_POS = 32
CLS_HIDDEN = 64          # cls_layer1 = Linear(H, 64)
NUM_CLASSES = 2          # cls_layer2 = Linear(64, 2)
OUT_PAD = 128            # lane-dense padded logits width
LN_EPS = 1e-12


# ------------------------------ kernel helpers -------------------------------

def _gelu_tanh(y):
    # TODO(synk): HF BERT uses the exact erf GELU; tanh approximation deviates by ~1e-3.
    c = math.sqrt(2.0 / math.pi)
    return 0.5 * y * (1.0 + jnp.tanh(c * (y + 0.044715 * y * y * y)))


def _layernorm(x, g, b):
    mu = jnp.mean(x, axis=-1, keepdims=True)
    var = jnp.mean(jnp.square(x - mu), axis=-1, keepdims=True)
    return (x - mu) * jax.lax.rsqrt(var + LN_EPS) * g + b


def _bf16_dot(a, w):
    # bf16 MXU operands, f32 accumulation.
    return jnp.dot(a.astype(jnp.bfloat16), w.astype(jnp.bfloat16),
                   preferred_element_type=jnp.float32)


# ------------------------------ fused BERT kernel -----------------------------

def _fused_wipo_kernel(seq_ref, mask_ref,
                       wemb_ref, pemb_ref, temb_ref,
                       emb_g_ref, emb_b_ref,
                       wqkv_ref, bqkv_ref, wo_ref, bo_ref,
                       ln1_g_ref, ln1_b_ref,
                       wi_ref, bi_ref, wo2_ref, bo2_ref,
                       ln2_g_ref, ln2_b_ref,
                       w1_ref, b1_ref, w2_ref, b2_ref,
                       logits_ref, x_scratch, *, seq_len):
    BT = x_scratch.shape[0]

    # ---- fused embedding lookup: token ids come from SMEM, tables are VMEM-resident ----
    for i in range(BT):
        row = (wemb_ref[seq_ref[i]]                 # dynamic first-axis gather  [H]
               + pemb_ref[i % seq_len]              # static position row        [H]
               + temb_ref[0])                       # token-type 0               [H]
        x_scratch[i] = row

    # residual-free embedding LayerNorm
    x = _layernorm(x_scratch[...], emb_g_ref[...], emb_b_ref[...])      # [BT, H] f32

    mask = mask_ref[...]                                                 # [BT, BT] additive bias

    for l in range(NUM_LAYERS):
        # ---- fused QKV projection (softmax scale is pre-folded into the Q weights/bias) ----
        qkv = _bf16_dot(x, wqkv_ref[l]) + bqkv_ref[l]                    # [BT, 3H] f32
        qkvT = qkv.T.astype(jnp.bfloat16)                                # [3H, BT], single cast

        # head-major layout: aligned sublane slices + tile-preserving reshapes
        qh = qkvT[0 * HIDDEN:1 * HIDDEN, :].reshape(NUM_HEADS, HEAD_DIM, BT)
        kh = qkvT[1 * HIDDEN:2 * HIDDEN, :].reshape(NUM_HEADS, HEAD_DIM, BT)
        vh = qkvT[2 * HIDDEN:3 * HIDDEN, :].reshape(NUM_HEADS, HEAD_DIM, BT)

        # ---- one batched QK^T over all (batch, head) pairs: [NH, BT, BT] ----
        s = jax.lax.dot_general(qh, kh, (((1,), (1,)), ((0,), (0,))),
                                preferred_element_type=jnp.float32)
        s = s + mask[None, :, :]          # padding bias + cross-batch -1e9 mask, added once
        m = jnp.max(s, axis=-1, keepdims=True)
        p = jnp.exp(s - m)
        p = p * pl.reciprocal(jnp.sum(p, axis=-1, keepdims=True), approx=True)

        # ---- one batched P.V:  ctx^T[h, d, q] = sum_s v[h, d, s] * p[h, q, s] ----
        ctxT = jax.lax.dot_general(vh, p.astype(jnp.bfloat16),
                                   (((2,), (2,)), ((0,), (0,))),
                                   preferred_element_type=jnp.float32)   # [NH, HD, BT]
        ctx = ctxT.reshape(HIDDEN, BT).T                                 # [BT, H]

        # ---- attention out-proj + add&LN ----
        attn_out = _bf16_dot(ctx, wo_ref[l]) + bo_ref[l]
        x = _layernorm(x + attn_out, ln1_g_ref[l], ln1_b_ref[l])

        # ---- GELU FFN + add&LN ----
        h_ff = _gelu_tanh(_bf16_dot(x, wi_ref[l]) + bi_ref[l])
        ffn_out = _bf16_dot(h_ff, wo2_ref[l]) + bo2_ref[l]
        x = _layernorm(x + ffn_out, ln2_g_ref[l], ln2_b_ref[l])

    # ---- classifier head on ALL rows (M=16 costs the same MXU pass as M=2); the wrapper
    #      strided-slices the CLS rows.  Output is lane-dense (padded to 128). ----
    l1 = _bf16_dot(x, w1_ref[...]) + b1_ref[...]                         # [BT, 64]
    # TODO(synk): nn.Dropout(0.2) is identity at inference; train-mode masking not implemented.
    logits_ref[...] = _bf16_dot(l1, w2_ref[...]) + b2_ref[...]           # [BT, 128]


# --------------------------- parameter construction --------------------------

def _dense(key, fan_in, fan_out):
    # Weights stored in bf16 (MXU-native); biases in f32.
    w = (jax.random.normal(key, (fan_in, fan_out), jnp.float32) * 0.02).astype(jnp.bfloat16)
    b = jnp.zeros((1, fan_out), jnp.float32)
    return w, b


def init_params(key):
    keys = iter(jax.random.split(key, 3 + NUM_LAYERS * 4 + 2))
    p = {
        "word_emb": jax.random.normal(next(keys), (VOCAB, HIDDEN), jnp.float32) * 0.02,
        "pos_emb": jax.random.normal(next(keys), (MAX_POS, HIDDEN), jnp.float32) * 0.02,
        "type_emb": jax.random.normal(next(keys), (2, HIDDEN), jnp.float32) * 0.02,
        "emb_ln_g": jnp.ones((1, HIDDEN), jnp.float32),
        "emb_ln_b": jnp.zeros((1, HIDDEN), jnp.float32),
    }
    stk = {n: [] for n in ["wqkv", "bqkv", "wo", "bo", "wi", "bi", "wo2", "bo2",
                           "ln1_g", "ln1_b", "ln2_g", "ln2_b"]}
    for _ in range(NUM_LAYERS):
        w, b = _dense(next(keys), HIDDEN, 3 * HIDDEN);   stk["wqkv"].append(w); stk["bqkv"].append(b)
        w, b = _dense(next(keys), HIDDEN, HIDDEN);       stk["wo"].append(w);   stk["bo"].append(b)
        w, b = _dense(next(keys), HIDDEN, INTERMEDIATE); stk["wi"].append(w);   stk["bi"].append(b)
        w, b = _dense(next(keys), INTERMEDIATE, HIDDEN); stk["wo2"].append(w);  stk["bo2"].append(b)
        stk["ln1_g"].append(jnp.ones((1, HIDDEN), jnp.float32))
        stk["ln1_b"].append(jnp.zeros((1, HIDDEN), jnp.float32))
        stk["ln2_g"].append(jnp.ones((1, HIDDEN), jnp.float32))
        stk["ln2_b"].append(jnp.zeros((1, HIDDEN), jnp.float32))
    for n, v in stk.items():
        p[n] = jnp.stack(v)                      # leading layer axis [NUM_LAYERS, ...]
    p["cls_w1"], p["cls_b1"] = _dense(next(keys), HIDDEN, CLS_HIDDEN)
    p["cls_w2"], p["cls_b2"] = _dense(next(keys), CLS_HIDDEN, NUM_CLASSES)
    return p


# -------------------------------- forward pass --------------------------------

def wipo_classifier_forward(params, seq, attn_masks):
    B, T = seq.shape
    BT = B * T
    scale = 1.0 / math.sqrt(HEAD_DIM)

    # Fold the softmax scale into the Q third of the fused QKV weight + bias (free).
    wqkv = params["wqkv"].astype(jnp.float32)
    wqkv = wqkv.at[..., :HIDDEN].multiply(scale).astype(jnp.bfloat16)
    bqkv = params["bqkv"].at[..., :HIDDEN].multiply(scale)

    # Additive attention bias over the flattened (B*T) key axis:
    #   0 for same-batch kept tokens, -10000 for same-batch PAD, -1e9 cross-batch.
    key_bias = (1.0 - attn_masks.astype(jnp.float32)) * -10000.0          # [B, T]
    cross = (1.0 - jnp.eye(B, dtype=jnp.float32)) * -1e9                  # [B, B]
    mask2d = jnp.broadcast_to(cross[:, None, :, None] + key_bias[None, None, :, :],
                              (B, T, B, T)).reshape(BT, BT)

    # Lane-dense padded classifier output ([*, 128] instead of [*, 2]).
    w2p = jnp.zeros((CLS_HIDDEN, OUT_PAD), jnp.bfloat16).at[:, :NUM_CLASSES].set(params["cls_w2"])
    b2p = jnp.zeros((1, OUT_PAD), jnp.float32).at[:, :NUM_CLASSES].set(params["cls_b2"])

    args = (seq.reshape(BT).astype(jnp.int32), mask2d,
            params["word_emb"], params["pos_emb"], params["type_emb"],
            params["emb_ln_g"], params["emb_ln_b"],
            wqkv, bqkv, params["wo"], params["bo"],
            params["ln1_g"], params["ln1_b"],
            params["wi"], params["bi"], params["wo2"], params["bo2"],
            params["ln2_g"], params["ln2_b"],
            params["cls_w1"], params["cls_b1"], w2p, b2p)

    in_specs = ([pl.BlockSpec(memory_space=pltpu.MemorySpace.SMEM)]          # token ids
                + [pl.BlockSpec(memory_space=pltpu.MemorySpace.VMEM)] * (len(args) - 1))

    out = pl.pallas_call(
        functools.partial(_fused_wipo_kernel, seq_len=T),
        out_shape=jax.ShapeDtypeStruct((BT, OUT_PAD), jnp.float32),
        in_specs=in_specs,
        out_specs=pl.BlockSpec(memory_space=pltpu.MemorySpace.VMEM),
        scratch_shapes=[pltpu.VMEM((BT, HIDDEN), jnp.float32)],
        # TODO(synk): at real BERT-base size, add a row grid with
        # dimension_semantics=("parallel",) (v7x dual-TC) and per-layer weight streaming
        # with an explicit vmem_limit_bytes (v7x: 64 MiB physical VMEM).
    )(*args)

    # CLS rows are 0, T, 2T, ...; take them (and the real class columns) outside the kernel.
    return out[0::T, :NUM_CLASSES]                                          # [B, 2]


# --------------------------- pure-JAX reference (check) -----------------------

def _reference_forward(params, seq, attn_masks):
    B, T = seq.shape

    def ln(x, g, b):
        mu = x.mean(-1, keepdims=True)
        var = ((x - mu) ** 2).mean(-1, keepdims=True)
        return (x - mu) / jnp.sqrt(var + LN_EPS) * g + b

    x = (params["word_emb"][seq] + params["pos_emb"][:T][None, :, :]
         + params["type_emb"][0][None, None, :]).reshape(B * T, HIDDEN)
    x = ln(x, params["emb_ln_g"], params["emb_ln_b"])
    mask = (1.0 - attn_masks.astype(jnp.float32)) * -10000.0

    for l in range(NUM_LAYERS):
        qkv = x @ params["wqkv"][l].astype(jnp.float32) + params["bqkv"][l]
        q, k, v = jnp.split(qkv, 3, axis=-1)
        heads = lambda z: z.reshape(B, T, NUM_HEADS, HEAD_DIM).transpose(0, 2, 1, 3)
        qh, kh, vh = heads(q), heads(k), heads(v)
        s = jnp.einsum("bhqd,bhkd->bhqk", qh, kh) / math.sqrt(HEAD_DIM) + mask[:, None, None, :]
        p = jax.nn.softmax(s, axis=-1)
        ctx = jnp.einsum("bhqk,bhkd->bhqd", p, vh).transpose(0, 2, 1, 3).reshape(B * T, HIDDEN)
        attn_out = ctx @ params["wo"][l].astype(jnp.float32) + params["bo"][l]
        x = ln(x + attn_out, params["ln1_g"][l], params["ln1_b"][l])
        c = math.sqrt(2.0 / math.pi)
        h = x @ params["wi"][l].astype(jnp.float32) + params["bi"][l]
        h = 0.5 * h * (1.0 + jnp.tanh(c * (h + 0.044715 * h ** 3)))
        ffn = h @ params["wo2"][l].astype(jnp.float32) + params["bo2"][l]
        x = ln(x + ffn, params["ln2_g"][l], params["ln2_b"][l])

    cls = x.reshape(B, T, HIDDEN)[:, 0]
    l1 = cls @ params["cls_w1"].astype(jnp.float32) + params["cls_b1"]
    return l1 @ params["cls_w2"].astype(jnp.float32) + params["cls_b2"]


# ------------------------------------ main ------------------------------------

if __name__ == "__main__":
    key = jax.random.PRNGKey(0)
    pkey, skey = jax.random.split(key)
    params = init_params(pkey)

    B, T = 2, 8
    seq = jax.random.randint(skey, (B, T), 0, VOCAB, dtype=jnp.int32)
    attn_masks = jnp.array([[1, 1, 1, 1, 1, 1, 1, 1],
                            [1, 1, 1, 1, 1, 0, 0, 0]], dtype=jnp.int32)

    logits = jax.jit(wipo_classifier_forward)(params, seq, attn_masks)
    logits = jax.block_until_ready(logits)

    assert logits.shape == (B, NUM_CLASSES) and logits.dtype == jnp.float32
    ref = _reference_forward(params, seq, attn_masks)
    assert bool(jnp.allclose(logits, ref, atol=2e-2, rtol=2e-2)), (logits, ref)
    print("KERNEL_OK")
</pallas_src>

<mosaic_0001>
module attributes {stable_mosaic.version = 11 : i64} {
  func.func @_fused_wipo_kernel(%arg0: memref<16xi32, #tpu.memory_space<smem>>, %arg1: memref<16x16xf32, #tpu.memory_space<vmem>>, %arg2: memref<100x128xf32, #tpu.memory_space<vmem>>, %arg3: memref<32x128xf32, #tpu.memory_space<vmem>>, %arg4: memref<2x128xf32, #tpu.memory_space<vmem>>, %arg5: memref<1x128xf32, #tpu.memory_space<vmem>>, %arg6: memref<1x128xf32, #tpu.memory_space<vmem>>, %arg7: memref<2x128x384xbf16, #tpu.memory_space<vmem>>, %arg8: memref<2x1x384xf32, #tpu.memory_space<vmem>>, %arg9: memref<2x128x128xbf16, #tpu.memory_space<vmem>>, %arg10: memref<2x1x128xf32, #tpu.memory_space<vmem>>, %arg11: memref<2x1x128xf32, #tpu.memory_space<vmem>>, %arg12: memref<2x1x128xf32, #tpu.memory_space<vmem>>, %arg13: memref<2x128x256xbf16, #tpu.memory_space<vmem>>, %arg14: memref<2x1x256xf32, #tpu.memory_space<vmem>>, %arg15: memref<2x256x128xbf16, #tpu.memory_space<vmem>>, %arg16: memref<2x1x128xf32, #tpu.memory_space<vmem>>, %arg17: memref<2x1x128xf32, #tpu.memory_space<vmem>>, %arg18: memref<2x1x128xf32, #tpu.memory_space<vmem>>, %arg19: memref<128x64xbf16, #tpu.memory_space<vmem>>, %arg20: memref<1x64xf32, #tpu.memory_space<vmem>>, %arg21: memref<64x128xbf16, #tpu.memory_space<vmem>>, %arg22: memref<1x128xf32, #tpu.memory_space<vmem>>, %arg23: memref<16x128xf32, #tpu.memory_space<vmem>>, %arg24: memref<16x128xf32, #tpu.memory_space<vmem>>) attributes {dimension_semantics = [], scalar_prefetch = 0 : i64, scratch_operands = 1 : i64, tpu.core_type = #tpu.core_type<tc>} {
    %c0 = arith.constant 0 : index
    %0 = memref.load %arg0[%c0] : memref<16xi32, #tpu.memory_space<smem>>
    %1 = arith.index_cast %0 : i32 to index
    %c0_0 = arith.constant 0 : index
    %2 = vector.load %arg2[%1, %c0_0] : memref<100x128xf32, #tpu.memory_space<vmem>>, vector<1x128xf32>
    %3 = vector.shape_cast %2 : vector<1x128xf32> to vector<128xf32>
    %c0_1 = arith.constant 0 : index
    %c0_2 = arith.constant 0 : index
    %4 = vector.load %arg3[%c0_1, %c0_2] : memref<32x128xf32, #tpu.memory_space<vmem>>, vector<1x128xf32>
    %5 = vector.shape_cast %4 : vector<1x128xf32> to vector<128xf32>
    %6 = arith.addf %3, %5 : vector<128xf32>
    %c0_3 = arith.constant 0 : index
    %c0_4 = arith.constant 0 : index
    %7 = vector.load %arg4[%c0_3, %c0_4] : memref<2x128xf32, #tpu.memory_space<vmem>>, vector<1x128xf32>
    %8 = vector.shape_cast %7 : vector<1x128xf32> to vector<128xf32>
    %9 = arith.addf %6, %8 : vector<128xf32>
    %c0_5 = arith.constant 0 : index
    %c0_6 = arith.constant 0 : index
    %10 = vector.load %arg24[%c0_5, %c0_6] : memref<16x128xf32, #tpu.memory_space<vmem>>, vector<1x128xf32>
    %11 = vector.shape_cast %10 : vector<1x128xf32> to vector<128xf32>
    %12 = vector.shape_cast %9 : vector<128xf32> to vector<1x128xf32>
    tpu.vector_store %arg24[%c0_5, %c0_6], %12 {strides = array<i32>} : memref<16x128xf32, #tpu.memory_space<vmem>>, vector<1x128xf32>,
    %c1 = arith.constant 1 : index
    %13 = memref.load %arg0[%c1] : memref<16xi32, #tpu.memory_space<smem>>
    %14 = arith.index_cast %13 : i32 to index
    %c0_7 = arith.constant 0 : index
    %15 = vector.load %arg2[%14, %c0_7] : memref<100x128xf32, #tpu.memory_space<vmem>>, vector<1x128xf32>
    %16 = vector.shape_cast %15 : vector<1x128xf32> to vector<128xf32>
    %c1_8 = arith.constant 1 : index
    %c0_9 = arith.constant 0 : index
    %17 = vector.load %arg3[%c1_8, %c0_9] : memref<32x128xf32, #tpu.memory_space<vmem>>, vector<1x128xf32>
    %18 = vector.shape_cast %17 : vector<1x128xf32> to vector<128xf32>
    %19 = arith.addf %16, %18 : vector<128xf32>
    %c0_10 = arith.constant 0 : index
    %c0_11 = arith.constant 0 : index
    %20 = vector.load %arg4[%c0_10, %c0_11] : memref<2x128xf32, #tpu.memory_space<vmem>>, vector<1x128xf32>
    %21 = vector.shape_cast %20 : vector<1x128xf32> to vector<128xf32>
    %22 = arith.addf %19, %21 : vector<128xf32>
    %c1_12 = arith.constant 1 : index
    %c0_13 = arith.constant 0 : index
    %23 = vector.load %arg24[%c1_12, %c0_13] : memref<16x128xf32, #tpu.memory_space<vmem>>, vector<1x128xf32>
    %24 = vector.shape_cast %23 : vector<1x128xf32> to vector<128xf32>
    %25 = vector.shape_cast %22 : vector<128xf32> to vector<1x128xf32>
    tpu.vector_store %arg24[%c1_12, %c0_13], %25 {strides = array<i32>} : memref<16x128xf32, #tpu.memory_space<vmem>>, vector<1x128xf32>,
    %c2 = arith.constant 2 : index
    %26 = memref.load %arg0[%c2] : memref<16xi32, #tpu.memory_space<smem>>
    %27 = arith.index_cast %26 : i32 to index
    %c0_14 = arith.constant 0 : index
    %28 = vector.load %arg2[%27, %c0_14] : memref<100x128xf32, #tpu.memory_space<vmem>>, vector<1x128xf32>
    %29 = vector.shape_cast %28 : vector<1x128xf32> to vector<128xf32>
    %c2_15 = arith.constant 2 : index
    %c0_16 = arith.constant 0 : index
    %30 = vector.load %arg3[%c2_15, %c0_16] : memref<32x128xf32, #tpu.memory_space<vmem>>, vector<1x128xf32>
    %31 = vector.shape_cast %30 : vector<1x128xf32> to vector<128xf32>
    %32 = arith.addf %29, %31 : vector<128xf32>
    %c0_17 = arith.constant 0 : index
    %c0_18 = arith.constant 0 : index
    %33 = vector.load %arg4[%c0_17, %c0_18] : memref<2x128xf32, #tpu.memory_space<vmem>>, vector<1x128xf32>
    %34 = vector.shape_cast %33 : vector<1x128xf32> to vector<128xf32>
    %35 = arith.addf %32, %34 : vector<128xf32>
    %c2_19 = arith.constant 2 : index
    %c0_20 = arith.constant 0 : index
    %36 = vector.load %arg24[%c2_19, %c0_20] : memref<16x128xf32, #tpu.memory_space<vmem>>, vector<1x128xf32>
    %37 = vector.shape_cast %36 : vector<1x128xf32> to vector<128xf32>
    %38 = vector.shape_cast %35 : vector<128xf32> to vector<1x128xf32>
    tpu.vector_store %arg24[%c2_19, %c0_20], %38 {strides = array<i32>} : memref<16x128xf32, #tpu.memory_space<vmem>>, vector<1x128xf32>,
    %c3 = arith.constant 3 : index
    %39 = memref.load %arg0[%c3] : memref<16xi32, #tpu.memory_space<smem>>
    %40 = arith.index_cast %39 : i32 to index
    %c0_21 = arith.constant 0 : index
    %41 = vector.load %arg2[%40, %c0_21] : memref<100x128xf32, #tpu.memory_space<vmem>>, vector<1x128xf32>
    %42 = vector.shape_cast %41 : vector<1x128xf32> to vector<128xf32>
    %c3_22 = arith.constant 3 : index
    %c0_23 = arith.constant 0 : index
    %43 = vector.load %arg3[%c3_22, %c0_23] : memref<32x128xf32, #tpu.memory_space<vmem>>, vector<1x128xf32>
    %44 = vector.shape_cast %43 : vector<1x128xf32> to vector<128xf32>
    %45 = arith.addf %42, %44 : vector<128xf32>
    %c0_24 = arith.constant 0 : index
    %c0_25 = arith.constant 0 : index
    %46 = vector.load %arg4[%c0_24, %c0_25] : memref<2x128xf32, #tpu.memory_space<vmem>>, vector<1x128xf32>
    %47 = vector.shape_cast %46 : vector<1x128xf32> to vector<128xf32>
    %48 = arith.addf %45, %47 : vector<128xf32>
    %c3_26 = arith.constant 3 : index
    %c0_27 = arith.constant 0 : index
    %49 = vector.load %arg24[%c3_26, %c0_27] : memref<16x128xf32, #tpu.memory_space<vmem>>, vector<1x128xf32>
    %50 = vector.shape_cast %49 : vector<1x128xf32> to vector<128xf32>
    %51 = vector.shape_cast %48 : vector<128xf32> to vector<1x128xf32>
    tpu.vector_store %arg24[%c3_26, %c0_27], %51 {strides = array<i32>} : memref<16x128xf32, #tpu.memory_space<vmem>>, vector<1x128xf32>,
    %c4 = arith.constant 4 : index
    %52 = memref.load %arg0[%c4] : memref<16xi32, #tpu.memory_space<smem>>
    %53 = arith.index_cast %52 : i32 to index
    %c0_28 = arith.constant 0 : index
    %54 = vector.load %arg2[%53, %c0_28] : memref<100x128xf32, #tpu.memory_space<vmem>>, vector<1x128xf32>
    %55 = vector.shape_cast %54 : vector<1x128xf32> to vector<128xf32>
    %c4_29 = arith.constant 4 : index
    %c0_30 = arith.constant 0 : index
    %56 = vector.load %arg3[%c4_29, %c0_30] : memref<32x128xf32, #tpu.memory_space<vmem>>, vector<1x128xf32>
    %57 = vector.shape_cast %56 : vector<1x128xf32> to vector<128xf32>
    %58 = arith.addf %55, %57 : vector<128xf32>
    %c0_31 = arith.constant 0 : index
    %c0_32 = arith.constant 0 : index
    %59 = vector.load %arg4[%c0_31, %c0_32] : memref<2x128xf32, #tpu.memory_space<vmem>>, vector<1x128xf32>
    %60 = vector.shape_cast %59 : vector<1x128xf32> to vector<128xf32>
    %61 = arith.addf %58, %60 : vector<128xf32>
    %c4_33 = arith.constant 4 : index
    %c0_34 = arith.constant 0 : index
    %62 = vector.load %arg24[%c4_33, %c0_34] : memref<16x128xf32, #tpu.memory_space<vmem>>, vector<1x128xf32>
    %63 = vector.shape_cast %62 : vector<1x128xf32> to vector<128xf32>
    %64 = vector.shape_cast %61 : vector<128xf32> to vector<1x128xf32>
    tpu.vector_store %arg24[%c4_33, %c0_34], %64 {strides = array<i32>} : memref<16x128xf32, #tpu.memory_space<vmem>>, vector<1x128xf32>,
    %c5 = arith.constant 5 : index
    %65 = memref.load %arg0[%c5] : memref<16xi32, #tpu.memory_space<smem>>
    %66 = arith.index_cast %65 : i32 to index
    %c0_35 = arith.constant 0 : index
    %67 = vector.load %arg2[%66, %c0_35] : memref<100x128xf32, #tpu.memory_space<vmem>>, vector<1x128xf32>
    %68 = vector.shape_cast %67 : vector<1x128xf32> to vector<128xf32>
    %c5_36 = arith.constant 5 : index
    %c0_37 = arith.constant 0 : index
    %69 = vector.load %arg3[%c5_36, %c0_37] : memref<32x128xf32, #tpu.memory_space<vmem>>, vector<1x128xf32>
    %70 = vector.shape_cast %69 : vector<1x128xf32> to vector<128xf32>
    %71 = arith.addf %68, %70 : vector<128xf32>
    %c0_38 = arith.constant 0 : index
    %c0_39 = arith.constant 0 : index
    %72 = vector.load %arg4[%c0_38, %c0_39] : memref<2x128xf32, #tpu.memory_space<vmem>>, vector<1x128xf32>
    %73 = vector.shape_cast %72 : vector<1x128xf32> to vector<128xf32>
    %74 = arith.addf %71, %73 : vector<128xf32>
    %c5_40 = arith.constant 5 : index
    %c0_41 = arith.constant 0 : index
    %75 = vector.load %arg24[%c5_40, %c0_41] : memref<16x128xf32, #tpu.memory_space<vmem>>, vector<1x128xf32>
    %76 = vector.shape_cast %75 : vector<1x128xf32> to vector<128xf32>
    %77 = vector.shape_cast %74 : vector<128xf32> to vector<1x128xf32>
    tpu.vector_store %arg24[%c5_40, %c0_41], %77 {strides = array<i32>} : memref<16x128xf32, #tpu.memory_space<vmem>>, vector<1x128xf32>,
    %c6 = arith.constant 6 : index
    %78 = memref.load %arg0[%c6] : memref<16xi32, #tpu.memory_space<smem>>
    %79 = arith.index_cast %78 : i32 to index
    %c0_42 = arith.constant 0 : index
    %80 = vector.load %arg2[%79, %c0_42] : memref<100x128xf32, #tpu.memory_space<vmem>>, vector<1x128xf32>
    %81 = vector.shape_cast %80 : vector<1x128xf32> to vector<128xf32>
    %c6_43 = arith.constant 6 : index
    %c0_44 = arith.constant 0 : index
    %82 = vector.load %arg3[%c6_43, %c0_44] : memref<32x128xf32, #tpu.memory_space<vmem>>, vector<1x128xf32>
    %83 = vector.shape_cast %82 : vector<1x128xf32> to vector<128xf32>
    %84 = arith.addf %81, %83 : vector<128xf32>
    %c0_45 = arith.constant 0 : index
    %c0_46 = arith.constant 0 : index
    %85 = vector.load %arg4[%c0_45, %c0_46] : memref<2x128xf32, #tpu.memory_space<vmem>>, vector<1x128xf32>
    %86 = vector.shape_cast %85 : vector<1x128xf32> to vector<128xf32>
    %87 = arith.addf %84, %86 : vector<128xf32>
    %c6_47 = arith.constant 6 : index
    %c0_48 = arith.constant 0 : index
    %88 = vector.load %arg24[%c6_47, %c0_48] : memref<16x128xf32, #tpu.memory_space<vmem>>, vector<1x128xf32>
    %89 = vector.shape_cast %88 : vector<1x128xf32> to vector<128xf32>
    %90 = vector.shape_cast %87 : vector<128xf32> to vector<1x128xf32>
    tpu.vector_store %arg24[%c6_47, %c0_48], %90 {strides = array<i32>} : memref<16x128xf32, #tpu.memory_space<vmem>>, vector<1x128xf32>,
    %c7 = arith.constant 7 : index
    %91 = memref.load %arg0[%c7] : memref<16xi32, #tpu.memory_space<smem>>
    %92 = arith.index_cast %91 : i32 to index
    %c0_49 = arith.constant 0 : index
    %93 = vector.load %arg2[%92, %c0_49] : memref<100x128xf32, #tpu.memory_space<vmem>>, vector<1x128xf32>
    %94 = vector.shape_cast %93 : vector<1x128xf32> to vector<128xf32>
    %c7_50 = arith.constant 7 : index
    %c0_51 = arith.constant 0 : index
    %95 = vector.load %arg3[%c7_50, %c0_51] : memref<32x128xf32, #tpu.memory_space<vmem>>, vector<1x128xf32>
    %96 = vector.shape_cast %95 : vector<1x128xf32> to vector<128xf32>
    %97 = arith.addf %94, %96 : vector<128xf32>
    %c0_52 = arith.constant 0 : index
    %c0_53 = arith.constant 0 : index
    %98 = vector.load %arg4[%c0_52, %c0_53] : memref<2x128xf32, #tpu.memory_space<vmem>>, vector<1x128xf32>
    %99 = vector.shape_cast %98 : vector<1x128xf32> to vector<128xf32>
    %100 = arith.addf %97, %99 : vector<128xf32>
    %c7_54 = arith.constant 7 : index
    %c0_55 = arith.constant 0 : index
    %101 = vector.load %arg24[%c7_54, %c0_55] : memref<16x128xf32, #tpu.memory_space<vmem>>, vector<1x128xf32>
    %102 = vector.shape_cast %101 : vector<1x128xf32> to vector<128xf32>
    %103 = vector.shape_cast %100 : vector<128xf32> to vector<1x128xf32>
    tpu.vector_store %arg24[%c7_54, %c0_55], %103 {strides = array<i32>} : memref<16x128xf32, #tpu.memory_space<vmem>>, vector<1x128xf32>,
    %c8 = arith.constant 8 : index
    %104 = memref.load %arg0[%c8] : memref<16xi32, #tpu.memory_space<smem>>
    %105 = arith.index_cast %104 : i32 to index
    %c0_56 = arith.constant 0 : index
    %106 = vector.load %arg2[%105, %c0_56] : memref<100x128xf32, #tpu.memory_space<vmem>>, vector<1x128xf32>
    %107 = vector.shape_cast %106 : vector<1x128xf32> to vector<128xf32>
    %c0_57 = arith.constant 0 : index
    %c0_58 = arith.constant 0 : index
    %108 = vector.load %arg3[%c0_57, %c0_58] : memref<32x128xf32, #tpu.memory_space<vmem>>, vector<1x128xf32>
    %109 = vector.shape_cast %108 : vector<1x128xf32> to vector<128xf32>
    %110 = arith.addf %107, %109 : vector<128xf32>
    %c0_59 = arith.constant 0 : index
    %c0_60 = arith.constant 0 : index
    %111 = vector.load %arg4[%c0_59, %c0_60] : memref<2x128xf32, #tpu.memory_space<vmem>>, vector<1x128xf32>
    %112 = vector.shape_cast %111 : vector<1x128xf32> to vector<128xf32>
    %113 = arith.addf %110, %112 : vector<128xf32>
    %c8_61 = arith.constant 8 : index
    %c0_62 = arith.constant 0 : index
    %114 = vector.load %arg24[%c8_61, %c0_62] : memref<16x128xf32, #tpu.memory_space<vmem>>, vector<1x128xf32>
    %115 = vector.shape_cast %114 : vector<1x128xf32> to vector<128xf32>
    %116 = vector.shape_cast %113 : vector<128xf32> to vector<1x128xf32>
    tpu.vector_store %arg24[%c8_61, %c0_62], %116 {strides = array<i32>} : memref<16x128xf32, #tpu.memory_space<vmem>>, vector<1x128xf32>,
    %c9 = arith.constant 9 : index
    %117 = memref.load %arg0[%c9] : memref<16xi32, #tpu.memory_space<smem>>
    %118 = arith.index_cast %117 : i32 to index
    %c0_63 = arith.constant 0 : index
    %119 = vector.load %arg2[%118, %c0_63] : memref<100x128xf32, #tpu.memory_space<vmem>>, vector<1x128xf32>
    %120 = vector.shape_cast %119 : vector<1x128xf32> to vector<128xf32>
    %c1_64 = arith.constant 1 : index
    %c0_65 = arith.constant 0 : index
    %121 = vector.load %arg3[%c1_64, %c0_65] : memref<32x128xf32, #tpu.memory_space<vmem>>, vector<1x128xf32>
    %122 = vector.shape_cast %121 : vector<1x128xf32> to vector<128xf32>
    %123 = arith.addf %120, %122 : vector<128xf32>
    %c0_66 = arith.constant 0 : index
    %c0_67 = arith.constant 0 : index
    %124 = vector.load %arg4[%c0_66, %c0_67] : memref<2x128xf32, #tpu.memory_space<vmem>>, vector<1x128xf32>
    %125 = vector.shape_cast %124 : vector<1x128xf32> to vector<128xf32>
    %126 = arith.addf %123, %125 : vector<128xf32>
    %c9_68 = arith.constant 9 : index
    %c0_69 = arith.constant 0 : index
    %127 = vector.load %arg24[%c9_68, %c0_69] : memref<16x128xf32, #tpu.memory_space<vmem>>, vector<1x128xf32>
    %128 = vector.shape_cast %127 : vector<1x128xf32> to vector<128xf32>
    %129 = vector.shape_cast %126 : vector<128xf32> to vector<1x128xf32>
    tpu.vector_store %arg24[%c9_68, %c0_69], %129 {strides = array<i32>} : memref<16x128xf32, #tpu.memory_space<vmem>>, vector<1x128xf32>,
    %c10 = arith.constant 10 : index
    %130 = memref.load %arg0[%c10] : memref<16xi32, #tpu.memory_space<smem>>
    %131 = arith.index_cast %130 : i32 to index
    %c0_70 = arith.constant 0 : index
    %132 = vector.load %arg2[%131, %c0_70] : memref<100x128xf32, #tpu.memory_space<vmem>>, vector<1x128xf32>
    %133 = vector.shape_cast %132 : vector<1x128xf32> to vector<128xf32>
    %c2_71 = arith.constant 2 : index
    %c0_72 = arith.constant 0 : index
    %134 = vector.load %arg3[%c2_71, %c0_72] : memref<32x128xf32, #tpu.memory_space<vmem>>, vector<1x128xf32>
    %135 = vector.shape_cast %134 : vector<1x128xf32> to vector<128xf32>
    %136 = arith.addf %133, %135 : vector<128xf32>
    %c0_73 = arith.constant 0 : index
    %c0_74 = arith.constant 0 : index
    %137 = vector.load %arg4[%c0_73, %c0_74] : memref<2x128xf32, #tpu.memory_space<vmem>>, vector<1x128xf32>
    %138 = vector.shape_cast %137 : vector<1x128xf32> to vector<128xf32>
    %139 = arith.addf %136, %138 : vector<128xf32>
    %c10_75 = arith.constant 10 : index
    %c0_76 = arith.constant 0 : index
    %140 = vector.load %arg24[%c10_75, %c0_76] : memref<16x128xf32, #tpu.memory_space<vmem>>, vector<1x128xf32>
    %141 = vector.shape_cast %140 : vector<1x128xf32> to vector<128xf32>
    %142 = vector.shape_cast %139 : vector<128xf32> to vector<1x128xf32>
    tpu.vector_store %arg24[%c10_75, %c0_76], %142 {strides = array<i32>} : memref<16x128xf32, #tpu.memory_space<vmem>>, vector<1x128xf32>,
    %c11 = arith.constant 11 : index
    %143 = memref.load %arg0[%c11] : memref<16xi32, #tpu.memory_space<smem>>
    %144 = arith.index_cast %143 : i32 to index
    %c0_77 = arith.constant 0 : index
    %145 = vector.load %arg2[%144, %c0_77] : memref<100x128xf32, #tpu.memory_space<vmem>>, vector<1x128xf32>
    %146 = vector.shape_cast %145 : vector<1x128xf32> to vector<128xf32>
    %c3_78 = arith.constant 3 : index
    %c0_79 = arith.constant 0 : index
    %147 = vector.load %arg3[%c3_78, %c0_79] : memref<32x128xf32, #tpu.memory_space<vmem>>, vector<1x128xf32>
    %148 = vector.shape_cast %147 : vector<1x128xf32> to vector<128xf32>
    %149 = arith.addf %146, %148 : vector<128xf32>
    %c0_80 = arith.constant 0 : index
    %c0_81 = arith.constant 0 : index
    %150 = vector.load %arg4[%c0_80, %c0_81] : memref<2x128xf32, #tpu.memory_space<vmem>>, vector<1x128xf32>
    %151 = vector.shape_cast %150 : vector<1x128xf32> to vector<128xf32>
    %152 = arith.addf %149, %151 : vector<128xf32>
    %c11_82 = arith.constant 11 : index
    %c0_83 = arith.constant 0 : index
    %153 = vector.load %arg24[%c11_82, %c0_83] : memref<16x128xf32, #tpu.memory_space<vmem>>, vector<1x128xf32>
    %154 = vector.shape_cast %153 : vector<1x128xf32> to vector<128xf32>
    %155 = vector.shape_cast %152 : vector<128xf32> to vector<1x128xf32>
    tpu.vector_store %arg24[%c11_82, %c0_83], %155 {strides = array<i32>} : memref<16x128xf32, #tpu.memory_space<vmem>>, vector<1x128xf32>,
    %c12 = arith.constant 12 : index
    %156 = memref.load %arg0[%c12] : memref<16xi32, #tpu.memory_space<smem>>
    %157 = arith.index_cast %156 : i32 to index
    %c0_84 = arith.constant 0 : index
    %158 = vector.load %arg2[%157, %c0_84] : memref<100x128xf32, #tpu.memory_space<vmem>>, vector<1x128xf32>
    %159 = vector.shape_cast %158 : vector<1x128xf32> to vector<128xf32>
    %c4_85 = arith.constant 4 : index
    %c0_86 = arith.constant 0 : index
    %160 = vector.load %arg3[%c4_85, %c0_86] : memref<32x128xf32, #tpu.memory_space<vmem>>, vector<1x128xf32>
    %161 = vector.shape_cast %160 : vector<1x128xf32> to vector<128xf32>
    %162 = arith.addf %159, %161 : vector<128xf32>
    %c0_87 = arith.constant 0 : index
    %c0_88 = arith.constant 0 : index
    %163 = vector.load %arg4[%c0_87, %c0_88] : memref<2x128xf32, #tpu.memory_space<vmem>>, vector<1x128xf32>
    %164 = vector.shape_cast %163 : vector<1x128xf32> to vector<128xf32>
    %165 = arith.addf %162, %164 : vector<128xf32>
    %c12_89 = arith.constant 12 : index
    %c0_90 = arith.constant 0 : index
    %166 = vector.load %arg24[%c12_89, %c0_90] : memref<16x128xf32, #tpu.memory_space<vmem>>, vector<1x128xf32>
    %167 = vector.shape_cast %166 : vector<1x128xf32> to vector<128xf32>
    %168 = vector.shape_cast %165 : vector<128xf32> to vector<1x128xf32>
    tpu.vector_store %arg24[%c12_89, %c0_90], %168 {strides = array<i32>} : memref<16x128xf32, #tpu.memory_space<vmem>>, vector<1x128xf32>,
    %c13 = arith.constant 13 : index
    %169 = memref.load %arg0[%c13] : memref<16xi32, #tpu.memory_space<smem>>
    %170 = arith.index_cast %169 : i32 to index
    %c0_91 = arith.constant 0 : index
    %171 = vector.load %arg2[%170, %c0_91] : memref<100x128xf32, #tpu.memory_space<vmem>>, vector<1x128xf32>
    %172 = vector.shape_cast %171 : vector<1x128xf32> to vector<128xf32>
    %c5_92 = arith.constant 5 : index
    %c0_93 = arith.constant 0 : index
    %173 = vector.load %arg3[%c5_92, %c0_93] : memref<32x128xf32, #tpu.memory_space<vmem>>, vector<1x128xf32>
    %174 = vector.shape_cast %173 : vector<1x128xf32> to vector<128xf32>
    %175 = arith.addf %172, %174 : vector<128xf32>
    %c0_94 = arith.constant 0 : index
    %c0_95 = arith.constant 0 : index
    %176 = vector.load %arg4[%c0_94, %c0_95] : memref<2x128xf32, #tpu.memory_space<vmem>>, vector<1x128xf32>
    %177 = vector.shape_cast %176 : vector<1x128xf32> to vector<128xf32>
    %178 = arith.addf %175, %177 : vector<128xf32>
    %c13_96 = arith.constant 13 : index
    %c0_97 = arith.constant 0 : index
    %179 = vector.load %arg24[%c13_96, %c0_97] : memref<16x128xf32, #tpu.memory_space<vmem>>, vector<1x128xf32>
    %180 = vector.shape_cast %179 : vector<1x128xf32> to vector<128xf32>
    %181 = vector.shape_cast %178 : vector<128xf32> to vector<1x128xf32>
    tpu.vector_store %arg24[%c13_96, %c0_97], %181 {strides = array<i32>} : memref<16x128xf32, #tpu.memory_space<vmem>>, vector<1x128xf32>,
    %c14 = arith.constant 14 : index
    %182 = memref.load %arg0[%c14] : memref<16xi32, #tpu.memory_space<smem>>
    %183 = arith.index_cast %182 : i32 to index
    %c0_98 = arith.constant 0 : index
    %184 = vector.load %arg2[%183, %c0_98] : memref<100x128xf32, #tpu.memory_space<vmem>>, vector<1x128xf32>
    %185 = vector.shape_cast %184 : vector<1x128xf32> to vector<128xf32>
    %c6_99 = arith.constant 6 : index
    %c0_100 = arith.constant 0 : index
    %186 = vector.load %arg3[%c6_99, %c0_100] : memref<32x128xf32, #tpu.memory_space<vmem>>, vector<1x128xf32>
    %187 = vector.shape_cast %186 : vector<1x128xf32> to vector<128xf32>
    %188 = arith.addf %185, %187 : vector<128xf32>
    %c0_101 = arith.constant 0 : index
    %c0_102 = arith.constant 0 : index
    %189 = vector.load %arg4[%c0_101, %c0_102] : memref<2x128xf32, #tpu.memory_space<vmem>>, vector<1x128xf32>
    %190 = vector.shape_cast %189 : vector<1x128xf32> to vector<128xf32>
    %191 = arith.addf %188, %190 : vector<128xf32>
    %c14_103 = arith.constant 14 : index
    %c0_104 = arith.constant 0 : index
    %192 = vector.load %arg24[%c14_103, %c0_104] : memref<16x128xf32, #tpu.memory_space<vmem>>, vector<1x128xf32>
    %193 = vector.shape_cast %192 : vector<1x128xf32> to vector<128xf32>
    %194 = vector.shape_cast %191 : vector<128xf32> to vector<1x128xf32>
    tpu.vector_store %arg24[%c14_103, %c0_104], %194 {strides = array<i32>} : memref<16x128xf32, #tpu.memory_space<vmem>>, vector<1x128xf32>,
    %c15 = arith.constant 15 : index
    %195 = memref.load %arg0[%c15] : memref<16xi32, #tpu.memory_space<smem>>
    %196 = arith.index_cast %195 : i32 to index
    %c0_105 = arith.constant 0 : index
    %197 = vector.load %arg2[%196, %c0_105] : memref<100x128xf32, #tpu.memory_space<vmem>>, vector<1x128xf32>
    %198 = vector.shape_cast %197 : vector<1x128xf32> to vector<128xf32>
    %c7_106 = arith.constant 7 : index
    %c0_107 = arith.constant 0 : index
    %199 = vector.load %arg3[%c7_106, %c0_107] : memref<32x128xf32, #tpu.memory_space<vmem>>, vector<1x128xf32>
    %200 = vector.shape_cast %199 : vector<1x128xf32> to vector<128xf32>
    %201 = arith.addf %198, %200 : vector<128xf32>
    %c0_108 = arith.constant 0 : index
    %c0_109 = arith.constant 0 : index
    %202 = vector.load %arg4[%c0_108, %c0_109] : memref<2x128xf32, #tpu.memory_space<vmem>>, vector<1x128xf32>
    %203 = vector.shape_cast %202 : vector<1x128xf32> to vector<128xf32>
    %204 = arith.addf %201, %203 : vector<128xf32>
    %c15_110 = arith.constant 15 : index
    %c0_111 = arith.constant 0 : index
    %205 = vector.load %arg24[%c15_110, %c0_111] : memref<16x128xf32, #tpu.memory_space<vmem>>, vector<1x128xf32>
    %206 = vector.shape_cast %205 : vector<1x128xf32> to vector<128xf32>
    %207 = vector.shape_cast %204 : vector<128xf32> to vector<1x128xf32>
    tpu.vector_store %arg24[%c15_110, %c0_111], %207 {strides = array<i32>} : memref<16x128xf32, #tpu.memory_space<vmem>>, vector<1x128xf32>,
    %c0_112 = arith.constant 0 : index
    %c0_113 = arith.constant 0 : index
    %208 = vector.load %arg24[%c0_112, %c0_113] : memref<16x128xf32, #tpu.memory_space<vmem>>, vector<16x128xf32>
    %c0_114 = arith.constant 0 : index
    %c0_115 = arith.constant 0 : index
    %209 = vector.load %arg5[%c0_114, %c0_115] : memref<1x128xf32, #tpu.memory_space<vmem>>, vector<1x128xf32>
    %c0_116 = arith.constant 0 : index
    %c0_117 = arith.constant 0 : index
    %210 = vector.load %arg6[%c0_116, %c0_117] : memref<1x128xf32, #tpu.memory_space<vmem>>, vector<1x128xf32>
    %cst = arith.constant dense<0.000000e+00> : vector<16xf32>
    %211 = vector.multi_reduction <add>, %208, %cst [1] : vector<16x128xf32> to vector<16xf32>
    %212 = vector.shape_cast %211 : vector<16xf32> to vector<16x1xf32>
    %cst_118 = arith.constant 1.280000e+02 : f32
    %213 = vector.broadcast %cst_118 : f32 to vector<16x1xf32>
    %214 = arith.divf %212, %213 : vector<16x1xf32>
    %215 = vector.broadcast %214 : vector<16x1xf32> to vector<16x128xf32>
    %216 = arith.subf %208, %215 : vector<16x128xf32>
    %217 = arith.mulf %216, %216 : vector<16x128xf32>
    %cst_119 = arith.constant dense<0.000000e+00> : vector<16xf32>
    %218 = vector.multi_reduction <add>, %217, %cst_119 [1] : vector<16x128xf32> to vector<16xf32>
    %219 = vector.shape_cast %218 : vector<16xf32> to vector<16x1xf32>
    %cst_120 = arith.constant 1.280000e+02 : f32
    %220 = vector.broadcast %cst_120 : f32 to vector<16x1xf32>
    %221 = arith.divf %219, %220 : vector<16x1xf32>
    %222 = vector.broadcast %214 : vector<16x1xf32> to vector<16x128xf32>
    %223 = arith.subf %208, %222 : vector<16x128xf32>
    %cst_121 = arith.constant 9.99999996E-13 : f32
    %224 = vector.broadcast %cst_121 : f32 to vector<16x1xf32>
    %225 = arith.addf %221, %224 : vector<16x1xf32>
    %226 = math.rsqrt %225 : vector<16x1xf32>
    %227 = vector.broadcast %226 : vector<16x1xf32> to vector<16x128xf32>
    %228 = arith.mulf %223, %227 : vector<16x128xf32>
    %229 = vector.broadcast %209 : vector<1x128xf32> to vector<16x128xf32>
    %230 = arith.mulf %228, %229 : vector<16x128xf32>
    %231 = vector.broadcast %210 : vector<1x128xf32> to vector<16x128xf32>
    %232 = arith.addf %230, %231 : vector<16x128xf32>
    %c0_122 = arith.constant 0 : index
    %c0_123 = arith.constant 0 : index
    %233 = vector.load %arg1[%c0_122, %c0_123] : memref<16x16xf32, #tpu.memory_space<vmem>>, vector<16x16xf32>
    %c0_124 = arith.constant 0 : index
    %c0_125 = arith.constant 0 : index
    %c0_126 = arith.constant 0 : index
    %234 = vector.load %arg7[%c0_124, %c0_125, %c0_126] : memref<2x128x384xbf16, #tpu.memory_space<vmem>>, vector<1x128x384xbf16>
    %235 = vector.shape_cast %234 : vector<1x128x384xbf16> to vector<128x384xbf16>
    %236 = arith.truncf %232 : vector<16x128xf32> to vector<16x128xbf16>
    %cst_127 = arith.constant dense<0.000000e+00> : vector<16x384xf32>
    %237 = tpu.matmul %236, %235, %cst_127 {dimension_numbers = #tpu.dot_dimension_numbers<[1], [0], [0], [1], [0, 0, 1, 1], [], []>} : vector<16x128xbf16>, vector<128x384xbf16>, vector<16x384xf32> -> vector<16x384xf32>
    %c0_128 = arith.constant 0 : index
    %c0_129 = arith.constant 0 : index
    %c0_130 = arith.constant 0 : index
    %238 = vector.load %arg8[%c0_128, %c0_129, %c0_130] : memref<2x1x384xf32, #tpu.memory_space<vmem>>, vector<1x1x384xf32>
    %239 = vector.shape_cast %238 : vector<1x1x384xf32> to vector<1x384xf32>
    %240 = vector.broadcast %239 : vector<1x384xf32> to vector<16x384xf32>
    %241 = arith.addf %237, %240 : vector<16x384xf32>
    %242 = tpu.transpose %241, [1, 0] : vector<16x384xf32> -> vector<384x16xf32>
    %243 = arith.truncf %242 : vector<384x16xf32> to vector<384x16xbf16>
    %244 = vector.extract_strided_slice %243 {offsets = [0, 0], sizes = [128, 16], strides = [1, 1]} : vector<384x16xbf16> to vector<128x16xbf16>
    %245 = vector.shape_cast %244 : vector<128x16xbf16> to vector<4x32x16xbf16>
    %246 = vector.extract_strided_slice %243 {offsets = [128, 0], sizes = [128, 16], strides = [1, 1]} : vector<384x16xbf16> to vector<128x16xbf16>
    %247 = vector.shape_cast %246 : vector<128x16xbf16> to vector<4x32x16xbf16>
    %248 = vector.extract_strided_slice %243 {offsets = [256, 0], sizes = [128, 16], strides = [1, 1]} : vector<384x16xbf16> to vector<128x16xbf16>
    %249 = vector.shape_cast %248 : vector<128x16xbf16> to vector<4x32x16xbf16>
    %cst_131 = arith.constant dense<0.000000e+00> : vector<4x16x16xf32>
    %250 = tpu.matmul %245, %247, %cst_131 {dimension_numbers = #tpu.dot_dimension_numbers<[1], [1], [2], [2], [0, 0, 0, 2, 1, 2], [0], [0]>} : vector<4x32x16xbf16>, vector<4x32x16xbf16>, vector<4x16x16xf32> -> vector<4x16x16xf32>
    %251 = vector.shape_cast %233 : vector<16x16xf32> to vector<1x16x16xf32>
    %252 = vector.broadcast %251 : vector<1x16x16xf32> to vector<4x16x16xf32>
    %253 = arith.addf %250, %252 : vector<4x16x16xf32>
    %cst_132 = arith.constant dense<0xFF800000> : vector<4x16xf32>
    %254 = vector.multi_reduction <maximumf>, %253, %cst_132 [2] : vector<4x16x16xf32> to vector<4x16xf32>
    %255 = vector.shape_cast %254 : vector<4x16xf32> to vector<4x16x1xf32>
    %256 = vector.broadcast %255 : vector<4x16x1xf32> to vector<4x16x16xf32>
    %257 = arith.subf %253, %256 : vector<4x16x16xf32>
    %258 = math.exp %257 : vector<4x16x16xf32>
    %cst_133 = arith.constant dense<0.000000e+00> : vector<4x16xf32>
    %259 = vector.multi_reduction <add>, %258, %cst_133 [2] : vector<4x16x16xf32> to vector<4x16xf32>
    %260 = vector.shape_cast %259 : vector<4x16xf32> to vector<4x16x1xf32>
    %261 = tpu.reciprocal %260 {approx = true} : vector<4x16x1xf32> -> vector<4x16x1xf32>
    %262 = vector.broadcast %261 : vector<4x16x1xf32> to vector<4x16x16xf32>
    %263 = arith.mulf %258, %262 : vector<4x16x16xf32>
    %264 = arith.truncf %263 : vector<4x16x16xf32> to vector<4x16x16xbf16>
    %cst_134 = arith.constant dense<0.000000e+00> : vector<4x32x16xf32>
    %265 = tpu.matmul %249, %264, %cst_134 {dimension_numbers = #tpu.dot_dimension_numbers<[2], [2], [1], [1], [0, 0, 0, 1, 1, 1], [0], [0]>} : vector<4x32x16xbf16>, vector<4x16x16xbf16>, vector<4x32x16xf32> -> vector<4x32x16xf32>
    %266 = vector.shape_cast %265 : vector<4x32x16xf32> to vector<128x16xf32>
    %267 = tpu.transpose %266, [1, 0] : vector<128x16xf32> -> vector<16x128xf32>
    %c0_135 = arith.constant 0 : index
    %c0_136 = arith.constant 0 : index
    %c0_137 = arith.constant 0 : index
    %268 = vector.load %arg9[%c0_135, %c0_136, %c0_137] : memref<2x128x128xbf16, #tpu.memory_space<vmem>>, vector<1x128x128xbf16>
    %269 = vector.shape_cast %268 : vector<1x128x128xbf16> to vector<128x128xbf16>
    %270 = arith.truncf %267 : vector<16x128xf32> to vector<16x128xbf16>
    %cst_138 = arith.constant dense<0.000000e+00> : vector<16x128xf32>
    %271 = tpu.matmul %270, %269, %cst_138 {dimension_numbers = #tpu.dot_dimension_numbers<[1], [0], [0], [1], [0, 0, 1, 1], [], []>} : vector<16x128xbf16>, vector<128x128xbf16>, vector<16x128xf32> -> vector<16x128xf32>
    %c0_139 = arith.constant 0 : index
    %c0_140 = arith.constant 0 : index
    %c0_141 = arith.constant 0 : index
    %272 = vector.load %arg10[%c0_139, %c0_140, %c0_141] : memref<2x1x128xf32, #tpu.memory_space<vmem>>, vector<1x1x128xf32>
    %273 = vector.shape_cast %272 : vector<1x1x128xf32> to vector<1x128xf32>
    %274 = vector.broadcast %273 : vector<1x128xf32> to vector<16x128xf32>
    %275 = arith.addf %271, %274 : vector<16x128xf32>
    %276 = arith.addf %232, %275 : vector<16x128xf32>
    %c0_142 = arith.constant 0 : index
    %c0_143 = arith.constant 0 : index
    %c0_144 = arith.constant 0 : index
    %277 = vector.load %arg11[%c0_142, %c0_143, %c0_144] : memref<2x1x128xf32, #tpu.memory_space<vmem>>, vector<1x1x128xf32>
    %278 = vector.shape_cast %277 : vector<1x1x128xf32> to vector<1x128xf32>
    %c0_145 = arith.constant 0 : index
    %c0_146 = arith.constant 0 : index
    %c0_147 = arith.constant 0 : index
    %279 = vector.load %arg12[%c0_145, %c0_146, %c0_147] : memref<2x1x128xf32, #tpu.memory_space<vmem>>, vector<1x1x128xf32>
    %280 = vector.shape_cast %279 : vector<1x1x128xf32> to vector<1x128xf32>
    %cst_148 = arith.constant dense<0.000000e+00> : vector<16xf32>
    %281 = vector.multi_reduction <add>, %276, %cst_148 [1] : vector<16x128xf32> to vector<16xf32>
    %282 = vector.shape_cast %281 : vector<16xf32> to vector<16x1xf32>
    %cst_149 = arith.constant 1.280000e+02 : f32
    %283 = vector.broadcast %cst_149 : f32 to vector<16x1xf32>
    %284 = arith.divf %282, %283 : vector<16x1xf32>
    %285 = vector.broadcast %284 : vector<16x1xf32> to vector<16x128xf32>
    %286 = arith.subf %276, %285 : vector<16x128xf32>
    %287 = arith.mulf %286, %286 : vector<16x128xf32>
    %cst_150 = arith.constant dense<0.000000e+00> : vector<16xf32>
    %288 = vector.multi_reduction <add>, %287, %cst_150 [1] : vector<16x128xf32> to vector<16xf32>
    %289 = vector.shape_cast %288 : vector<16xf32> to vector<16x1xf32>
    %cst_151 = arith.constant 1.280000e+02 : f32
    %290 = vector.broadcast %cst_151 : f32 to vector<16x1xf32>
    %291 = arith.divf %289, %290 : vector<16x1xf32>
    %292 = vector.broadcast %284 : vector<16x1xf32> to vector<16x128xf32>
    %293 = arith.subf %276, %292 : vector<16x128xf32>
    %cst_152 = arith.constant 9.99999996E-13 : f32
    %294 = vector.broadcast %cst_152 : f32 to vector<16x1xf32>
    %295 = arith.addf %291, %294 : vector<16x1xf32>
    %296 = math.rsqrt %295 : vector<16x1xf32>
    %297 = vector.broadcast %296 : vector<16x1xf32> to vector<16x128xf32>
    %298 = arith.mulf %293, %297 : vector<16x128xf32>
    %299 = vector.broadcast %278 : vector<1x128xf32> to vector<16x128xf32>
    %300 = arith.mulf %298, %299 : vector<16x128xf32>
    %301 = vector.broadcast %280 : vector<1x128xf32> to vector<16x128xf32>
    %302 = arith.addf %300, %301 : vector<16x128xf32>
    %c0_153 = arith.constant 0 : index
    %c0_154 = arith.constant 0 : index
    %c0_155 = arith.constant 0 : index
    %303 = vector.load %arg13[%c0_153, %c0_154, %c0_155] : memref<2x128x256xbf16, #tpu.memory_space<vmem>>, vector<1x128x256xbf16>
    %304 = vector.shape_cast %303 : vector<1x128x256xbf16> to vector<128x256xbf16>
    %305 = arith.truncf %302 : vector<16x128xf32> to vector<16x128xbf16>
    %cst_156 = arith.constant dense<0.000000e+00> : vector<16x256xf32>
    %306 = tpu.matmul %305, %304, %cst_156 {dimension_numbers = #tpu.dot_dimension_numbers<[1], [0], [0], [1], [0, 0, 1, 1], [], []>} : vector<16x128xbf16>, vector<128x256xbf16>, vector<16x256xf32> -> vector<16x256xf32>
    %c0_157 = arith.constant 0 : index
    %c0_158 = arith.constant 0 : index
    %c0_159 = arith.constant 0 : index
    %307 = vector.load %arg14[%c0_157, %c0_158, %c0_159] : memref<2x1x256xf32, #tpu.memory_space<vmem>>, vector<1x1x256xf32>
    %308 = vector.shape_cast %307 : vector<1x1x256xf32> to vector<1x256xf32>
    %309 = vector.broadcast %308 : vector<1x256xf32> to vector<16x256xf32>
    %310 = arith.addf %306, %309 : vector<16x256xf32>
    %cst_160 = arith.constant 5.000000e-01 : f32
    %311 = vector.broadcast %cst_160 : f32 to vector<16x256xf32>
    %312 = arith.mulf %311, %310 : vector<16x256xf32>
    %cst_161 = arith.constant 4.471500e-02 : f32
    %313 = vector.broadcast %cst_161 : f32 to vector<16x256xf32>
    %314 = arith.mulf %313, %310 : vector<16x256xf32>
    %315 = arith.mulf %314, %310 : vector<16x256xf32>
    %316 = arith.mulf %315, %310 : vector<16x256xf32>
    %317 = arith.addf %310, %316 : vector<16x256xf32>
    %cst_162 = arith.constant 0.797884583 : f32
    %318 = vector.broadcast %cst_162 : f32 to vector<16x256xf32>
    %319 = arith.mulf %318, %317 : vector<16x256xf32>
    %320 = math.tanh %319 : vector<16x256xf32>
    %cst_163 = arith.constant 1.000000e+00 : f32
    %321 = vector.broadcast %cst_163 : f32 to vector<16x256xf32>
    %322 = arith.addf %321, %320 : vector<16x256xf32>
    %323 = arith.mulf %312, %322 : vector<16x256xf32>
    %c0_164 = arith.constant 0 : index
    %c0_165 = arith.constant 0 : index
    %c0_166 = arith.constant 0 : index
    %324 = vector.load %arg15[%c0_164, %c0_165, %c0_166] : memref<2x256x128xbf16, #tpu.memory_space<vmem>>, vector<1x256x128xbf16>
    %325 = vector.shape_cast %324 : vector<1x256x128xbf16> to vector<256x128xbf16>
    %326 = arith.truncf %323 : vector<16x256xf32> to vector<16x256xbf16>
    %cst_167 = arith.constant dense<0.000000e+00> : vector<16x128xf32>
    %327 = tpu.matmul %326, %325, %cst_167 {dimension_numbers = #tpu.dot_dimension_numbers<[1], [0], [0], [1], [0, 0, 1, 1], [], []>} : vector<16x256xbf16>, vector<256x128xbf16>, vector<16x128xf32> -> vector<16x128xf32>
    %c0_168 = arith.constant 0 : index
    %c0_169 = arith.constant 0 : index
    %c0_170 = arith.constant 0 : index
    %328 = vector.load %arg16[%c0_168, %c0_169, %c0_170] : memref<2x1x128xf32, #tpu.memory_space<vmem>>, vector<1x1x128xf32>
    %329 = vector.shape_cast %328 : vector<1x1x128xf32> to vector<1x128xf32>
    %330 = vector.broadcast %329 : vector<1x128xf32> to vector<16x128xf32>
    %331 = arith.addf %327, %330 : vector<16x128xf32>
    %332 = arith.addf %302, %331 : vector<16x128xf32>
    %c0_171 = arith.constant 0 : index
    %c0_172 = arith.constant 0 : index
    %c0_173 = arith.constant 0 : index
    %333 = vector.load %arg17[%c0_171, %c0_172, %c0_173] : memref<2x1x128xf32, #tpu.memory_space<vmem>>, vector<1x1x128xf32>
    %334 = vector.shape_cast %333 : vector<1x1x128xf32> to vector<1x128xf32>
    %c0_174 = arith.constant 0 : index
    %c0_175 = arith.constant 0 : index
    %c0_176 = arith.constant 0 : index
    %335 = vector.load %arg18[%c0_174, %c0_175, %c0_176] : memref<2x1x128xf32, #tpu.memory_space<vmem>>, vector<1x1x128xf32>
    %336 = vector.shape_cast %335 : vector<1x1x128xf32> to vector<1x128xf32>
    %cst_177 = arith.constant dense<0.000000e+00> : vector<16xf32>
    %337 = vector.multi_reduction <add>, %332, %cst_177 [1] : vector<16x128xf32> to vector<16xf32>
    %338 = vector.shape_cast %337 : vector<16xf32> to vector<16x1xf32>
    %cst_178 = arith.constant 1.280000e+02 : f32
    %339 = vector.broadcast %cst_178 : f32 to vector<16x1xf32>
    %340 = arith.divf %338, %339 : vector<16x1xf32>
    %341 = vector.broadcast %340 : vector<16x1xf32> to vector<16x128xf32>
    %342 = arith.subf %332, %341 : vector<16x128xf32>
    %343 = arith.mulf %342, %342 : vector<16x128xf32>
    %cst_179 = arith.constant dense<0.000000e+00> : vector<16xf32>
    %344 = vector.multi_reduction <add>, %343, %cst_179 [1] : vector<16x128xf32> to vector<16xf32>
    %345 = vector.shape_cast %344 : vector<16xf32> to vector<16x1xf32>
    %cst_180 = arith.constant 1.280000e+02 : f32
    %346 = vector.broadcast %cst_180 : f32 to vector<16x1xf32>
    %347 = arith.divf %345, %346 : vector<16x1xf32>
    %348 = vector.broadcast %340 : vector<16x1xf32> to vector<16x128xf32>
    %349 = arith.subf %332, %348 : vector<16x128xf32>
    %cst_181 = arith.constant 9.99999996E-13 : f32
    %350 = vector.broadcast %cst_181 : f32 to vector<16x1xf32>
    %351 = arith.addf %347, %350 : vector<16x1xf32>
    %352 = math.rsqrt %351 : vector<16x1xf32>
    %353 = vector.broadcast %352 : vector<16x1xf32> to vector<16x128xf32>
    %354 = arith.mulf %349, %353 : vector<16x128xf32>
    %355 = vector.broadcast %334 : vector<1x128xf32> to vector<16x128xf32>
    %356 = arith.mulf %354, %355 : vector<16x128xf32>
    %357 = vector.broadcast %336 : vector<1x128xf32> to vector<16x128xf32>
    %358 = arith.addf %356, %357 : vector<16x128xf32>
    %c1_182 = arith.constant 1 : index
    %c0_183 = arith.constant 0 : index
    %c0_184 = arith.constant 0 : index
    %359 = vector.load %arg7[%c1_182, %c0_183, %c0_184] : memref<2x128x384xbf16, #tpu.memory_space<vmem>>, vector<1x128x384xbf16>
    %360 = vector.shape_cast %359 : vector<1x128x384xbf16> to vector<128x384xbf16>
    %361 = arith.truncf %358 : vector<16x128xf32> to vector<16x128xbf16>
    %cst_185 = arith.constant dense<0.000000e+00> : vector<16x384xf32>
    %362 = tpu.matmul %361, %360, %cst_185 {dimension_numbers = #tpu.dot_dimension_numbers<[1], [0], [0], [1], [0, 0, 1, 1], [], []>} : vector<16x128xbf16>, vector<128x384xbf16>, vector<16x384xf32> -> vector<16x384xf32>
    %c1_186 = arith.constant 1 : index
    %c0_187 = arith.constant 0 : index
    %c0_188 = arith.constant 0 : index
    %363 = vector.load %arg8[%c1_186, %c0_187, %c0_188] : memref<2x1x384xf32, #tpu.memory_space<vmem>>, vector<1x1x384xf32>
    %364 = vector.shape_cast %363 : vector<1x1x384xf32> to vector<1x384xf32>
    %365 = vector.broadcast %364 : vector<1x384xf32> to vector<16x384xf32>
    %366 = arith.addf %362, %365 : vector<16x384xf32>
    %367 = tpu.transpose %366, [1, 0] : vector<16x384xf32> -> vector<384x16xf32>
    %368 = arith.truncf %367 : vector<384x16xf32> to vector<384x16xbf16>
    %369 = vector.extract_strided_slice %368 {offsets = [0, 0], sizes = [128, 16], strides = [1, 1]} : vector<384x16xbf16> to vector<128x16xbf16>
    %370 = vector.shape_cast %369 : vector<128x16xbf16> to vector<4x32x16xbf16>
    %371 = vector.extract_strided_slice %368 {offsets = [128, 0], sizes = [128, 16], strides = [1, 1]} : vector<384x16xbf16> to vector<128x16xbf16>
    %372 = vector.shape_cast %371 : vector<128x16xbf16> to vector<4x32x16xbf16>
    %373 = vector.extract_strided_slice %368 {offsets = [256, 0], sizes = [128, 16], strides = [1, 1]} : vector<384x16xbf16> to vector<128x16xbf16>
    %374 = vector.shape_cast %373 : vector<128x16xbf16> to vector<4x32x16xbf16>
    %cst_189 = arith.constant dense<0.000000e+00> : vector<4x16x16xf32>
    %375 = tpu.matmul %370, %372, %cst_189 {dimension_numbers = #tpu.dot_dimension_numbers<[1], [1], [2], [2], [0, 0, 0, 2, 1, 2], [0], [0]>} : vector<4x32x16xbf16>, vector<4x32x16xbf16>, vector<4x16x16xf32> -> vector<4x16x16xf32>
    %376 = vector.shape_cast %233 : vector<16x16xf32> to vector<1x16x16xf32>
    %377 = vector.broadcast %376 : vector<1x16x16xf32> to vector<4x16x16xf32>
    %378 = arith.addf %375, %377 : vector<4x16x16xf32>
    %cst_190 = arith.constant dense<0xFF800000> : vector<4x16xf32>
    %379 = vector.multi_reduction <maximumf>, %378, %cst_190 [2] : vector<4x16x16xf32> to vector<4x16xf32>
    %380 = vector.shape_cast %379 : vector<4x16xf32> to vector<4x16x1xf32>
    %381 = vector.broadcast %380 : vector<4x16x1xf32> to vector<4x16x16xf32>
    %382 = arith.subf %378, %381 : vector<4x16x16xf32>
    %383 = math.exp %382 : vector<4x16x16xf32>
    %cst_191 = arith.constant dense<0.000000e+00> : vector<4x16xf32>
    %384 = vector.multi_reduction <add>, %383, %cst_191 [2] : vector<4x16x16xf32> to vector<4x16xf32>
    %385 = vector.shape_cast %384 : vector<4x16xf32> to vector<4x16x1xf32>
    %386 = tpu.reciprocal %385 {approx = true} : vector<4x16x1xf32> -> vector<4x16x1xf32>
    %387 = vector.broadcast %386 : vector<4x16x1xf32> to vector<4x16x16xf32>
    %388 = arith.mulf %383, %387 : vector<4x16x16xf32>
    %389 = arith.truncf %388 : vector<4x16x16xf32> to vector<4x16x16xbf16>
    %cst_192 = arith.constant dense<0.000000e+00> : vector<4x32x16xf32>
    %390 = tpu.matmul %374, %389, %cst_192 {dimension_numbers = #tpu.dot_dimension_numbers<[2], [2], [1], [1], [0, 0, 0, 1, 1, 1], [0], [0]>} : vector<4x32x16xbf16>, vector<4x16x16xbf16>, vector<4x32x16xf32> -> vector<4x32x16xf32>
    %391 = vector.shape_cast %390 : vector<4x32x16xf32> to vector<128x16xf32>
    %392 = tpu.transpose %391, [1, 0] : vector<128x16xf32> -> vector<16x128xf32>
    %c1_193 = arith.constant 1 : index
    %c0_194 = arith.constant 0 : index
    %c0_195 = arith.constant 0 : index
    %393 = vector.load %arg9[%c1_193, %c0_194, %c0_195] : memref<2x128x128xbf16, #tpu.memory_space<vmem>>, vector<1x128x128xbf16>
    %394 = vector.shape_cast %393 : vector<1x128x128xbf16> to vector<128x128xbf16>
    %395 = arith.truncf %392 : vector<16x128xf32> to vector<16x128xbf16>
    %cst_196 = arith.constant dense<0.000000e+00> : vector<16x128xf32>
    %396 = tpu.matmul %395, %394, %cst_196 {dimension_numbers = #tpu.dot_dimension_numbers<[1], [0], [0], [1], [0, 0, 1, 1], [], []>} : vector<16x128xbf16>, vector<128x128xbf16>, vector<16x128xf32> -> vector<16x128xf32>
    %c1_197 = arith.constant 1 : index
    %c0_198 = arith.constant 0 : index
    %c0_199 = arith.constant 0 : index
    %397 = vector.load %arg10[%c1_197, %c0_198, %c0_199] : memref<2x1x128xf32, #tpu.memory_space<vmem>>, vector<1x1x128xf32>
    %398 = vector.shape_cast %397 : vector<1x1x128xf32> to vector<1x128xf32>
    %399 = vector.broadcast %398 : vector<1x128xf32> to vector<16x128xf32>
    %400 = arith.addf %396, %399 : vector<16x128xf32>
    %401 = arith.addf %358, %400 : vector<16x128xf32>
    %c1_200 = arith.constant 1 : index
    %c0_201 = arith.constant 0 : index
    %c0_202 = arith.constant 0 : index
    %402 = vector.load %arg11[%c1_200, %c0_201, %c0_202] : memref<2x1x128xf32, #tpu.memory_space<vmem>>, vector<1x1x128xf32>
    %403 = vector.shape_cast %402 : vector<1x1x128xf32> to vector<1x128xf32>
    %c1_203 = arith.constant 1 : index
    %c0_204 = arith.constant 0 : index
    %c0_205 = arith.constant 0 : index
    %404 = vector.load %arg12[%c1_203, %c0_204, %c0_205] : memref<2x1x128xf32, #tpu.memory_space<vmem>>, vector<1x1x128xf32>
    %405 = vector.shape_cast %404 : vector<1x1x128xf32> to vector<1x128xf32>
    %cst_206 = arith.constant dense<0.000000e+00> : vector<16xf32>
    %406 = vector.multi_reduction <add>, %401, %cst_206 [1] : vector<16x128xf32> to vector<16xf32>
    %407 = vector.shape_cast %406 : vector<16xf32> to vector<16x1xf32>
    %cst_207 = arith.constant 1.280000e+02 : f32
    %408 = vector.broadcast %cst_207 : f32 to vector<16x1xf32>
    %409 = arith.divf %407, %408 : vector<16x1xf32>
    %410 = vector.broadcast %409 : vector<16x1xf32> to vector<16x128xf32>
    %411 = arith.subf %401, %410 : vector<16x128xf32>
    %412 = arith.mulf %411, %411 : vector<16x128xf32>
    %cst_208 = arith.constant dense<0.000000e+00> : vector<16xf32>
    %413 = vector.multi_reduction <add>, %412, %cst_208 [1] : vector<16x128xf32> to vector<16xf32>
    %414 = vector.shape_cast %413 : vector<16xf32> to vector<16x1xf32>
    %cst_209 = arith.constant 1.280000e+02 : f32
    %415 = vector.broadcast %cst_209 : f32 to vector<16x1xf32>
    %416 = arith.divf %414, %415 : vector<16x1xf32>
    %417 = vector.broadcast %409 : vector<16x1xf32> to vector<16x128xf32>
    %418 = arith.subf %401, %417 : vector<16x128xf32>
    %cst_210 = arith.constant 9.99999996E-13 : f32
    %419 = vector.broadcast %cst_210 : f32 to vector<16x1xf32>
    %420 = arith.addf %416, %419 : vector<16x1xf32>
    %421 = math.rsqrt %420 : vector<16x1xf32>
    %422 = vector.broadcast %421 : vector<16x1xf32> to vector<16x128xf32>
    %423 = arith.mulf %418, %422 : vector<16x128xf32>
    %424 = vector.broadcast %403 : vector<1x128xf32> to vector<16x128xf32>
    %425 = arith.mulf %423, %424 : vector<16x128xf32>
    %426 = vector.broadcast %405 : vector<1x128xf32> to vector<16x128xf32>
    %427 = arith.addf %425, %426 : vector<16x128xf32>
    %c1_211 = arith.constant 1 : index
    %c0_212 = arith.constant 0 : index
    %c0_213 = arith.constant 0 : index
    %428 = vector.load %arg13[%c1_211, %c0_212, %c0_213] : memref<2x128x256xbf16, #tpu.memory_space<vmem>>, vector<1x128x256xbf16>
    %429 = vector.shape_cast %428 : vector<1x128x256xbf16> to vector<128x256xbf16>
    %430 = arith.truncf %427 : vector<16x128xf32> to vector<16x128xbf16>
    %cst_214 = arith.constant dense<0.000000e+00> : vector<16x256xf32>
    %431 = tpu.matmul %430, %429, %cst_214 {dimension_numbers = #tpu.dot_dimension_numbers<[1], [0], [0], [1], [0, 0, 1, 1], [], []>} : vector<16x128xbf16>, vector<128x256xbf16>, vector<16x256xf32> -> vector<16x256xf32>
    %c1_215 = arith.constant 1 : index
    %c0_216 = arith.constant 0 : index
    %c0_217 = arith.constant 0 : index
    %432 = vector.load %arg14[%c1_215, %c0_216, %c0_217] : memref<2x1x256xf32, #tpu.memory_space<vmem>>, vector<1x1x256xf32>
    %433 = vector.shape_cast %432 : vector<1x1x256xf32> to vector<1x256xf32>
    %434 = vector.broadcast %433 : vector<1x256xf32> to vector<16x256xf32>
    %435 = arith.addf %431, %434 : vector<16x256xf32>
    %cst_218 = arith.constant 5.000000e-01 : f32
    %436 = vector.broadcast %cst_218 : f32 to vector<16x256xf32>
    %437 = arith.mulf %436, %435 : vector<16x256xf32>
    %cst_219 = arith.constant 4.471500e-02 : f32
    %438 = vector.broadcast %cst_219 : f32 to vector<16x256xf32>
    %439 = arith.mulf %438, %435 : vector<16x256xf32>
    %440 = arith.mulf %439, %435 : vector<16x256xf32>
    %441 = arith.mulf %440, %435 : vector<16x256xf32>
    %442 = arith.addf %435, %441 : vector<16x256xf32>
    %cst_220 = arith.constant 0.797884583 : f32
    %443 = vector.broadcast %cst_220 : f32 to vector<16x256xf32>
    %444 = arith.mulf %443, %442 : vector<16x256xf32>
    %445 = math.tanh %444 : vector<16x256xf32>
    %cst_221 = arith.constant 1.000000e+00 : f32
    %446 = vector.broadcast %cst_221 : f32 to vector<16x256xf32>
    %447 = arith.addf %446, %445 : vector<16x256xf32>
    %448 = arith.mulf %437, %447 : vector<16x256xf32>
    %c1_222 = arith.constant 1 : index
    %c0_223 = arith.constant 0 : index
    %c0_224 = arith.constant 0 : index
    %449 = vector.load %arg15[%c1_222, %c0_223, %c0_224] : memref<2x256x128xbf16, #tpu.memory_space<vmem>>, vector<1x256x128xbf16>
    %450 = vector.shape_cast %449 : vector<1x256x128xbf16> to vector<256x128xbf16>
    %451 = arith.truncf %448 : vector<16x256xf32> to vector<16x256xbf16>
    %cst_225 = arith.constant dense<0.000000e+00> : vector<16x128xf32>
    %452 = tpu.matmul %451, %450, %cst_225 {dimension_numbers = #tpu.dot_dimension_numbers<[1], [0], [0], [1], [0, 0, 1, 1], [], []>} : vector<16x256xbf16>, vector<256x128xbf16>, vector<16x128xf32> -> vector<16x128xf32>
    %c1_226 = arith.constant 1 : index
    %c0_227 = arith.constant 0 : index
    %c0_228 = arith.constant 0 : index
    %453 = vector.load %arg16[%c1_226, %c0_227, %c0_228] : memref<2x1x128xf32, #tpu.memory_space<vmem>>, vector<1x1x128xf32>
    %454 = vector.shape_cast %453 : vector<1x1x128xf32> to vector<1x128xf32>
    %455 = vector.broadcast %454 : vector<1x128xf32> to vector<16x128xf32>
    %456 = arith.addf %452, %455 : vector<16x128xf32>
    %457 = arith.addf %427, %456 : vector<16x128xf32>
    %c1_229 = arith.constant 1 : index
    %c0_230 = arith.constant 0 : index
    %c0_231 = arith.constant 0 : index
    %458 = vector.load %arg17[%c1_229, %c0_230, %c0_231] : memref<2x1x128xf32, #tpu.memory_space<vmem>>, vector<1x1x128xf32>
    %459 = vector.shape_cast %458 : vector<1x1x128xf32> to vector<1x128xf32>
    %c1_232 = arith.constant 1 : index
    %c0_233 = arith.constant 0 : index
    %c0_234 = arith.constant 0 : index
    %460 = vector.load %arg18[%c1_232, %c0_233, %c0_234] : memref<2x1x128xf32, #tpu.memory_space<vmem>>, vector<1x1x128xf32>
    %461 = vector.shape_cast %460 : vector<1x1x128xf32> to vector<1x128xf32>
    %cst_235 = arith.constant dense<0.000000e+00> : vector<16xf32>
    %462 = vector.multi_reduction <add>, %457, %cst_235 [1] : vector<16x128xf32> to vector<16xf32>
    %463 = vector.shape_cast %462 : vector<16xf32> to vector<16x1xf32>
    %cst_236 = arith.constant 1.280000e+02 : f32
    %464 = vector.broadcast %cst_236 : f32 to vector<16x1xf32>
    %465 = arith.divf %463, %464 : vector<16x1xf32>
    %466 = vector.broadcast %465 : vector<16x1xf32> to vector<16x128xf32>
    %467 = arith.subf %457, %466 : vector<16x128xf32>
    %468 = arith.mulf %467, %467 : vector<16x128xf32>
    %cst_237 = arith.constant dense<0.000000e+00> : vector<16xf32>
    %469 = vector.multi_reduction <add>, %468, %cst_237 [1] : vector<16x128xf32> to vector<16xf32>
    %470 = vector.shape_cast %469 : vector<16xf32> to vector<16x1xf32>
    %cst_238 = arith.constant 1.280000e+02 : f32
    %471 = vector.broadcast %cst_238 : f32 to vector<16x1xf32>
    %472 = arith.divf %470, %471 : vector<16x1xf32>
    %473 = vector.broadcast %465 : vector<16x1xf32> to vector<16x128xf32>
    %474 = arith.subf %457, %473 : vector<16x128xf32>
    %cst_239 = arith.constant 9.99999996E-13 : f32
    %475 = vector.broadcast %cst_239 : f32 to vector<16x1xf32>
    %476 = arith.addf %472, %475 : vector<16x1xf32>
    %477 = math.rsqrt %476 : vector<16x1xf32>
    %478 = vector.broadcast %477 : vector<16x1xf32> to vector<16x128xf32>
    %479 = arith.mulf %474, %478 : vector<16x128xf32>
    %480 = vector.broadcast %459 : vector<1x128xf32> to vector<16x128xf32>
    %481 = arith.mulf %479, %480 : vector<16x128xf32>
    %482 = vector.broadcast %461 : vector<1x128xf32> to vector<16x128xf32>
    %483 = arith.addf %481, %482 : vector<16x128xf32>
    %c0_240 = arith.constant 0 : index
    %c0_241 = arith.constant 0 : index
    %484 = vector.load %arg19[%c0_240, %c0_241] : memref<128x64xbf16, #tpu.memory_space<vmem>>, vector<128x64xbf16>
    %485 = arith.truncf %483 : vector<16x128xf32> to vector<16x128xbf16>
    %cst_242 = arith.constant dense<0.000000e+00> : vector<16x64xf32>
    %486 = tpu.matmul %485, %484, %cst_242 {dimension_numbers = #tpu.dot_dimension_numbers<[1], [0], [0], [1], [0, 0, 1, 1], [], []>} : vector<16x128xbf16>, vector<128x64xbf16>, vector<16x64xf32> -> vector<16x64xf32>
    %c0_243 = arith.constant 0 : index
    %c0_244 = arith.constant 0 : index
    %487 = vector.load %arg20[%c0_243, %c0_244] : memref<1x64xf32, #tpu.memory_space<vmem>>, vector<1x64xf32>
    %488 = vector.broadcast %487 : vector<1x64xf32> to vector<16x64xf32>
    %489 = arith.addf %486, %488 : vector<16x64xf32>
    %c0_245 = arith.constant 0 : index
    %c0_246 = arith.constant 0 : index
    %490 = vector.load %arg21[%c0_245, %c0_246] : memref<64x128xbf16, #tpu.memory_space<vmem>>, vector<64x128xbf16>
    %491 = arith.truncf %489 : vector<16x64xf32> to vector<16x64xbf16>
    %cst_247 = arith.constant dense<0.000000e+00> : vector<16x128xf32>
    %492 = tpu.matmul %491, %490, %cst_247 {dimension_numbers = #tpu.dot_dimension_numbers<[1], [0], [0], [1], [0, 0, 1, 1], [], []>} : vector<16x64xbf16>, vector<64x128xbf16>, vector<16x128xf32> -> vector<16x128xf32>
    %c0_248 = arith.constant 0 : index
    %c0_249 = arith.constant 0 : index
    %493 = vector.load %arg22[%c0_248, %c0_249] : memref<1x128xf32, #tpu.memory_space<vmem>>, vector<1x128xf32>
    %494 = vector.broadcast %493 : vector<1x128xf32> to vector<16x128xf32>
    %495 = arith.addf %492, %494 : vector<16x128xf32>
    %c0_250 = arith.constant 0 : index
    %c0_251 = arith.constant 0 : index
    %496 = vector.load %arg23[%c0_250, %c0_251] : memref<16x128xf32, #tpu.memory_space<vmem>>, vector<16x128xf32>
    tpu.vector_store %arg23[%c0_250, %c0_251], %495 {strides = array<i32>} : memref<16x128xf32, #tpu.memory_space<vmem>>, vector<16x128xf32>,
    return
  }
}

</mosaic_0001>

<bundles_post_ra>
// kernel: wipo_classifier_forward.1
= control target key start
LH: loop header
LB: loop body
LE: loop exit
PB: predicated region body
PF: predicated region fallthrough
CT: control target
= control target key end

     0   :  { %s5638_s0 = inlined_call_operand.vmem [shape: s32[16], index: 0, kind: input, shape index: {}]   ;;  %s5639_s1 = inlined_call_operand.vmem [shape: f32[16,16], index: 1, kind: input, shape index: {}]   ;;  %s5640_s2 = inlined_call_operand.vmem [shape: f32[100,128], index: 2, kind: input, shape index: {}]   ;;  %s5641_s3 = inlined_call_operand.vmem [shape: f32[32,128], index: 3, kind: input, shape index: {}]   ;;  %s5642_s4 = inlined_call_operand.vmem [shape: f32[2,128], index: 4, kind: input, shape index: {}]   ;;  %s5643_s5 = inlined_call_operand.vmem [shape: f32[1,128], index: 5, kind: input, shape index: {}]   ;;  %s5644_s6 = inlined_call_operand.vmem [shape: f32[1,128], index: 6, kind: input, shape index: {}]   ;;  %s5645_s7 = inlined_call_operand.vmem [shape: bf16[2,128,384], index: 7, kind: input, shape index: {}]   ;;  %s5646_s8 = inlined_call_operand.vmem [shape: f32[2,1,384], index: 8, kind: input, shape index: {}]   ;;  %s5647_s9 = inlined_call_operand.vmem [shape: bf16[2,128,128], index: 9, kind: input, shape index: {}]   ;;  %s5648_s10 = inlined_call_operand.vmem [shape: f32[2,1,128], index: 10, kind: input, shape index: {}]   ;;  %s5649_s11 = inlined_call_operand.vmem [shape: f32[2,1,128], index: 11, kind: input, shape index: {}]   ;;  %s5650_s12 = inlined_call_operand.vmem [shape: f32[2,1,128], index: 12, kind: input, shape index: {}]   ;;  %s5651_s13 = inlined_call_operand.vmem [shape: bf16[2,128,256], index: 13, kind: input, shape index: {}]   ;;  %s5652_s14 = inlined_call_operand.vmem [shape: f32[2,1,256], index: 14, kind: input, shape index: {}]   ;;  %s5653_s15 = inlined_call_operand.vmem [shape: bf16[2,256,128], index: 15, kind: input, shape index: {}]   ;;  %s5654_s16 = inlined_call_operand.vmem [shape: f32[2,1,128], index: 16, kind: input, shape index: {}]   ;;  %s5655_s17 = inlined_call_operand.vmem [shape: f32[2,1,128], index: 17, kind: input, shape index: {}]   ;;  %s5656_s18 = inlined_call_operand.vmem [shape: f32[2,1,128], index: 18, kind: input, shape index: {}]   ;;  %s5657_s19 = inlined_call_operand.vmem [shape: bf16[128,64], index: 19, kind: input, shape index: {}]   ;;  %s5658_s20 = inlined_call_operand.vmem [shape: f32[1,64], index: 20, kind: input, shape index: {}]   ;;  %s5659_s21 = inlined_call_operand.vmem [shape: bf16[64,128], index: 21, kind: input, shape index: {}]   ;;  %s5660_s22 = inlined_call_operand.vmem [shape: f32[1,128], index: 22, kind: input, shape index: {}]   ;;  %s5661_s23 = inlined_call_operand.vmem [shape: f32[16,128], index: 23, kind: output, shape index: {}]  }
   0x1   :  { %5672 = sst [smem:[#allocation6_spill]] %s5638_s0 }
   0x2   :  { %5673 = sst [smem:[#allocation7_spill]] %s5639_s1 }
   0x3   :  { %5674 = sst [smem:[#allocation8_spill]] %s5640_s2 }
   0x4   :  { %5675 = sst [smem:[#allocation9_spill]] %s5641_s3 }
   0x5   :  { %5676 = sst [smem:[#allocation10_spill]] %s5642_s4 }
   0x6   :  { %5677 = sst [smem:[#allocation11_spill]] %s5643_s5 }
   0x7   :  { %5678 = sst [smem:[#allocation12_spill]] %s5644_s6 }
   0x8   :  { %5679 = sst [smem:[#allocation13_spill]] %s5645_s7 }
   0x9   :  { %5680 = sst [smem:[#allocation14_spill]] %s5655_s17 }
   0xa   :  { %5681 = sst [smem:[#allocation15_spill]] %s5656_s18 }
   0xb   :  { %5682 = sst [smem:[#allocation16_spill]] %s5657_s19 }
   0xc   :  { %5683 = sst [smem:[#allocation17_spill]] %s5658_s20 }
   0xd   :  { %5684 = sst [smem:[#allocation18_spill]] %s5659_s21 }
   0xe   :  { %5685 = sst [smem:[#allocation19_spill]] %s5660_s22 }
   0xf   :  { %5686 = sst [smem:[#allocation20_spill]] %s5661_s23 }
  0x10   :  { %28 = vsyncpa [#allocation4], 0  ;;  %s5687_s24 = sld [smem:[#allocation6_spill]]  ;;  %s4414_s5 = smov [#allocation3]  }
  0x16   :  { %s34_s25 = sshll.u32 %s5687_s24, 4  ;;  %s35_s25 = int_to_ptr.vmem [resolvable:$true] %s34_s25 }
  0x17   :  { %37 = dma.vmem_to_smem %s35_s25, 16, %s4414_s5, [#allocation4]  }
  0x18   :  { %4412 = dma.done.wait [#allocation4], 16  }
  0x19   :  { %4413 = vsyncadd [#allocation4], 4294967280 }
  0x1a   :  { %86 = sfence }
  0x1b   :  { %s88_s1 = sld [smem:[#allocation3]]  ;;  %vm674_vm7 = vcmask 261120   ;;  %vm863_vm8 = vcmask 130048  }
  0x1c   :  { %s3260_s26 = sld [smem:[#allocation3 + $0x1]] }
  0x1d   :  { %s3261_s2 = sld [smem:[#allocation3 + $0x2]] }
  0x1e   :  { %s3262_s6 = sld [smem:[#allocation3 + $0x3]] }
  0x1f   :  { %s5688_s28 = sld [smem:[#allocation9_spill]] }
  0x20   :  { %s4542_s29 = sld [smem:[#allocation3 + $0x4]] }
  0x21   :  { %s5689_s4 = sld [smem:[#allocation10_spill]] }
  0x22   :  { %s4550_s25 = sld [smem:[#allocation3 + $0x5]] }
  0x23   :  { %s5690_s22 = sld [smem:[#allocation8_spill]] }
  0x24   :  { %s4561_s3 = sld [smem:[#allocation3 + $0x6]] }
  0x25   :  { %v91_v0 = vld [vmem:[%s5688_s28] sm:$0x1]  ;;  %v99_v2 = vld [vmem:[%s5688_s28 + $0x1] sm:$0x1]  ;;  %v107_v4 = vld [vmem:[%s5688_s28 + $0x2] sm:$0x1] }
  0x26   :  { %v115_v7 = vld [vmem:[%s5688_s28 + $0x3] sm:$0x1]  ;;  %s4572_s19 = sld [smem:[#allocation3 + $0x7]]  ;;  %v123_v11 = vld [vmem:[%s5688_s28 + $0x4] sm:$0x1] }
  0x27   :  { %v93_v1 = vld [vmem:[%s5689_s4] sm:$0x1]  ;;  %s4583_s18 = sld [smem:[#allocation3 + $0x8]]  ;;  %v131_v15 = vld [vmem:[%s5688_s28 + $0x5] sm:$0x1] }
  0x28   :  { %v101_v3 = vld [vmem:[%s5689_s4] sm:$0x1]  ;;  %v139_v20 = vld [vmem:[%s5688_s28 + $0x6] sm:$0x1]  ;;  %s4604_s0 = sld [smem:[#allocation3 + $0x9]] }
  0x29   :  { %s89_s20 = scalar_lea.vmem %s5690_s22, %s88_s1  ;;  %s97_s24 = scalar_lea.vmem %s5690_s22, %s3260_s26  ;;  %v109_v6 = vld [vmem:[%s5689_s4] sm:$0x1]  ;;  %v147_v25 = vld [vmem:[%s5688_s28 + $0x7] sm:$0x1]  ;;  %v163_v41 = vld [vmem:[%s5688_s28 + $0x1] sm:$0x1] }
  0x2a   :  { %v90_v5 = vld [vmem:[%s89_s20] sm:$0x1]  ;;  %s105_s20 = scalar_lea.vmem %s5690_s22, %s3261_s2  ;;  %s129_s23 = scalar_lea.vmem %s5690_s22, %s4550_s25  ;;  %v171_v44 = vld [vmem:[%s5688_s28 + $0x2] sm:$0x1]  ;;  %v179_v53 = vld [vmem:[%s5688_s28 + $0x3] sm:$0x1] }
  0x2b   :  { %v92_v8 = vadd.f32 %v91_v0, %v90_v5  ;;  %v98_v9 = vld [vmem:[%s97_s24] sm:$0x1]  ;;  %s113_s24 = scalar_lea.vmem %s5690_s22, %s3262_s6  ;;  %s4616_s5 = sld [smem:[#allocation3 + $0xa]]  ;;  %v187_v58 = vld [vmem:[%s5688_s28 + $0x4] sm:$0x1] }
  0x2c   :  { %v117_v10 = vld [vmem:[%s5689_s4] sm:$0x1]  ;;  %v100_v12 = vadd.f32 %v99_v2, %v98_v9  ;;  %s137_s7 = scalar_lea.vmem %s5690_s22, %s4561_s3  ;;  %s4639_s27 = sld [smem:[#allocation3 + $0xb]]  ;;  %v195_v61 = vld [vmem:[%s5688_s28 + $0x5] sm:$0x1] }
  0x2d   :  { %v106_v13 = vld [vmem:[%s105_s20] sm:$0x1]  ;;  %v94_v16 = vadd.f32 %v93_v1, %v92_v8  ;;  %s121_s20 = scalar_lea.vmem %s5690_s22, %s4542_s29  ;;  %s153_s21 = scalar_lea.vmem %s5690_s22, %s4583_s18  ;;  %v203_v63 = vld [vmem:[%s5688_s28 + $0x6] sm:$0x1] }
  0x2e   :  { %v125_v14 = vld [vmem:[%s5689_s4] sm:$0x1]  ;;  %v108_v17 = vadd.f32 %v107_v4, %v106_v13  ;;  %v102_v21 = vadd.f32 %v101_v3, %v100_v12  ;;  %s161_s26 = scalar_lea.vmem %s5690_s22, %s4604_s0  ;;  %s4651_s17 = sld [smem:[#allocation3 + $0xc]]  ;;  %v211_v4 = vld [vmem:[%s5688_s28 + $0x7] sm:$0x1] }
  0x2f   :  { %v114_v18 = vld [vmem:[%s113_s24] sm:$0x1]  ;;  %95 = vst [vmem:[#allocation2] sm:$0x1] %v94_v16  ;;  %s3273_s6 = sld [smem:[#allocation3 + $0xe]] }
  0x30   :  { %v133_v19 = vld [vmem:[%s5689_s4] sm:$0x1]  ;;  %v116_v22 = vadd.f32 %v115_v7, %v114_v18  ;;  %v110_v26 = vadd.f32 %v109_v6, %v108_v17  ;;  %103 = vst [vmem:[#allocation2 + $0x1] sm:$0x1] %v102_v21  ;;  %s3274_s2 = sld [smem:[#allocation3 + $0xf]]  ;;  %v4415_v18 = vmov 128.0  }
  0x31   :  { %v122_v23 = vld [vmem:[%s121_s20] sm:$0x1]  ;;  %s169_s29 = scalar_lea.vmem %s5690_s22, %s4616_s5  ;;  %4296 = vrcp.f32 %v4415_v18  ;;  %s5693_s0 = sld [smem:[#allocation12_spill]] }
  0x32   :  { %v141_v24 = vld [vmem:[%s5689_s4] sm:$0x1]  ;;  %v124_v27 = vadd.f32 %v123_v11, %v122_v23  ;;  %v118_v31 = vadd.f32 %v117_v10, %v116_v22  ;;  %111 = vst [vmem:[#allocation2 + $0x2] sm:$0x1] %v110_v26  ;;  %s5695_s20 = sld [smem:[#allocation14_spill]] }
  0x33   :  { %v130_v28 = vld [vmem:[%s129_s23] sm:$0x1]  ;;  %s145_s23 = scalar_lea.vmem %s5690_s22, %s4572_s19  ;;  %s3272_s19 = sld [smem:[#allocation3 + $0xd]] }
  0x34   :  { %v149_v29 = vld [vmem:[%s5689_s4] sm:$0x1]  ;;  %v132_v32 = vadd.f32 %v131_v15, %v130_v28  ;;  %v126_v35 = vadd.f32 %v125_v14, %v124_v27  ;;  %119 = vst [vmem:[#allocation2 + $0x3] sm:$0x1] %v118_v31  ;;  %s5696_s25 = sld [smem:[#allocation15_spill]] }
  0x35   :  { %v155_v30 = vld [vmem:[%s5688_s28] sm:$0x1]  ;;  %s5699_s24 = sld [smem:[#allocation17_spill]] }
  0x36   :  { %v138_v33 = vld [vmem:[%s137_s7] sm:$0x1]  ;;  %v134_v38 = vadd.f32 %v133_v19, %v132_v32  ;;  %127 = vst [vmem:[#allocation2 + $0x4] sm:$0x1] %v126_v35  ;;  %s177_s7 = scalar_lea.vmem %s5690_s22, %s4639_s27  ;;  %s185_s27 = scalar_lea.vmem %s5690_s22, %s4651_s17 }
  0x37   :  { %v157_v34 = vld [vmem:[%s5689_s4] sm:$0x1]  ;;  %v140_v36 = vadd.f32 %v139_v20, %v138_v33  ;;  %s209_s28 = scalar_lea.vmem %s5690_s22, %s3274_s2  ;;  %v4297_v19 = vpop.eup %4296  ;;  %s5700_s1 = sld [smem:[#allocation19_spill]] }
  0x38   :  { %v146_v37 = vld [vmem:[%s145_s23] sm:$0x1]  ;;  %135 = vst [vmem:[#allocation2 + $0x5] sm:$0x1] %v134_v38  ;;  %v225_v20 = vmul.f32 128.0, %v4297_v19  ;;  %vm229_vm0 = vweird.f32 %v4297_v19 }
  0x39   :  { %v148_v39 = vadd.f32 %v147_v25, %v146_v37  ;;  %v154_v40 = vld [vmem:[%s153_s21] sm:$0x1]  ;;  %v142_v42 = vadd.f32 %v141_v24, %v140_v36  ;;  %s193_s17 = scalar_lea.vmem %s5690_s22, %s3272_s19  ;;  %s5701_s19 = sld [smem:[#allocation20_spill]] }
  0x3a   :  { %v156_v43 = vadd.f32 %v155_v30, %v154_v40  ;;  %v162_v46 = vld [vmem:[%s161_s26] sm:$0x1]  ;;  %v226_v21 = vsub.f32 1.0, %v225_v20 }
  0x3b   :  { %v150_v45 = vadd.f32 %v149_v29, %v148_v39  ;;  %v165_v47 = vld [vmem:[%s5689_s4] sm:$0x1]  ;;  %143 = vst [vmem:[#allocation2 + $0x6] sm:$0x1] %v142_v42  ;;  %v164_v49 = vadd.f32 %v163_v41, %v162_v46 }
  0x3c   :  { %v158_v48 = vadd.f32 %v157_v34, %v156_v43  ;;  %v170_v50 = vld [vmem:[%s169_s29] sm:$0x1]  ;;  %v227_v22 = vmul.f32 %v4297_v19, %v226_v21  ;;  %s5692_s29 = sld [smem:[#allocation11_spill]] }
  0x3d   :  { %v173_v51 = vld [vmem:[%s5689_s4] sm:$0x1]  ;;  %151 = vst [vmem:[#allocation2 + $0x7] sm:$0x1] %v150_v45  ;;  %v172_v52 = vadd.f32 %v171_v44, %v170_v50  ;;  %v166_v54 = vadd.f32 %v165_v47, %v164_v49 }
  0x3e   :  { %159 = vst [vmem:[#allocation2 + $0x8] sm:$0x1] %v158_v48  ;;  %v181_v55 = vld [vmem:[%s5689_s4] sm:$0x1]  ;;  %v228_v23 = vadd.f32 %v4297_v19, %v227_v22 }
  0x3f   :  { %v174_v56 = vadd.f32 %v173_v51, %v172_v52  ;;  %v178_v57 = vld [vmem:[%s177_s7] sm:$0x1]  ;;  %167 = vst [vmem:[#allocation2 + $0x9] sm:$0x1] %v166_v54 }
  0x40   :  { %v189_v59 = vld [vmem:[%s5689_s4] sm:$0x1]  ;;  %v180_v60 = vadd.f32 %v179_v53, %v178_v57  ;;  %v4710_v24 = vsel %vm229_vm0, %v4297_v19, %v228_v23 }
  0x41   :  { %175 = vst [vmem:[#allocation2 + $0xa] sm:$0x1] %v174_v56  ;;  %v186_v62 = vld [vmem:[%s185_s27] sm:$0x1]  ;;  %s201_s27 = scalar_lea.vmem %s5690_s22, %s3273_s6  ;;  %s5691_s6 = sld [smem:[#allocation13_spill]] }
  0x42   :  { %v182_v0 = vadd.f32 %v181_v55, %v180_v60  ;;  %v188_v1 = vadd.f32 %v187_v58, %v186_v62  ;;  %v197_v2 = vld [vmem:[%s5689_s4] sm:$0x1] }
  0x43   :  { %v205_v3 = vld [vmem:[%s5689_s4] sm:$0x1] }
  0x44   :  { %v216_v5 = vld [vmem:[#allocation2] sm:$0xff]  ;;  %183 = vst [vmem:[#allocation2 + $0xb] sm:$0x1] %v182_v0  ;;  %v190_v6 = vadd.f32 %v189_v59, %v188_v1 }
  0x45   :  { %v194_v7 = vld [vmem:[%s193_s17] sm:$0x1]  ;;  %220 = vadd.xlane.f32.xlu0 %v216_v5 }
  0x46   :  { %v196_v8 = vadd.f32 %v195_v61, %v194_v7  ;;  %v202_v9 = vld [vmem:[%s201_s27] sm:$0x1]  ;;  %191 = vst [vmem:[#allocation2 + $0xc] sm:$0x1] %v190_v6 }
  0x47   :  { %v213_v10 = vld [vmem:[%s5689_s4] sm:$0x1]  ;;  %v204_v11 = vadd.f32 %v203_v63, %v202_v9  ;;  %v3361_v33 = vld [vmem:[%s5691_s6 + $0xa8] sm:$0xf]  ;;  %v3986_v34 = vld [vmem:[%s5691_s6 + $0xb0] sm:$0xf0] }
  0x48   :  { %v198_v12 = vadd.f32 %v197_v2, %v196_v8  ;;  %v210_v13 = vld [vmem:[%s209_s28] sm:$0x1]  ;;  %v3985_v35 = vld [vmem:[%s5691_s6 + $0xac] sm:$0xf]  ;;  %v3362_v36 = vor.u32 %v3986_v34, %v3361_v33  ;;  %v3363_v37 = vld [vmem:[%s5691_s6 + $0xb4] sm:$0xf0] }
  0x49   :  { %v206_v14 = vadd.f32 %v205_v3, %v204_v11  ;;  %v212_v15 = vadd.f32 %v211_v4, %v210_v13  ;;  %v3369_v38 = vld [vmem:[%s5691_s6 + $0xb0] sm:$0xf]  ;;  %v3987_v39 = vld [vmem:[%s5691_s6 + $0xb8] sm:$0xf0]  ;;  %v3366_v40 = vor.u32 %v3985_v35, %v3363_v37  ;;  %v3982_v44 = vld [vmem:[%s5691_s6 + $0x94] sm:$0xf] }
  0x4a   :  { %199 = vst [vmem:[#allocation2 + $0xd] sm:$0x1] %v198_v12  ;;  %v3370_v41 = vor.u32 %v3987_v39, %v3369_v38  ;;  %448 = vmatpush.bf16.msra.mxu0 %v3362_v36  ;;  %v3349_v42 = vld [vmem:[%s5691_s6 + $0x90] sm:$0xf]  ;;  %v3983_v43 = vld [vmem:[%s5691_s6 + $0x98] sm:$0xf0] }
  0x4b   :  { %207 = vst [vmem:[#allocation2 + $0xe] sm:$0x1] %v206_v14  ;;  %v214_v16 = vadd.f32 %v213_v10, %v212_v15  ;;  %462 = vmatpush.bf16.msra.mxu1 %v3366_v40  ;;  %v3350_v45 = vor.u32 %v3983_v43, %v3349_v42  ;;  %v3351_v46 = vld [vmem:[%s5691_s6 + $0x9c] sm:$0xf0]  ;;  %v3357_v47 = vld [vmem:[%s5691_s6 + $0x98] sm:$0xf] }
  0x4c   :  { %476 = vmatpush.bf16.msra.mxu2 %v3370_v41  ;;  %v3984_v48 = vld [vmem:[%s5691_s6 + $0xa0] sm:$0xf0]  ;;  %v3354_v49 = vor.u32 %v3982_v44, %v3351_v46  ;;  %v3337_v51 = vld [vmem:[%s5691_s6 + $0x78] sm:$0xf]  ;;  %v3979_v53 = vld [vmem:[%s5691_s6 + $0x7c] sm:$0xf] }
  0x4d   :  { %215 = vst [vmem:[#allocation2 + $0xf] sm:$0x1] %v214_v16  ;;  %v3358_v50 = vor.u32 %v3984_v48, %v3357_v47  ;;  %v3980_v52 = vld [vmem:[%s5691_s6 + $0x80] sm:$0xf0]  ;;  %v3339_v55 = vld [vmem:[%s5691_s6 + $0x84] sm:$0xf0] }
  0x4e   :  { %449 = vmatpush.bf16.msra.mxu0 %v3350_v45  ;;  %v3338_v54 = vor.u32 %v3980_v52, %v3337_v51  ;;  %v3345_v56 = vld [vmem:[%s5691_s6 + $0x80] sm:$0xf]  ;;  %v3981_v57 = vld [vmem:[%s5691_s6 + $0x88] sm:$0xf0]  ;;  %v3342_v58 = vor.u32 %v3979_v53, %v3339_v55  ;;  %v3976_v62 = vld [vmem:[%s5691_s6 + $0x64] sm:$0xf] }
  0x4f   :  { %463 = vmatpush.bf16.msra.mxu1 %v3354_v49  ;;  %v3346_v59 = vor.u32 %v3981_v57, %v3345_v56  ;;  %v3325_v60 = vld [vmem:[%s5691_s6 + $0x60] sm:$0xf]  ;;  %v3977_v61 = vld [vmem:[%s5691_s6 + $0x68] sm:$0xf0]  ;;  %v3327_v0 = vld [vmem:[%s5691_s6 + $0x6c] sm:$0xf0] }
  0x50   :  { %477 = vmatpush.bf16.msra.mxu2 %v3358_v50  ;;  %v3326_v63 = vor.u32 %v3977_v61, %v3325_v60  ;;  %v3333_v1 = vld [vmem:[%s5691_s6 + $0x68] sm:$0xf]  ;;  %v3978_v2 = vld [vmem:[%s5691_s6 + $0x70] sm:$0xf0]  ;;  %v3330_v3 = vor.u32 %v3976_v62, %v3327_v0  ;;  %v3973_v7 = vld [vmem:[%s5691_s6 + $0x4c] sm:$0xf] }
  0x51   :  { %v3334_v4 = vor.u32 %v3978_v2, %v3333_v1  ;;  %v3974_v6 = vld [vmem:[%s5691_s6 + $0x50] sm:$0xf0]  ;;  %v3315_v9 = vld [vmem:[%s5691_s6 + $0x54] sm:$0xf0]  ;;  %v3321_v10 = vld [vmem:[%s5691_s6 + $0x50] sm:$0xf] }
  0x52   :  { %450 = vmatpush.bf16.msra.mxu0 %v3338_v54  ;;  %v3975_v11 = vld [vmem:[%s5691_s6 + $0x58] sm:$0xf0]  ;;  %v3318_v12 = vor.u32 %v3973_v7, %v3315_v9  ;;  %v3301_v15 = vld [vmem:[%s5691_s6 + $0x30] sm:$0xf]  ;;  %v3303_v20 = vld [vmem:[%s5691_s6 + $0x3c] sm:$0xf0] }
  0x53   :  { %464 = vmatpush.bf16.msra.mxu1 %v3342_v58  ;;  %v3322_v13 = vor.u32 %v3975_v11, %v3321_v10  ;;  %v3971_v16 = vld [vmem:[%s5691_s6 + $0x38] sm:$0xf0]  ;;  %v3309_v21 = vld [vmem:[%s5691_s6 + $0x38] sm:$0xf]  ;;  %v3972_v22 = vld [vmem:[%s5691_s6 + $0x40] sm:$0xf0] }
  0x54   :  { %v217_v17 = vld [vmem:[#allocation2 + $0x8] sm:$0xff]  ;;  %478 = vmatpush.bf16.msra.mxu2 %v3346_v59  ;;  %v3302_v19 = vor.u32 %v3971_v16, %v3301_v15  ;;  %v3297_v34 = vld [vmem:[%s5691_s6 + $0x20] sm:$0xf]  ;;  %v3964_v40 = vld [vmem:[%s5691_s6 + $0x4] sm:$0xf]  ;;  %s5694_s4 = sld [smem:[#allocation7_spill]] }
  0x55   :  { %222 = vadd.xlane.f32.xlu0 %v217_v17  ;;  %v3291_v33 = vld [vmem:[%s5691_s6 + $0x24] sm:$0xf0]  ;;  %v3969_v35 = vld [vmem:[%s5691_s6 + $0x28] sm:$0xf0]  ;;  %v3277_v38 = vld [vmem:[%s5691_s6] sm:$0xf] }
  0x56   :  { %451 = vmatpush.bf16.msra.mxu0 %v3326_v63  ;;  %v3298_v37 = vor.u32 %v3969_v35, %v3297_v34  ;;  %v3965_v39 = vld [vmem:[%s5691_s6 + $0x8] sm:$0xf0]  ;;  %v3279_v42 = vld [vmem:[%s5691_s6 + $0xc] sm:$0xf0]  ;;  %v3285_v43 = vld [vmem:[%s5691_s6 + $0x8] sm:$0xf] }
  0x57   :  { %465 = vmatpush.bf16.msra.mxu1 %v3330_v3  ;;  %v3278_v41 = vor.u32 %v3965_v39, %v3277_v38  ;;  %v3966_v44 = vld [vmem:[%s5691_s6 + $0x10] sm:$0xf0]  ;;  %v3282_v45 = vor.u32 %v3964_v40, %v3279_v42  ;;  %v4280_v63 = vld [vmem:[%s5692_s29] ss:$0 sm:$0xff] }
  0x58   :  { %479 = vmatpush.bf16.msra.mxu2 %v3334_v4  ;;  %v3286_v46 = vor.u32 %v3966_v44, %v3285_v43  ;;  %v4281_v4 = vld [vmem:[%s5693_s0] ss:$0 sm:$0xff] }
  0x5b   :  { %466 = vmatpush.bf16.msra.mxu1 %v3318_v12 }
  0x5c   :  { %480 = vmatpush.bf16.msra.mxu2 %v3322_v13 }
  0xb8   :  { %v221_v25 = vpop.xlane.xlu0 %220 }
  0xb9   :  { %v231_v26 = vmul.f32 %v4710_v24, %v221_v25  ;;  %v3310_v25 = vor.u32 %v3972_v22, %v3309_v21 }
  0xbb   :  { %v4713_v27 = vsub.f32 %v216_v5, %v231_v26  ;;  %v3313_v5 = vld [vmem:[%s5691_s6 + $0x48] sm:$0xf]  ;;  %481 = vmatpush.bf16.msra.mxu2 %v3310_v25 }
  0xbc   :  { %v3314_v8 = vor.u32 %v3974_v6, %v3313_v5 }
  0xbd   :  { %v235_v28 = vmul.f32 %v4713_v27, %v4713_v27 }
  0xbe   :  { %452 = vmatpush.bf16.msra.mxu0 %v3314_v8 }
  0xbf   :  { %237 = vadd.xlane.f32.xlu1 %v235_v28  ;;  %v3289_v28 = vld [vmem:[%s5691_s6 + $0x18] sm:$0xf]  ;;  %482 = vmatpush.bf16.msra.mxu2 %v3298_v37 }
  0xc2   :  { %453 = vmatpush.bf16.msra.mxu0 %v3302_v19 }
  0xc3   :  { %483 = vmatpush.bf16.msra.mxu2 %v3286_v46 }
  0xc8   :  { %v223_v29 = vpop.xlane.xlu0 %222 }
  0xc9   :  { %v232_v30 = vmul.f32 %v4710_v24, %v223_v29  ;;  %v3968_v29 = vld [vmem:[%s5691_s6 + $0x20] sm:$0xf0] }
  0xcb   :  { %v4718_v31 = vsub.f32 %v217_v17, %v232_v30  ;;  %v3970_v17 = vld [vmem:[%s5691_s6 + $0x34] sm:$0xf]  ;;  %v3967_v30 = vld [vmem:[%s5691_s6 + $0x1c] sm:$0xf] }
  0xcc   :  { %v3306_v23 = vor.u32 %v3970_v17, %v3303_v20  ;;  %v3294_v36 = vor.u32 %v3967_v30, %v3291_v33 }
  0xcd   :  { %v236_v32 = vmul.f32 %v4718_v31, %v4718_v31 }
  0xce   :  { %467 = vmatpush.bf16.msra.mxu1 %v3306_v23 }
  0xcf   :  { %239 = vadd.xlane.f32.xlu1 %v236_v32  ;;  %v3290_v32 = vor.u32 %v3968_v29, %v3289_v28 }
  0xd1   :  { %454 = vmatpush.bf16.msra.mxu0 %v3290_v32 }
  0xd2   :  { %468 = vmatpush.bf16.msra.mxu1 %v3294_v36 }
  0xd5   :  { %455 = vmatpush.bf16.msra.mxu0 %v3278_v41 }
  0xd6   :  { %469 = vmatpush.bf16.msra.mxu1 %v3282_v45 }
 0x132   :  { %v238_v14 = vpop.xlane.xlu1 %237 }
 0x133   :  { %v241_v18 = vmul.f32 %v238_v14, %v4710_v24 }
 0x135   :  { %v243_v26 = vadd.f32 1e-12, %v241_v18 }
 0x137   :  { %4298 = vrsqrt.f32 %v243_v26  ;;  %vm251_vm2 = vweird.f32 %v243_v26 }
 0x13d   :  { %v4299_v47 = vpop.eup %4298 }
 0x13e   :  { %v246_v48 = vmul.f32 %v4299_v47, %v243_v26  ;;  %vm252_vm1 = vweird.f32 %v4299_v47 }
 0x13f   :  { %vm253_vm3 = vmor %vm251_vm2, %vm252_vm1 }
 0x140   :  { %v247_v49 = vmul.f32 %v4299_v47, %v246_v48 }
 0x142   :  { %v240_v50 = vpop.xlane.xlu1 %239  ;;  %v248_v53 = vmul.f32 0.5, %v247_v49 }
 0x143   :  { %v242_v51 = vmul.f32 %v240_v50, %v4710_v24 }
 0x144   :  { %v249_v54 = vsub.f32 1.5, %v248_v53 }
 0x145   :  { %v244_v52 = vadd.f32 1e-12, %v242_v51 }
 0x146   :  { %v250_v56 = vmul.f32 %v4299_v47, %v249_v54 }
 0x147   :  { %4300 = vrsqrt.f32 %v244_v52  ;;  %vm261_vm5 = vweird.f32 %v244_v52 }
 0x148   :  { %v254_v59 = vsel %vm253_vm3, %v4299_v47, %v250_v56 }
 0x149   :  { %v265_v62 = vmul.f32 %v254_v59, %v4713_v27 }
 0x14b   :  { %v270_v3 = vmul.f32 %v4280_v63, %v265_v62 }
 0x14d   :  { %v4301_v55 = vpop.eup %4300  ;;  %v4876_v6 = vadd.f32 %v4281_v4, %v270_v3 }
 0x14e   :  { %v256_v57 = vmul.f32 %v4301_v55, %v244_v52  ;;  %vm262_vm4 = vweird.f32 %v4301_v55 }
 0x14f   :  { %vm263_vm6 = vmor %vm261_vm5, %vm262_vm4 }
 0x150   :  { %v257_v58 = vmul.f32 %v4301_v55, %v256_v57 }
 0x152   :  { %v258_v60 = vmul.f32 0.5, %v257_v58 }
 0x154   :  { %v259_v61 = vsub.f32 1.5, %v258_v60 }
 0x156   :  { %v260_v0 = vmul.f32 %v4301_v55, %v259_v61 }
 0x158   :  { %v264_v1 = vsel %vm263_vm6, %v4301_v55, %v260_v0 }
 0x159   :  { %v266_v2 = vmul.f32 %v264_v1, %v4718_v31  ;;  %v4885_v31 = vld [vmem:[%s5646_s8] sm:$0x7] }
 0x15a   :  { %v314_v8 = vperm.slane %v4885_v31, 0  ;;  %v315_v9 = vperm.slane %v4885_v31, 1 }
 0x15b   :  { %v271_v5 = vmul.f32 %v4280_v63, %v266_v2 }
 0x15d   :  { %v4878_v7 = vadd.f32 %v4281_v4, %v271_v5 }
 0x15f   :  { %v311_v27 = vpack.c.bf16 %v4878_v7, %v4876_v6 }
 0x161   :  { %456 = vmatmul.bf16.vlgmr.msra.gmra.mxu0 %v311_v27  ;;  %470 = vmatmul.bf16.vlgmr.msra.gmra.mxu1 %v311_v27 }
 0x162   :  { %484 = vmatmul.bf16.vlgmr.msra.gmra.mxu2 %v311_v27 }
 0x1de   :  { %v457_v10 = vpop.f32.mrf.mxu0  ;;  %v471_v11 = vpop.f32.mrf.mxu1 }
 0x1df   :  { %v458_v12 = vadd.f32 %v457_v10, %v314_v8  ;;  %v472_v13 = vadd.f32 %v471_v11, %v315_v9 }
 0x1e1   :  { %v4108_v14 = vpack.i.bf16 %v472_v13, %v458_v12 }
 0x1e3   :  { %4109 = vxpose.xlu2.b32.start [1/2] (short) %v4108_v14, 128 }
 0x1e6   :  { %v459_v15 = vpop.f32.mrf.mxu0  ;;  %v473_v16 = vpop.f32.mrf.mxu1 }
 0x1e7   :  { %v460_v17 = vadd.f32 %v459_v15, %v314_v8  ;;  %v474_v18 = vadd.f32 %v473_v16, %v315_v9 }
 0x1e9   :  { %v4110_v19 = vpack.i.bf16 %v474_v18, %v460_v17 }
 0x1eb   :  { %4111 = vxpose.xlu2.b32.end [2/2] (short) %v4110_v19, 128 }
 0x27c   :  { %v4112_v20 = vpop.trf.xlu2 }
 0x27d   :  { %v4113_v21 = vunpack.i.l.bf16 %v4112_v20  ;;  %v4116_v39 = vunpack.i.h.bf16 %v4112_v20 }
 0x27f   :  { %v586_v25 = vpack.c.bf16 %v4113_v21, %v4113_v21  ;;  %v602_v45 = vpack.c.bf16 %v4116_v39, %v4116_v39 }
 0x281   :  { %v638_v29 = vunpack.c.l.b16 %v586_v25  ;;  %v666_v54 = vunpack.c.l.b16 %v602_v45 }
 0x284   :  { %v4117_v22 = vpop.trf.xlu2 }
 0x285   :  { %v4118_v23 = vunpack.i.l.bf16 %v4117_v22  ;;  %v4121_v35 = vunpack.i.h.bf16 %v4117_v22 }
 0x287   :  { %v587_v26 = vpack.c.bf16 %v4118_v23, %v4118_v23  ;;  %v603_v44 = vpack.c.bf16 %v4121_v35, %v4121_v35 }
 0x289   :  { %v639_v28 = vunpack.c.l.b16 %v587_v26  ;;  %v667_v52 = vunpack.c.l.b16 %v603_v44 }
 0x28b   :  { %v642_v30 = vpack.c.b16 %v639_v28, %v638_v29  ;;  %v670_v55 = vpack.c.b16 %v667_v52, %v666_v54 }
 0x28c   :  { %v4122_v32 = vpop.trf.xlu2 }
 0x28d   :  { %646 = vxpose.xlu0.c.b16.start [1/2] (short) (narrow) %v642_v30, 16  ;;  %v4123_v33 = vunpack.i.l.bf16 %v4122_v32  ;;  %v4126_v34 = vunpack.i.h.bf16 %v4122_v32 }
 0x28f   :  { %v588_v36 = vpack.c.bf16 %v4123_v33, %v4123_v33  ;;  %v604_v38 = vpack.c.bf16 %v4126_v34, %v4126_v34 }
 0x291   :  { %v668_v47 = vunpack.c.l.b16 %v604_v38  ;;  %v640_v48 = vunpack.c.l.b16 %v588_v36 }
 0x294   :  { %v4127_v37 = vpop.trf.xlu2 }
 0x295   :  { %v4128_v40 = vunpack.i.l.bf16 %v4127_v37  ;;  %v4131_v41 = vunpack.i.h.bf16 %v4127_v37 }
 0x297   :  { %v589_v42 = vpack.c.bf16 %v4128_v40, %v4128_v40  ;;  %v605_v43 = vpack.c.bf16 %v4131_v41, %v4131_v41 }
 0x299   :  { %v669_v46 = vunpack.c.l.b16 %v605_v43  ;;  %v641_v49 = vunpack.c.l.b16 %v589_v42 }
 0x29b   :  { %v671_v50 = vpack.c.b16 %v669_v46, %v668_v47  ;;  %v643_v51 = vpack.c.b16 %v641_v49, %v640_v48 }
 0x29c   :  { %v4132_v53 = vpop.trf.xlu2 }
 0x29d   :  { %684 = vmatpush.bf16.msra.mxu3 %v671_v50  ;;  %647 = vxpose.xlu0.c.b16.end [2/2] (short) (narrow) %v643_v51, 16  ;;  %v4133_v56 = vunpack.i.l.bf16 %v4132_v53  ;;  %v4136_v8 = vunpack.i.h.bf16 %v4132_v53 }
 0x29f   :  { %v590_v59 = vpack.c.bf16 %v4133_v56, %v4133_v56  ;;  %v606_v14 = vpack.c.bf16 %v4136_v8, %v4136_v8 }
 0x2a1   :  { %685 = vmatpush.bf16.msra.mxu3 %v670_v55  ;;  %v696_v62 = vunpack.c.l.b16 %v590_v59  ;;  %v724_v23 = vunpack.c.l.b16 %v606_v14 }
 0x2a4   :  { %v4137_v57 = vpop.trf.xlu2 }
 0x2a5   :  { %v4138_v58 = vunpack.i.l.bf16 %v4137_v57  ;;  %v4141_v3 = vunpack.i.h.bf16 %v4137_v57 }
 0x2a7   :  { %v591_v60 = vpack.c.bf16 %v4138_v58, %v4138_v58  ;;  %v607_v13 = vpack.c.bf16 %v4141_v3, %v4141_v3 }
 0x2a9   :  { %v697_v61 = vunpack.c.l.b16 %v591_v60  ;;  %v725_v21 = vunpack.c.l.b16 %v607_v13 }
 0x2ab   :  { %v700_v63 = vpack.c.b16 %v697_v61, %v696_v62  ;;  %v728_v25 = vpack.c.b16 %v725_v21, %v724_v23 }
 0x2ac   :  { %v4142_v0 = vpop.trf.xlu2 }
 0x2ad   :  { %704 = vxpose.xlu1.c.b16.start [1/2] (short) (narrow) %v700_v63, 16  ;;  %v4143_v1 = vunpack.i.l.bf16 %v4142_v0  ;;  %v4146_v2 = vunpack.i.h.bf16 %v4142_v0 }
 0x2af   :  { %v592_v4 = vpack.c.bf16 %v4143_v1, %v4143_v1  ;;  %v608_v27 = vpack.c.bf16 %v4146_v2, %v4146_v2 }
 0x2b1   :  { %v698_v15 = vunpack.c.l.b16 %v592_v4  ;;  %v726_v18 = vunpack.c.l.b16 %v608_v27 }
 0x2b4   :  { %v4147_v5 = vpop.trf.xlu2 }
 0x2b5   :  { %v4148_v9 = vunpack.i.l.bf16 %v4147_v5  ;;  %v4151_v10 = vunpack.i.h.bf16 %v4147_v5 }
 0x2b7   :  { %v593_v11 = vpack.c.bf16 %v4148_v9, %v4148_v9  ;;  %v609_v12 = vpack.c.bf16 %v4151_v10, %v4151_v10 }
 0x2b9   :  { %v699_v16 = vunpack.c.l.b16 %v593_v11  ;;  %v727_v17 = vunpack.c.l.b16 %v609_v12 }
 0x2bb   :  { %v701_v19 = vpack.c.b16 %v699_v16, %v698_v15  ;;  %v729_v20 = vpack.c.b16 %v727_v17, %v726_v18 }
 0x2bc   :  { %v4152_v22 = vpop.trf.xlu2 }
 0x2bd   :  { %705 = vxpose.xlu1.c.b16.end [2/2] (short) (narrow) %v701_v19, 16  ;;  %741 = vmatpush.bf16.msrb.mxu3 %v729_v20  ;;  %v4156_v26 = vunpack.i.h.bf16 %v4152_v22  ;;  %v4153_v28 = vunpack.i.l.bf16 %v4152_v22 }
 0x2bf   :  { %v610_v29 = vpack.c.bf16 %v4156_v26, %v4156_v26  ;;  %v594_v32 = vpack.c.bf16 %v4153_v28, %v4153_v28 }
 0x2c1   :  { %742 = vmatpush.bf16.msrb.mxu3 %v728_v25  ;;  %v753_v38 = vunpack.c.l.b16 %v594_v32  ;;  %v781_v39 = vunpack.c.l.b16 %v610_v29 }
 0x2c4   :  { %v4157_v30 = vpop.trf.xlu2 }
 0x2c5   :  { %v4161_v33 = vunpack.i.h.bf16 %v4157_v30  ;;  %v4158_v34 = vunpack.i.l.bf16 %v4157_v30 }
 0x2c7   :  { %v611_v35 = vpack.c.bf16 %v4161_v33, %v4161_v33  ;;  %v595_v36 = vpack.c.bf16 %v4158_v34, %v4158_v34 }
 0x2c9   :  { %v754_v37 = vunpack.c.l.b16 %v595_v36  ;;  %v782_v40 = vunpack.c.l.b16 %v611_v35  ;;  %v277_v35 = vld [vmem:[%s5694_s4] sm:$0xff] }
 0x2cb   :  { %v757_v41 = vpack.c.b16 %v754_v37, %v753_v38  ;;  %v785_v42 = vpack.c.b16 %v782_v40, %v781_v39  ;;  %v278_v39 = vld [vmem:[%s5694_s4 + $0x8] sm:$0xff] }
 0x2cc   :  { %v4162_v43 = vpop.trf.xlu2 }
 0x2cd   :  { %761 = vxpose.xlu2.c.b16.start [1/2] (short) (narrow) %v757_v41, 16  ;;  %v4166_v44 = vunpack.i.h.bf16 %v4162_v43  ;;  %v4163_v45 = vunpack.i.l.bf16 %v4162_v43 }
 0x2cf   :  { %v612_v46 = vpack.c.bf16 %v4166_v44, %v4166_v44  ;;  %v596_v47 = vpack.c.bf16 %v4163_v45, %v4163_v45 }
 0x2d1   :  { %v783_v53 = vunpack.c.l.b16 %v612_v46  ;;  %v755_v55 = vunpack.c.l.b16 %v596_v47 }
 0x2d4   :  { %v4167_v48 = vpop.trf.xlu2 }
 0x2d5   :  { %v4171_v49 = vunpack.i.h.bf16 %v4167_v48  ;;  %v4168_v50 = vunpack.i.l.bf16 %v4167_v48 }
 0x2d7   :  { %v613_v51 = vpack.c.bf16 %v4171_v49, %v4171_v49  ;;  %v597_v52 = vpack.c.bf16 %v4168_v50, %v4168_v50 }
 0x2d9   :  { %v784_v54 = vunpack.c.l.b16 %v613_v51  ;;  %v756_v56 = vunpack.c.l.b16 %v597_v52 }
 0x2db   :  { %v758_v57 = vpack.c.b16 %v756_v56, %v755_v55  ;;  %v786_v58 = vpack.c.b16 %v784_v54, %v783_v53 }
 0x2dc   :  { %v4172_v59 = vpop.trf.xlu2 }
 0x2dd   :  { %762 = vxpose.xlu2.c.b16.end [2/2] (short) (narrow) %v758_v57, 16  ;;  %v4173_v60 = vunpack.i.l.bf16 %v4172_v59  ;;  %v4176_v9 = vunpack.i.h.bf16 %v4172_v59 }
 0x2df   :  { %v598_v61 = vpack.c.bf16 %v4173_v60, %v4173_v60  ;;  %v614_v14 = vpack.c.bf16 %v4176_v9, %v4176_v9 }
 0x2e1   :  { %v810_v1 = vunpack.c.l.b16 %v598_v61  ;;  %v838_v25 = vunpack.c.l.b16 %v614_v14 }
 0x2e4   :  { %v4177_v62 = vpop.trf.xlu2 }
 0x2e5   :  { %v4178_v63 = vunpack.i.l.bf16 %v4177_v62  ;;  %v4181_v8 = vunpack.i.h.bf16 %v4177_v62 }
 0x2e7   :  { %v599_v0 = vpack.c.bf16 %v4178_v63, %v4178_v63  ;;  %v615_v13 = vpack.c.bf16 %v4181_v8, %v4181_v8 }
 0x2e9   :  { %v811_v2 = vunpack.c.l.b16 %v599_v0  ;;  %v839_v23 = vunpack.c.l.b16 %v615_v13 }
 0x2eb   :  { %v814_v3 = vpack.c.b16 %v811_v2, %v810_v1  ;;  %v842_v29 = vpack.c.b16 %v839_v23, %v838_v25 }
 0x2ec   :  { %v4182_v4 = vpop.trf.xlu2 }
 0x2ed   :  { %818 = vxpose.xlu0.c.b16.start [1/2] (short) (narrow) %v814_v3, 16  ;;  %v4183_v5 = vunpack.i.l.bf16 %v4182_v4  ;;  %v4186_v27 = vunpack.i.h.bf16 %v4182_v4 }
 0x2ef   :  { %v600_v10 = vpack.c.bf16 %v4183_v5, %v4183_v5  ;;  %v616_v11 = vpack.c.bf16 %v4186_v27, %v4186_v27 }
 0x2f1   :  { %v812_v18 = vunpack.c.l.b16 %v600_v10  ;;  %v840_v20 = vunpack.c.l.b16 %v616_v11 }
 0x2f4   :  { %v4187_v12 = vpop.trf.xlu2 }
 0x2f5   :  { %v4188_v15 = vunpack.i.l.bf16 %v4187_v12  ;;  %v4191_v16 = vunpack.i.h.bf16 %v4187_v12 }
 0x2f7   :  { %v601_v17 = vpack.c.bf16 %v4188_v15, %v4188_v15  ;;  %v617_v19 = vpack.c.bf16 %v4191_v16, %v4191_v16 }
 0x2f9   :  { %v813_v21 = vunpack.c.l.b16 %v601_v17  ;;  %v841_v22 = vunpack.c.l.b16 %v617_v19 }
 0x2fb   :  { %v815_v26 = vpack.c.b16 %v813_v21, %v812_v18  ;;  %v843_v28 = vpack.c.b16 %v841_v22, %v840_v20 }
 0x2fd   :  { %819 = vxpose.xlu0.c.b16.end [2/2] (short) (narrow) %v815_v26, 16  ;;  %855 = vmatpush.bf16.msrb.mxu0 %v843_v28 }
 0x301   :  { %856 = vmatpush.bf16.msrb.mxu0 %v842_v29 }
 0x339   :  { %v654_v30 = vpop.trf.xlu0 }
 0x33a   :  { %3371 = vmatmul.msk.bf16.vlgmr.msra.gmra.mxu3 %vm674_vm7, %v654_v30 }
 0x33b   :  { %798 = vmatpush.bf16.msra.mxu3 %v786_v58 }
 0x33f   :  { %799 = vmatpush.bf16.msra.mxu3 %v785_v42 }
 0x359   :  { %v712_v32 = vpop.trf.xlu1 }
 0x35a   :  { %3372 = vmatmul.msk.bf16.vlgmr.msrb.gmra.mxu3 %vm674_vm7, %v712_v32 }
 0x36e   :  { %v769_v33 = vpop.trf.xlu2 }
 0x36f   :  { %3373 = vmatmul.msk.bf16.vlgmr.msra.gmra.mxu3 %vm674_vm7, %v769_v33 }
 0x399   :  { %v826_v34 = vpop.trf.xlu0 }
 0x39a   :  { %3374 = vmatmul.msk.bf16.vlgmr.msrb.gmra.mxu0 %vm674_vm7, %v826_v34 }
 0x3bd   :  { %v687_v36 = vpop.f32.mrf.mxu3 }
 0x3be   :  { %v688_v37 = vadd.f32 %v687_v36, %v277_v35 }
 0x3c0   :  { %v864_v38 = vsel %vm863_vm8, %v688_v37, -inf }
 0x3c1   :  { %865 = vmax.xlane.f32.xlu1 %v864_v38 }
 0x3c5   :  { %v689_v40 = vpop.f32.mrf.mxu3 }
 0x3c6   :  { %v690_v41 = vadd.f32 %v689_v40, %v278_v39 }
 0x3c8   :  { %v867_v42 = vsel %vm863_vm8, %v690_v41, -inf }
 0x3c9   :  { %868 = vmax.xlane.f32.xlu0 %v867_v42  ;;  %v316_v42 = vperm.slane %v4885_v31, 2 }
 0x3dd   :  { %v744_v43 = vpop.f32.mrf.mxu3 }
 0x3de   :  { %v745_v44 = vadd.f32 %v744_v43, %v277_v35 }
 0x3e0   :  { %v870_v45 = vsel %vm863_vm8, %v745_v44, -inf }
 0x3e1   :  { %871 = vmax.xlane.f32.xlu2 %v870_v45 }
 0x3e5   :  { %v746_v46 = vpop.f32.mrf.mxu3 }
 0x3e6   :  { %v747_v47 = vadd.f32 %v746_v46, %v278_v39 }
 0x3e8   :  { %v873_v48 = vsel %vm863_vm8, %v747_v47, -inf }
 0x3e9   :  { %874 = vmax.xlane.f32.xlu1 %v873_v48 }
 0x3f2   :  { %v801_v49 = vpop.f32.mrf.mxu3 }
 0x3f3   :  { %v802_v50 = vadd.f32 %v801_v49, %v277_v35 }
 0x3f5   :  { %v876_v51 = vsel %vm863_vm8, %v802_v50, -inf }
 0x3f6   :  { %877 = vmax.xlane.f32.xlu1 %v876_v51 }
 0x3fa   :  { %v803_v52 = vpop.f32.mrf.mxu3 }
 0x3fb   :  { %v804_v53 = vadd.f32 %v803_v52, %v278_v39 }
 0x3fd   :  { %v879_v54 = vsel %vm863_vm8, %v804_v53, -inf }
 0x3fe   :  { %880 = vmax.xlane.f32.xlu1 %v879_v54 }
 0x417   :  { %v858_v55 = vpop.f32.mrf.mxu0 }
 0x418   :  { %v859_v56 = vadd.f32 %v858_v55, %v277_v35 }
 0x41a   :  { %v882_v57 = vsel %vm863_vm8, %v859_v56, -inf }
 0x41b   :  { %883 = vmax.xlane.f32.xlu1 %v882_v57 }
 0x41f   :  { %v860_v58 = vpop.f32.mrf.mxu0 }
 0x420   :  { %v861_v59 = vadd.f32 %v860_v58, %v278_v39 }
 0x422   :  { %v885_v60 = vsel %vm863_vm8, %v861_v59, -inf }
 0x423   :  { %886 = vmax.xlane.f32.xlu0 %v885_v60 }
 0x434   :  { %v866_v61 = vpop.xlane.xlu1 %865 }
 0x435   :  { %v888_v62 = vsub.f32 %v688_v37, %v866_v61 }
 0x437   :  { %v896_v63 = vmul.f32 1.442695, %v888_v62 }
 0x439   :  { %4302 = vpow2.f32 %v896_v63 }
 0x43c   :  { %v869_v0 = vpop.xlane.xlu0 %868 }
 0x43d   :  { %v889_v1 = vsub.f32 %v690_v41, %v869_v0  ;;  %v485_v41 = vpop.f32.mrf.mxu2 }
 0x43e   :  { %v486_v43 = vadd.f32 %v485_v41, %v316_v42 }
 0x43f   :  { %v4303_v2 = vpop.eup %4302  ;;  %v898_v3 = vmul.f32 1.442695, %v889_v1 }
 0x440   :  { %v912_v4 = vsel %vm863_vm8, %v4303_v2, 0.0 }
 0x441   :  { %4304 = vpow2.f32 %v898_v3  ;;  %913 = vadd.xlane.f32.xlu1 %v912_v4 }
 0x447   :  { %v4305_v5 = vpop.eup %4304 }
 0x448   :  { %v915_v27 = vsel %vm863_vm8, %v4305_v5, 0.0 }
 0x449   :  { %916 = vadd.xlane.f32.xlu0 %v915_v27 }
 0x454   :  { %v872_v8 = vpop.xlane.xlu2 %871 }
 0x455   :  { %v890_v9 = vsub.f32 %v745_v44, %v872_v8  ;;  %v487_v44 = vpop.f32.mrf.mxu2 }
 0x456   :  { %v488_v46 = vadd.f32 %v487_v44, %v316_v42 }
 0x457   :  { %v900_v10 = vmul.f32 1.442695, %v890_v9 }
 0x459   :  { %4306 = vpow2.f32 %v900_v10 }
 0x45c   :  { %v875_v11 = vpop.xlane.xlu1 %874 }
 0x45d   :  { %v891_v12 = vsub.f32 %v747_v47, %v875_v11 }
 0x45f   :  { %v4909_v13 = vpop.eup %4306  ;;  %v902_v14 = vmul.f32 1.442695, %v891_v12 }
 0x460   :  { %v918_v15 = vsel %vm863_vm8, %v4909_v13, 0.0 }
 0x461   :  { %4308 = vpow2.f32 %v902_v14  ;;  %919 = vadd.xlane.f32.xlu1 %v918_v15 }
 0x467   :  { %v4309_v16 = vpop.eup %4308 }
 0x468   :  { %v921_v17 = vsel %vm863_vm8, %v4309_v16, 0.0 }
 0x469   :  { %v878_v18 = vpop.xlane.xlu1 %877  ;;  %922 = vadd.xlane.f32.xlu0 %v921_v17 }
 0x46a   :  { %v892_v19 = vsub.f32 %v802_v50, %v878_v18 }
 0x46c   :  { %v904_v20 = vmul.f32 1.442695, %v892_v19 }
 0x46e   :  { %4310 = vpow2.f32 %v904_v20 }
 0x471   :  { %v881_v21 = vpop.xlane.xlu1 %880 }
 0x472   :  { %v893_v22 = vsub.f32 %v804_v53, %v881_v21 }
 0x474   :  { %v4914_v23 = vpop.eup %4310  ;;  %v906_v25 = vmul.f32 1.442695, %v893_v22 }
 0x475   :  { %v924_v26 = vsel %vm863_vm8, %v4914_v23, 0.0 }
 0x476   :  { %4312 = vpow2.f32 %v906_v25  ;;  %925 = vadd.xlane.f32.xlu1 %v924_v26 }
 0x47c   :  { %v4313_v28 = vpop.eup %4312 }
 0x47d   :  { %v927_v29 = vsel %vm863_vm8, %v4313_v28, 0.0 }
 0x47e   :  { %928 = vadd.xlane.f32.xlu0 %v927_v29 }
 0x48e   :  { %v884_v30 = vpop.xlane.xlu1 %883 }
 0x48f   :  { %v894_v32 = vsub.f32 %v859_v56, %v884_v30 }
 0x491   :  { %v908_v33 = vmul.f32 1.442695, %v894_v32 }
 0x493   :  { %4314 = vpow2.f32 %v908_v33 }
 0x496   :  { %v887_v34 = vpop.xlane.xlu0 %886 }
 0x497   :  { %v895_v35 = vsub.f32 %v861_v59, %v887_v34 }
 0x499   :  { %v4919_v36 = vpop.eup %4314  ;;  %v910_v37 = vmul.f32 1.442695, %v895_v35 }
 0x49a   :  { %v930_v38 = vsel %vm863_vm8, %v4919_v36, 0.0 }
 0x49b   :  { %4316 = vpow2.f32 %v910_v37  ;;  %931 = vadd.xlane.f32.xlu0 %v930_v38 }
 0x4a1   :  { %v4317_v39 = vpop.eup %4316 }
 0x4a2   :  { %v933_v40 = vsel %vm863_vm8, %v4317_v39, 0.0 }
 0x4a3   :  { %934 = vadd.xlane.f32.xlu0 %v933_v40 }
 0x4b0   :  { %554 = vxpose.xlu1.b32.start [1/2] (short) %v486_v43, 128 }
 0x4b4   :  { %v914_v45 = vpop.xlane.xlu1 %913 }
 0x4b5   :  { %4318 = vrcp.f32 %v914_v45 }
 0x4b8   :  { %555 = vxpose.xlu1.b32.end [2/2] (short) %v488_v46, 128 }
 0x4bb   :  { %v4319_v48 = vpop.eup %4318 }
 0x4bc   :  { %v917_v47 = vpop.xlane.xlu0 %916  ;;  %v944_v49 = vmul.f32 %v4319_v48, %v4303_v2 }
 0x4bd   :  { %4320 = vrcp.f32 %v917_v47 }
 0x4be   :  { %v952_v52 = vpack.c.bf16 %v944_v49, %v944_v49 }
 0x4c0   :  { %v972_v54 = vunpack.c.l.b16 %v952_v52 }
 0x4c3   :  { %v4321_v50 = vpop.eup %4320 }
 0x4c4   :  { %v945_v51 = vmul.f32 %v4321_v50, %v4305_v5 }
 0x4c6   :  { %v953_v53 = vpack.c.bf16 %v945_v51, %v945_v51 }
 0x4c8   :  { %v973_v55 = vunpack.c.l.b16 %v953_v53 }
 0x4ca   :  { %v974_v56 = vpack.c.b16 %v973_v55, %v972_v54 }
 0x4cc   :  { %v982_v31 = vsel %vm863_vm8, %v974_v56, 0 }
 0x4cd   :  { %991 = vmatpush.bf16.xpose.msrb.mxu1 %v982_v31 }
 0x4d4   :  { %v920_v57 = vpop.xlane.xlu1 %919 }
 0x4d5   :  { %4322 = vrcp.f32 %v920_v57 }
 0x4db   :  { %v4323_v59 = vpop.eup %4322 }
 0x4dc   :  { %v923_v58 = vpop.xlane.xlu0 %922  ;;  %v946_v60 = vmul.f32 %v4323_v59, %v4909_v13 }
 0x4dd   :  { %4324 = vrcp.f32 %v923_v58 }
 0x4de   :  { %v954_v63 = vpack.c.bf16 %v946_v60, %v946_v60 }
 0x4e0   :  { %v1015_v1 = vunpack.c.l.b16 %v954_v63 }
 0x4e3   :  { %v4325_v61 = vpop.eup %4324 }
 0x4e4   :  { %v947_v62 = vmul.f32 %v4325_v61, %v4309_v16 }
 0x4e6   :  { %v955_v0 = vpack.c.bf16 %v947_v62, %v947_v62 }
 0x4e8   :  { %v1016_v2 = vunpack.c.l.b16 %v955_v0 }
 0x4e9   :  { %v926_v3 = vpop.xlane.xlu1 %925 }
 0x4ea   :  { %v1017_v4 = vpack.c.b16 %v1016_v2, %v1015_v1  ;;  %4326 = vrcp.f32 %v926_v3 }
 0x4ec   :  { %v1025_v5 = vsel %vm863_vm8, %v1017_v4, 0 }
 0x4ed   :  { %1034 = vmatpush.bf16.xpose.msrb.mxu2 %v1025_v5 }
 0x4f0   :  { %v4327_v8 = vpop.eup %4326 }
 0x4f1   :  { %v929_v27 = vpop.xlane.xlu0 %928  ;;  %v948_v9 = vmul.f32 %v4327_v8, %v4914_v23 }
 0x4f2   :  { %4328 = vrcp.f32 %v929_v27 }
 0x4f3   :  { %v956_v12 = vpack.c.bf16 %v948_v9, %v948_v9 }
 0x4f5   :  { %v1058_v14 = vunpack.c.l.b16 %v956_v12 }
 0x4f8   :  { %v4329_v10 = vpop.eup %4328 }
 0x4f9   :  { %v949_v11 = vmul.f32 %v4329_v10, %v4313_v28 }
 0x4fb   :  { %v957_v13 = vpack.c.bf16 %v949_v11, %v949_v11 }
 0x4fd   :  { %v1059_v15 = vunpack.c.l.b16 %v957_v13 }
 0x4ff   :  { %v1060_v16 = vpack.c.b16 %v1059_v15, %v1058_v14 }
 0x501   :  { %v1068_v17 = vsel %vm863_vm8, %v1060_v16, 0 }
 0x502   :  { %1077 = vmatpush.bf16.xpose.msrb.mxu3 %v1068_v17 }
 0x50e   :  { %v932_v18 = vpop.xlane.xlu0 %931 }
 0x50f   :  { %4330 = vrcp.f32 %v932_v18 }
 0x515   :  { %v4331_v20 = vpop.eup %4330 }
 0x516   :  { %v935_v19 = vpop.xlane.xlu0 %934  ;;  %v950_v21 = vmul.f32 %v4331_v20, %v4919_v36 }
 0x517   :  { %4332 = vrcp.f32 %v935_v19 }
 0x518   :  { %v958_v23 = vpack.c.bf16 %v950_v21, %v950_v21 }
 0x51a   :  { %v1101_v28 = vunpack.c.l.b16 %v958_v23 }
 0x51d   :  { %v4333_v22 = vpop.eup %4332 }
 0x51e   :  { %v951_v25 = vmul.f32 %v4333_v22, %v4317_v39 }
 0x520   :  { %v959_v26 = vpack.c.bf16 %v951_v25, %v951_v25 }
 0x522   :  { %v1102_v29 = vunpack.c.l.b16 %v959_v26 }
 0x524   :  { %v1103_v30 = vpack.c.b16 %v1102_v29, %v1101_v28 }
 0x526   :  { %v1111_v32 = vsel %vm863_vm8, %v1103_v30, 0 }
 0x527   :  { %1120 = vmatpush.bf16.xpose.msra.mxu0 %v1111_v32 }
 0x554   :  { %v570_v33 = vpop.trf.xlu1 }
 0x555   :  { %v618_v34 = vpack.c.bf16 %v570_v33, %v570_v33 }
 0x557   :  { %v964_v38 = vunpack.c.l.b16 %v618_v34 }
 0x55c   :  { %v571_v35 = vpop.trf.xlu1 }
 0x55d   :  { %v619_v37 = vpack.c.bf16 %v571_v35, %v571_v35 }
 0x55f   :  { %v965_v40 = vunpack.c.l.b16 %v619_v37 }
 0x561   :  { %v968_v41 = vpack.c.b16 %v965_v40, %v964_v38 }
 0x563   :  { %3375 = vmatmul.msk.bf16.vlgmr.msrb.gmra.mxu1 %vm863_vm8, %v968_v41 }
 0x564   :  { %v572_v36 = vpop.trf.xlu1 }
 0x565   :  { %v620_v42 = vpack.c.bf16 %v572_v36, %v572_v36  ;;  %v3995_v36 = vld [vmem:[%s5647_s9 + $0x38] sm:$0xff] }
 0x566   :  { %1233 = vmatpush.bf16.msra.mxu1 %v3995_v36 }
 0x567   :  { %v966_v44 = vunpack.c.l.b16 %v620_v42 }
 0x56c   :  { %v573_v39 = vpop.trf.xlu1 }
 0x56d   :  { %v621_v43 = vpack.c.bf16 %v573_v39, %v573_v39  ;;  %v3994_v39 = vld [vmem:[%s5647_s9 + $0x30] sm:$0xff] }
 0x56e   :  { %1234 = vmatpush.bf16.msra.mxu1 %v3994_v39 }
 0x56f   :  { %v967_v45 = vunpack.c.l.b16 %v621_v43  ;;  %v3993_v43 = vld [vmem:[%s5647_s9 + $0x28] sm:$0xff] }
 0x571   :  { %v969_v46 = vpack.c.b16 %v967_v45, %v966_v44  ;;  %v3992_v44 = vld [vmem:[%s5647_s9 + $0x20] sm:$0xff] }
 0x572   :  { %1235 = vmatpush.bf16.msra.mxu1 %v3993_v43  ;;  %v3425_v43 = vld [vmem:[%s5651_s13 + $0x10] sm:$0xf] }
 0x573   :  { %3376 = vmatmul.msk.bf16.gmra.mxu1 %vm863_vm8, %v969_v46  ;;  %v3991_v46 = vld [vmem:[%s5647_s9 + $0x18] sm:$0xff] }
 0x574   :  { %v574_v47 = vpop.trf.xlu1 }
 0x575   :  { %v622_v48 = vpack.c.bf16 %v574_v47, %v574_v47  ;;  %v3990_v47 = vld [vmem:[%s5647_s9 + $0x10] sm:$0xff] }
 0x576   :  { %1236 = vmatpush.bf16.msra.mxu1 %v3992_v44  ;;  %v3999_v44 = vld [vmem:[%s5651_s13 + $0x14] sm:$0xf0] }
 0x577   :  { %v1007_v51 = vunpack.c.l.b16 %v622_v48 }
 0x57a   :  { %1237 = vmatpush.bf16.msra.mxu1 %v3991_v46  ;;  %v3426_v46 = vor.u32 %v3999_v44, %v3425_v43 }
 0x57c   :  { %v575_v49 = vpop.trf.xlu1 }
 0x57d   :  { %v623_v50 = vpack.c.bf16 %v575_v49, %v575_v49 }
 0x57e   :  { %1238 = vmatpush.bf16.msra.mxu1 %v3990_v47  ;;  %v3427_v47 = vld [vmem:[%s5651_s13 + $0x18] sm:$0xf0] }
 0x57f   :  { %v1008_v52 = vunpack.c.l.b16 %v623_v50  ;;  %v3989_v50 = vld [vmem:[%s5647_s9 + $0x8] sm:$0xff] }
 0x581   :  { %v1011_v53 = vpack.c.b16 %v1008_v52, %v1007_v51  ;;  %v3988_v51 = vld [vmem:[%s5647_s9] sm:$0xff] }
 0x582   :  { %1239 = vmatpush.bf16.msra.mxu1 %v3989_v50 }
 0x583   :  { %3377 = vmatmul.msk.bf16.vlgmr.msrb.gmra.mxu2 %vm863_vm8, %v1011_v53 }
 0x584   :  { %v576_v54 = vpop.trf.xlu1 }
 0x585   :  { %v624_v55 = vpack.c.bf16 %v576_v54, %v576_v54 }
 0x586   :  { %1240 = vmatpush.bf16.msra.mxu1 %v3988_v51 }
 0x587   :  { %v1009_v57 = vunpack.c.l.b16 %v624_v55  ;;  %v4282_v55 = vld [vmem:[%s5648_s10] ss:$0 sm:$0xff] }
 0x58c   :  { %v577_v56 = vpop.trf.xlu1 }
 0x58d   :  { %v625_v31 = vpack.c.bf16 %v577_v56, %v577_v56 }
 0x58f   :  { %v1010_v58 = vunpack.c.l.b16 %v625_v31 }
 0x591   :  { %v1012_v59 = vpack.c.b16 %v1010_v58, %v1009_v57 }
 0x593   :  { %3378 = vmatmul.msk.bf16.gmra.mxu2 %vm863_vm8, %v1012_v59 }
 0x594   :  { %v578_v60 = vpop.trf.xlu1 }
 0x595   :  { %v626_v61 = vpack.c.bf16 %v578_v60, %v578_v60 }
 0x597   :  { %v1050_v0 = vunpack.c.l.b16 %v626_v61 }
 0x59c   :  { %v579_v62 = vpop.trf.xlu1 }
 0x59d   :  { %v627_v63 = vpack.c.bf16 %v579_v62, %v579_v62 }
 0x59f   :  { %v1051_v1 = vunpack.c.l.b16 %v627_v63 }
 0x5a1   :  { %v1054_v2 = vpack.c.b16 %v1051_v1, %v1050_v0 }
 0x5a3   :  { %3379 = vmatmul.msk.bf16.vlgmr.msrb.gmra.mxu3 %vm863_vm8, %v1054_v2 }
 0x5a4   :  { %v580_v3 = vpop.trf.xlu1 }
 0x5a5   :  { %v628_v4 = vpack.c.bf16 %v580_v3, %v580_v3 }
 0x5a7   :  { %v1052_v8 = vunpack.c.l.b16 %v628_v4  ;;  %v4011_v4 = vld [vmem:[%s5651_s13 + $0x74] sm:$0xf0] }
 0x5ac   :  { %v581_v5 = vpop.trf.xlu1 }
 0x5ad   :  { %v629_v27 = vpack.c.bf16 %v581_v5, %v581_v5  ;;  %v4010_v5 = vld [vmem:[%s5651_s13 + $0x74] sm:$0xf] }
 0x5af   :  { %v1053_v9 = vunpack.c.l.b16 %v629_v27 }
 0x5b1   :  { %v1055_v10 = vpack.c.b16 %v1053_v9, %v1052_v8  ;;  %v3475_v8 = vld [vmem:[%s5651_s13 + $0x78] sm:$0xf0] }
 0x5b2   :  { %v3478_v9 = vor.u32 %v4010_v5, %v3475_v8 }
 0x5b3   :  { %3380 = vmatmul.msk.bf16.gmra.mxu3 %vm863_vm8, %v1055_v10  ;;  %v3465_v10 = vld [vmem:[%s5651_s13 + $0x60] sm:$0xf] }
 0x5b4   :  { %v582_v11 = vpop.trf.xlu1  ;;  %1418 = vmatpush.bf16.msra.mxu3 %v3478_v9 }
 0x5b5   :  { %v630_v12 = vpack.c.bf16 %v582_v11, %v582_v11  ;;  %v4009_v11 = vld [vmem:[%s5651_s13 + $0x64] sm:$0xf0] }
 0x5b7   :  { %v1093_v15 = vunpack.c.l.b16 %v630_v12  ;;  %v4008_v12 = vld [vmem:[%s5651_s13 + $0x64] sm:$0xf] }
 0x5bc   :  { %v583_v13 = vpop.trf.xlu1 }
 0x5bd   :  { %v631_v14 = vpack.c.bf16 %v583_v13, %v583_v13  ;;  %v3466_v13 = vor.u32 %v4009_v11, %v3465_v10  ;;  %v4283_v10 = vld [vmem:[%s5649_s11] ss:$0 sm:$0xff] }
 0x5bf   :  { %v1094_v16 = vunpack.c.l.b16 %v631_v14  ;;  %v3467_v14 = vld [vmem:[%s5651_s13 + $0x68] sm:$0xf0] }
 0x5c1   :  { %v1097_v17 = vpack.c.b16 %v1094_v16, %v1093_v15  ;;  %v3470_v15 = vor.u32 %v4008_v12, %v3467_v14  ;;  %v3457_v16 = vld [vmem:[%s5651_s13 + $0x50] sm:$0xf] }
 0x5c3   :  { %3381 = vmatmul.msk.bf16.vlgmr.msra.gmra.mxu0 %vm863_vm8, %v1097_v17  ;;  %1419 = vmatpush.bf16.msra.mxu3 %v3470_v15  ;;  %v4007_v17 = vld [vmem:[%s5651_s13 + $0x54] sm:$0xf0]  ;;  %v4284_v15 = vld [vmem:[%s5650_s12] ss:$0 sm:$0xff] }
 0x5c4   :  { %v584_v18 = vpop.trf.xlu1 }
 0x5c5   :  { %v632_v19 = vpack.c.bf16 %v584_v18, %v584_v18  ;;  %v4006_v18 = vld [vmem:[%s5651_s13 + $0x54] sm:$0xf] }
 0x5c7   :  { %v1095_v22 = vunpack.c.l.b16 %v632_v19  ;;  %v3458_v19 = vor.u32 %v4007_v17, %v3457_v16 }
 0x5cc   :  { %v585_v20 = vpop.trf.xlu1 }
 0x5cd   :  { %v633_v21 = vpack.c.bf16 %v585_v20, %v585_v20  ;;  %v3459_v20 = vld [vmem:[%s5651_s13 + $0x58] sm:$0xf0] }
 0x5cf   :  { %v1096_v25 = vunpack.c.l.b16 %v633_v21  ;;  %v3462_v21 = vor.u32 %v4006_v18, %v3459_v20  ;;  %v4018_v20 = vld [vmem:[%s5653_s15 + $0x30] sm:$0xff] }
 0x5d1   :  { %v1098_v23 = vpack.c.b16 %v1096_v25, %v1095_v22  ;;  %1420 = vmatpush.bf16.msra.mxu3 %v3462_v21  ;;  %v3449_v22 = vld [vmem:[%s5651_s13 + $0x40] sm:$0xf]  ;;  %v4005_v25 = vld [vmem:[%s5651_s13 + $0x44] sm:$0xf0]  ;;  %v4026_v21 = vld [vmem:[%s5653_s15 + $0x70] sm:$0xff] }
 0x5d3   :  { %3382 = vmatmul.msk.bf16.gmra.mxu0 %vm863_vm8, %v1098_v23  ;;  %v4004_v23 = vld [vmem:[%s5651_s13 + $0x44] sm:$0xf] }
 0x5e0   :  { %v993_v26 = vpop.f32.mrf.mxu1 }
 0x5e1   :  { %1132 = vxpose.xlu2.b32.start [1/16] (narrow) %v993_v26, 16  ;;  %v3450_v26 = vor.u32 %v4005_v25, %v3449_v22  ;;  %v4017_v22 = vld [vmem:[%s5653_s15 + $0x28] sm:$0xff] }
 0x5e2   :  { %v4025_v25 = vld [vmem:[%s5653_s15 + $0x68] sm:$0xff] }
 0x5e8   :  { %v995_v28 = vpop.f32.mrf.mxu1 }
 0x5e9   :  { %1133 = vxpose.xlu2.b32.cont [2/16] (narrow) %v995_v28, 16  ;;  %v3451_v28 = vld [vmem:[%s5651_s13 + $0x48] sm:$0xf0] }
 0x5f0   :  { %v998_v29 = vpop.f32.mrf.mxu1 }
 0x5f1   :  { %1134 = vxpose.xlu2.b32.cont [3/16] (narrow) %v998_v29, 16  ;;  %v3454_v29 = vor.u32 %v4004_v23, %v3451_v28  ;;  %v4016_v23 = vld [vmem:[%s5653_s15 + $0x20] sm:$0xff]  ;;  %v4015_v28 = vld [vmem:[%s5653_s15 + $0x18] sm:$0xff] }
 0x5f3   :  { %1421 = vmatpush.bf16.msra.mxu3 %v3454_v29  ;;  %v4023_v29 = vld [vmem:[%s5653_s15 + $0x58] sm:$0xff] }
 0x5f8   :  { %v1000_v30 = vpop.f32.mrf.mxu1 }
 0x5f9   :  { %1135 = vxpose.xlu2.b32.cont [4/16] (narrow) %v1000_v30, 16  ;;  %v3441_v30 = vld [vmem:[%s5651_s13 + $0x30] sm:$0xf] }
 0x606   :  { %v1036_v32 = vpop.f32.mrf.mxu2 }
 0x607   :  { %1136 = vxpose.xlu2.b32.cont [5/16] (narrow) %v1036_v32, 16  ;;  %v4003_v32 = vld [vmem:[%s5651_s13 + $0x34] sm:$0xf0] }
 0x60e   :  { %v1038_v33 = vpop.f32.mrf.mxu2 }
 0x60f   :  { %1137 = vxpose.xlu2.b32.cont [6/16] (narrow) %v1038_v33, 16  ;;  %v4002_v33 = vld [vmem:[%s5651_s13 + $0x34] sm:$0xf] }
 0x616   :  { %v1041_v34 = vpop.f32.mrf.mxu2 }
 0x617   :  { %1138 = vxpose.xlu2.b32.cont [7/16] (narrow) %v1041_v34, 16  ;;  %v3442_v34 = vor.u32 %v4003_v32, %v3441_v30  ;;  %v4014_v30 = vld [vmem:[%s5653_s15 + $0x10] sm:$0xff] }
 0x618   :  { %v4022_v32 = vld [vmem:[%s5653_s15 + $0x50] sm:$0xff] }
 0x61e   :  { %v1043_v35 = vpop.f32.mrf.mxu2 }
 0x61f   :  { %1139 = vxpose.xlu2.b32.cont [8/16] (narrow) %v1043_v35, 16  ;;  %v3443_v35 = vld [vmem:[%s5651_s13 + $0x38] sm:$0xf0] }
 0x626   :  { %v1079_v37 = vpop.f32.mrf.mxu3 }
 0x627   :  { %1140 = vxpose.xlu2.b32.cont [9/16] (narrow) %v1079_v37, 16  ;;  %v3446_v37 = vor.u32 %v4002_v33, %v3443_v35  ;;  %v4013_v33 = vld [vmem:[%s5653_s15 + $0x8] sm:$0xff]  ;;  %v1318_v35 = vld [vmem:[%s5652_s14] sm:$0x3] }
 0x629   :  { %1422 = vmatpush.bf16.msra.mxu3 %v3446_v37  ;;  %v4012_v37 = vld [vmem:[%s5653_s15] sm:$0xff] }
 0x62e   :  { %v1081_v38 = vpop.f32.mrf.mxu3 }
 0x62f   :  { %1141 = vxpose.xlu2.b32.cont [10/16] (narrow) %v1081_v38, 16  ;;  %v3433_v38 = vld [vmem:[%s5651_s13 + $0x20] sm:$0xf] }
 0x636   :  { %v1084_v40 = vpop.f32.mrf.mxu3 }
 0x637   :  { %1142 = vxpose.xlu2.b32.cont [11/16] (narrow) %v1084_v40, 16  ;;  %v4001_v40 = vld [vmem:[%s5651_s13 + $0x24] sm:$0xf0] }
 0x638   :  { %v3434_v36 = vor.u32 %v4001_v40, %v3433_v38  ;;  %v4020_v38 = vld [vmem:[%s5653_s15 + $0x40] sm:$0xff]  ;;  %v1320_v40 = vperm.slane %v1318_v35, 0 }
 0x63e   :  { %v1086_v41 = vpop.f32.mrf.mxu3 }
 0x63f   :  { %1143 = vxpose.xlu2.b32.cont [12/16] (narrow) %v1086_v41, 16  ;;  %v4000_v41 = vld [vmem:[%s5651_s13 + $0x24] sm:$0xf] }
 0x640   :  { %v1122_v42 = vpop.f32.mrf.mxu0 }
 0x647   :  { %1144 = vxpose.xlu2.b32.cont [13/16] (narrow) %v1122_v42, 16  ;;  %v3435_v42 = vld [vmem:[%s5651_s13 + $0x28] sm:$0xf0] }
 0x648   :  { %v1124_v45 = vpop.f32.mrf.mxu0  ;;  %v3438_v39 = vor.u32 %v4000_v41, %v3435_v42  ;;  %v1321_v41 = vperm.slane %v1318_v35, 1 }
 0x64a   :  { %1423 = vmatpush.bf16.msra.mxu3 %v3438_v39 }
 0x64f   :  { %1145 = vxpose.xlu2.b32.cont [14/16] (narrow) %v1124_v45, 16  ;;  %v3998_v45 = vld [vmem:[%s5651_s13 + $0x14] sm:$0xf] }
 0x650   :  { %v1127_v48 = vpop.f32.mrf.mxu0  ;;  %v3430_v51 = vor.u32 %v3998_v45, %v3427_v47 }
 0x652   :  { %1424 = vmatpush.bf16.msra.mxu3 %v3430_v51 }
 0x657   :  { %1146 = vxpose.xlu2.b32.cont [15/16] (narrow) %v1127_v48, 16  ;;  %v3417_v48 = vld [vmem:[%s5651_s13] sm:$0xf] }
 0x658   :  { %v1129_v49 = vpop.f32.mrf.mxu0 }
 0x65f   :  { %1147 = vxpose.xlu2.b32.end [16/16] (narrow) %v1129_v49, 16  ;;  %v3997_v49 = vld [vmem:[%s5651_s13 + $0x4] sm:$0xf0] }
 0x680   :  { %v1148_v52 = vpop.trf.xlu2 }
 0x688   :  { %v1149_v53 = vpop.trf.xlu2 }
 0x689   :  { %v1180_v54 = vpack.c.bf16 %v1149_v53, %v1148_v52  ;;  %v3996_v52 = vld [vmem:[%s5651_s13 + $0x4] sm:$0xf]  ;;  %v3419_v53 = vld [vmem:[%s5651_s13 + $0x8] sm:$0xf0] }
 0x68b   :  { %1241 = vmatmul.bf16.vlgmr.msra.gmra.mxu1 %v1180_v54 }
 0x708   :  { %v1242_v56 = vpop.f32.mrf.mxu1 }
 0x709   :  { %v1243_v31 = vadd.f32 %v4282_v55, %v1242_v56  ;;  %v3422_v56 = vor.u32 %v3996_v52, %v3419_v53 }
 0x70b   :  { %v1247_v57 = vadd.f32 %v1243_v31, %v4876_v6  ;;  %1425 = vmatpush.bf16.msra.mxu3 %v3422_v56 }
 0x70d   :  { %1251 = vadd.xlane.f32.xlu0 %v1247_v57 }
 0x710   :  { %v1244_v58 = vpop.f32.mrf.mxu1 }
 0x711   :  { %v1245_v59 = vadd.f32 %v4282_v55, %v1244_v58  ;;  %v3418_v55 = vor.u32 %v3997_v49, %v3417_v48 }
 0x713   :  { %v1248_v60 = vadd.f32 %v1245_v59, %v4878_v7  ;;  %v3473_v7 = vld [vmem:[%s5651_s13 + $0x70] sm:$0xf] }
 0x714   :  { %v3474_v27 = vor.u32 %v4011_v4, %v3473_v7 }
 0x715   :  { %1253 = vadd.xlane.f32.xlu0 %v1248_v60 }
 0x716   :  { %1404 = vmatpush.bf16.msra.mxu2 %v3474_v27 }
 0x71a   :  { %1405 = vmatpush.bf16.msra.mxu2 %v3466_v13 }
 0x71e   :  { %1406 = vmatpush.bf16.msra.mxu2 %v3458_v19  ;;  %v4019_v19 = vld [vmem:[%s5653_s15 + $0x38] sm:$0xff] }
 0x71f   :  { %1602 = vmatpush.bf16.msrb.mxu0 %v4019_v19 }
 0x722   :  { %1407 = vmatpush.bf16.msra.mxu2 %v3450_v26  ;;  %v4024_v26 = vld [vmem:[%s5653_s15 + $0x60] sm:$0xff] }
 0x723   :  { %1603 = vmatpush.bf16.msrb.mxu0 %v4018_v20 }
 0x726   :  { %1408 = vmatpush.bf16.msra.mxu2 %v3442_v34  ;;  %v4021_v34 = vld [vmem:[%s5653_s15 + $0x48] sm:$0xff] }
 0x727   :  { %1604 = vmatpush.bf16.msrb.mxu0 %v4017_v22  ;;  %v4285_v22 = vld [vmem:[%s5654_s16] ss:$0 sm:$0xff] }
 0x72a   :  { %1409 = vmatpush.bf16.msra.mxu2 %v3434_v36 }
 0x72b   :  { %1605 = vmatpush.bf16.msrb.mxu0 %v4016_v23 }
 0x72e   :  { %1410 = vmatpush.bf16.msra.mxu2 %v3426_v46 }
 0x72f   :  { %1606 = vmatpush.bf16.msrb.mxu0 %v4015_v28 }
 0x732   :  { %1411 = vmatpush.bf16.msra.mxu2 %v3418_v55 }
 0x733   :  { %1607 = vmatpush.bf16.msrb.mxu0 %v4014_v30 }
 0x737   :  { %1608 = vmatpush.bf16.msrb.mxu0 %v4013_v33 }
 0x73b   :  { %1609 = vmatpush.bf16.msrb.mxu0 %v4012_v37 }
 0x780   :  { %v1252_v61 = vpop.xlane.xlu0 %1251 }
 0x781   :  { %v1255_v62 = vmul.f32 %v1252_v61, %v4710_v24 }
 0x783   :  { %v4970_v63 = vsub.f32 %v1247_v57, %v1255_v62 }
 0x785   :  { %v1259_v0 = vmul.f32 %v4970_v63, %v4970_v63 }
 0x787   :  { %1261 = vadd.xlane.f32.xlu0 %v1259_v0 }
 0x788   :  { %v1254_v1 = vpop.xlane.xlu0 %1253 }
 0x789   :  { %v1256_v2 = vmul.f32 %v1254_v1, %v4710_v24 }
 0x78b   :  { %v4975_v3 = vsub.f32 %v1248_v60, %v1256_v2 }
 0x78d   :  { %v1260_v6 = vmul.f32 %v4975_v3, %v4975_v3 }
 0x78f   :  { %1263 = vadd.xlane.f32.xlu0 %v1260_v6 }
 0x7fa   :  { %v1262_v50 = vpop.xlane.xlu0 %1261 }
 0x7fb   :  { %v1265_v54 = vmul.f32 %v1262_v50, %v4710_v24 }
 0x7fd   :  { %v1267_v31 = vadd.f32 1e-12, %v1265_v54 }
 0x7ff   :  { %4334 = vrsqrt.f32 %v1267_v31  ;;  %vm1275_vm10 = vweird.f32 %v1267_v31 }
 0x802   :  { %v1264_v57 = vpop.xlane.xlu0 %1263 }
 0x803   :  { %v1266_v58 = vmul.f32 %v1264_v57, %v4710_v24 }
 0x805   :  { %v4335_v59 = vpop.eup %4334  ;;  %v1268_v60 = vadd.f32 1e-12, %v1266_v58 }
 0x806   :  { %v1270_v61 = vmul.f32 %v4335_v59, %v1267_v31  ;;  %vm1276_vm9 = vweird.f32 %v4335_v59 }
 0x807   :  { %4336 = vrsqrt.f32 %v1268_v60  ;;  %vm1277_vm11 = vmor %vm1275_vm10, %vm1276_vm9  ;;  %vm1285_vm13 = vweird.f32 %v1268_v60 }
 0x808   :  { %v1271_v62 = vmul.f32 %v4335_v59, %v1270_v61 }
 0x80a   :  { %v1272_v0 = vmul.f32 0.5, %v1271_v62 }
 0x80c   :  { %v1273_v1 = vsub.f32 1.5, %v1272_v0 }
 0x80d   :  { %v4337_v2 = vpop.eup %4336 }
 0x80e   :  { %v1274_v6 = vmul.f32 %v4335_v59, %v1273_v1  ;;  %v1280_v7 = vmul.f32 %v4337_v2, %v1268_v60  ;;  %vm1286_vm12 = vweird.f32 %v4337_v2 }
 0x80f   :  { %vm1287_vm14 = vmor %vm1285_vm13, %vm1286_vm12 }
 0x810   :  { %v1281_v4 = vmul.f32 %v4337_v2, %v1280_v7  ;;  %v1278_v5 = vsel %vm1277_vm11, %v4335_v59, %v1274_v6 }
 0x811   :  { %v1289_v9 = vmul.f32 %v1278_v5, %v4970_v63 }
 0x812   :  { %v1282_v27 = vmul.f32 0.5, %v1281_v4 }
 0x813   :  { %v1294_v14 = vmul.f32 %v4283_v10, %v1289_v9 }
 0x814   :  { %v1283_v8 = vsub.f32 1.5, %v1282_v27 }
 0x815   :  { %v5085_v17 = vadd.f32 %v4284_v15, %v1294_v14 }
 0x816   :  { %v1284_v11 = vmul.f32 %v4337_v2, %v1283_v8 }
 0x818   :  { %v1288_v12 = vsel %vm1287_vm14, %v4337_v2, %v1284_v11 }
 0x819   :  { %v1290_v13 = vmul.f32 %v1288_v12, %v4975_v3  ;;  %v4027_v3 = vld [vmem:[%s5653_s15 + $0x78] sm:$0xff] }
 0x81a   :  { %1616 = vmatpush.bf16.msrb.mxu1 %v4027_v3 }
 0x81b   :  { %v1295_v16 = vmul.f32 %v4283_v10, %v1290_v13 }
 0x81d   :  { %v5087_v18 = vadd.f32 %v4284_v15, %v1295_v16 }
 0x81e   :  { %1617 = vmatpush.bf16.msrb.mxu1 %v4026_v21 }
 0x81f   :  { %v1317_v63 = vpack.c.bf16 %v5087_v18, %v5085_v17 }
 0x821   :  { %1412 = vmatmul.bf16.vlgmr.msra.gmra.mxu2 %v1317_v63  ;;  %1426 = vmatmul.bf16.vlgmr.msra.gmra.mxu3 %v1317_v63 }
 0x822   :  { %1618 = vmatpush.bf16.msrb.mxu1 %v4025_v25 }
 0x826   :  { %1619 = vmatpush.bf16.msrb.mxu1 %v4024_v26 }
 0x82a   :  { %1620 = vmatpush.bf16.msrb.mxu1 %v4023_v29 }
 0x82e   :  { %1621 = vmatpush.bf16.msrb.mxu1 %v4022_v32 }
 0x832   :  { %1622 = vmatpush.bf16.msrb.mxu1 %v4021_v34 }
 0x836   :  { %1623 = vmatpush.bf16.msrb.mxu1 %v4020_v38 }
 0x8a4   :  { %v1413_v36 = vpop.f32.mrf.mxu2  ;;  %v1427_v42 = vpop.f32.mrf.mxu3 }
 0x8a5   :  { %v1414_v39 = vadd.f32 %v1413_v36, %v1320_v40  ;;  %v1428_v43 = vadd.f32 %v1427_v42, %v1321_v41 }
 0x8a7   :  { %v1436_v44 = vmul.f32 0.044715, %v1414_v39  ;;  %v1437_v45 = vmul.f32 0.044715, %v1428_v43  ;;  %v1432_v10 = vmul.f32 0.5, %v1414_v39  ;;  %v1433_v13 = vmul.f32 0.5, %v1428_v43 }
 0x8a9   :  { %v1440_v46 = vmul.f32 %v1436_v44, %v1414_v39  ;;  %v1441_v47 = vmul.f32 %v1437_v45, %v1428_v43  ;;  %v4049_v44 = vld [vmem:[%s5691_s6 + $0x16c] sm:$0xf] }
 0x8ab   :  { %v1444_v48 = vmul.f32 %v1440_v46, %v1414_v39  ;;  %v1445_v49 = vmul.f32 %v1441_v47, %v1428_v43  ;;  %v3664_v46 = vld [vmem:[%s5691_s6 + $0x174] sm:$0xf0]  ;;  %v3670_v47 = vld [vmem:[%s5691_s6 + $0x170] sm:$0xf] }
 0x8ac   :  { %v1415_v50 = vpop.f32.mrf.mxu2  ;;  %v1429_v51 = vpop.f32.mrf.mxu3 }
 0x8ad   :  { %v1448_v52 = vadd.f32 %v1444_v48, %v1414_v39  ;;  %v1416_v53 = vadd.f32 %v1415_v50, %v1320_v40  ;;  %v1430_v54 = vadd.f32 %v1429_v51, %v1321_v41  ;;  %v1449_v55 = vadd.f32 %v1445_v49, %v1428_v43  ;;  %v4050_v43 = vld [vmem:[%s5691_s6 + $0x170] sm:$0xf0]  ;;  %v4051_v48 = vld [vmem:[%s5691_s6 + $0x178] sm:$0xf0]  ;;  %v3650_v51 = vld [vmem:[%s5691_s6 + $0x150] sm:$0xf] }
 0x8ae   :  { %v3667_v49 = vor.u32 %v4049_v44, %v3664_v46  ;;  %v3671_v50 = vor.u32 %v4051_v48, %v3670_v47  ;;  %v4029_v46 = vld [vmem:[%s5691_s6 + $0xc8] sm:$0xf0]  ;;  %v4028_v47 = vld [vmem:[%s5691_s6 + $0xc4] sm:$0xf] }
 0x8af   :  { %v1438_v56 = vmul.f32 0.044715, %v1416_v53  ;;  %v1439_v31 = vmul.f32 0.044715, %v1430_v54  ;;  %v1452_v57 = vmul.f32 0.7978846, %v1448_v52 }
 0x8b0   :  { %v1453_v59 = vmul.f32 0.7978846, %v1449_v55  ;;  %v1434_v11 = vmul.f32 0.5, %v1416_v53  ;;  %v1435_v14 = vmul.f32 0.5, %v1430_v54  ;;  %1869 = vmatpush.bf16.msrb.mxu3 %v3667_v49  ;;  %1883 = vmatpush.bf16.msra.mxu0 %v3671_v50  ;;  %v4047_v52 = vld [vmem:[%s5691_s6 + $0x158] sm:$0xf0] }
 0x8b1   :  { %v1442_v58 = vmul.f32 %v1438_v56, %v1416_v53  ;;  %v1443_v60 = vmul.f32 %v1439_v31, %v1430_v54  ;;  %4338 = vtanh.f32 %v1452_v57  ;;  %v3652_v55 = vld [vmem:[%s5691_s6 + $0x15c] sm:$0xf0]  ;;  %v3658_v56 = vld [vmem:[%s5691_s6 + $0x158] sm:$0xf]  ;;  %v4048_v31 = vld [vmem:[%s5691_s6 + $0x160] sm:$0xf0] }
 0x8b2   :  { %4340 = vtanh.f32 %v1453_v59  ;;  %v3638_v59 = vld [vmem:[%s5691_s6 + $0x138] sm:$0xf]  ;;  %v3580_v50 = vld [vmem:[%s5691_s6 + $0xcc] sm:$0xf0] }
 0x8b3   :  { %v1446_v61 = vmul.f32 %v1442_v58, %v1416_v53  ;;  %v1447_v62 = vmul.f32 %v1443_v60, %v1430_v54  ;;  %v3659_v58 = vor.u32 %v4048_v31, %v3658_v56  ;;  %v4044_v60 = vld [vmem:[%s5691_s6 + $0x140] sm:$0xf0] }
 0x8b5   :  { %v1450_v0 = vadd.f32 %v1446_v61, %v1416_v53  ;;  %v1451_v1 = vadd.f32 %v1447_v62, %v1430_v54  ;;  %v4046_v53 = vld [vmem:[%s5691_s6 + $0x154] sm:$0xf]  ;;  %v3651_v54 = vor.u32 %v4047_v52, %v3650_v51  ;;  %1884 = vmatpush.bf16.msra.mxu0 %v3659_v58  ;;  %v4043_v61 = vld [vmem:[%s5691_s6 + $0x13c] sm:$0xf]  ;;  %v3639_v62 = vor.u32 %v4044_v60, %v3638_v59  ;;  %v3586_v51 = vld [vmem:[%s5691_s6 + $0xc8] sm:$0xf] }
 0x8b6   :  { %v3655_v57 = vor.u32 %v4046_v53, %v3652_v55  ;;  %v4030_v52 = vld [vmem:[%s5691_s6 + $0xd0] sm:$0xf0]  ;;  %v3583_v53 = vor.u32 %v4028_v47, %v3580_v50 }
 0x8b7   :  { %v1454_v2 = vmul.f32 0.7978846, %v1450_v0  ;;  %v1455_v6 = vmul.f32 0.7978846, %v1451_v1  ;;  %v4339_v7 = vpop.eup %4338  ;;  %v3640_v0 = vld [vmem:[%s5691_s6 + $0x144] sm:$0xf0] }
 0x8b8   :  { %v4341_v4 = vpop.eup %4340  ;;  %v1460_v5 = vadd.f32 1.0, %v4339_v7  ;;  %1870 = vmatpush.bf16.msrb.mxu3 %v3655_v57  ;;  %v3646_v1 = vld [vmem:[%s5691_s6 + $0x140] sm:$0xf] }
 0x8b9   :  { %4342 = vtanh.f32 %v1454_v2  ;;  %v1461_v8 = vadd.f32 1.0, %v4341_v4  ;;  %v4045_v2 = vld [vmem:[%s5691_s6 + $0x148] sm:$0xf0]  ;;  %v3626_v4 = vld [vmem:[%s5691_s6 + $0x120] sm:$0xf] }
 0x8ba   :  { %4344 = vtanh.f32 %v1455_v6  ;;  %v1464_v16 = vmul.f32 %v1460_v5, %v1432_v10  ;;  %v3643_v6 = vor.u32 %v4043_v61, %v3640_v0  ;;  %v3647_v7 = vor.u32 %v4045_v2, %v3646_v1  ;;  %v4041_v5 = vld [vmem:[%s5691_s6 + $0x128] sm:$0xf0]  ;;  %v3634_v10 = vld [vmem:[%s5691_s6 + $0x128] sm:$0xf] }
 0x8bb   :  { %v1465_v19 = vmul.f32 %v1461_v8, %v1433_v13  ;;  %v3627_v8 = vor.u32 %v4041_v5, %v3626_v4 }
 0x8bc   :  { %1871 = vmatpush.bf16.msrb.mxu3 %v3643_v6  ;;  %1885 = vmatpush.bf16.msra.mxu0 %v3647_v7 }
 0x8bf   :  { %v4343_v27 = vpop.eup %4342 }
 0x8c0   :  { %v4345_v9 = vpop.eup %4344  ;;  %v1462_v12 = vadd.f32 1.0, %v4343_v27  ;;  %v4040_v27 = vld [vmem:[%s5691_s6 + $0x124] sm:$0xf] }
 0x8c1   :  { %v1463_v15 = vadd.f32 1.0, %v4345_v9  ;;  %v3628_v9 = vld [vmem:[%s5691_s6 + $0x12c] sm:$0xf0] }
 0x8c2   :  { %v1466_v63 = vmul.f32 %v1462_v12, %v1434_v11  ;;  %v4042_v11 = vld [vmem:[%s5691_s6 + $0x130] sm:$0xf0]  ;;  %v3631_v12 = vor.u32 %v4040_v27, %v3628_v9 }
 0x8c3   :  { %v1467_v3 = vmul.f32 %v1463_v15, %v1435_v14  ;;  %v3635_v13 = vor.u32 %v4042_v11, %v3634_v10  ;;  %v3614_v14 = vld [vmem:[%s5691_s6 + $0x108] sm:$0xf]  ;;  %v4038_v15 = vld [vmem:[%s5691_s6 + $0x110] sm:$0xf0] }
 0x8c4   :  { %v1500_v20 = vpack.c.bf16 %v1466_v63, %v1464_v16  ;;  %1872 = vmatpush.bf16.msrb.mxu3 %v3631_v12  ;;  %v4037_v16 = vld [vmem:[%s5691_s6 + $0x10c] sm:$0xf]  ;;  %v3615_v63 = vor.u32 %v4038_v15, %v3614_v14 }
 0x8c5   :  { %v1501_v21 = vpack.c.bf16 %v1467_v3, %v1465_v19  ;;  %1886 = vmatpush.bf16.msra.mxu0 %v3635_v13  ;;  %v3616_v19 = vld [vmem:[%s5691_s6 + $0x114] sm:$0xf0]  ;;  %v3622_v3 = vld [vmem:[%s5691_s6 + $0x110] sm:$0xf]  ;;  %v4287_v13 = vld [vmem:[%s5696_s25] ss:$0 sm:$0xff] }
 0x8c6   :  { %1610 = vmatmul.bf16.vlgmr.msrb.gmra.mxu0 %v1500_v20  ;;  %v4039_v20 = vld [vmem:[%s5691_s6 + $0x118] sm:$0xf0] }
 0x8c7   :  { %1624 = vmatmul.bf16.vlgmr.msrb.gmra.mxu1 %v1501_v21  ;;  %v3619_v21 = vor.u32 %v4037_v16, %v3616_v19 }
 0x8c9   :  { %1873 = vmatpush.bf16.msrb.mxu3 %v3619_v21 }
 0x943   :  { %v1611_v25 = vpop.f32.mrf.mxu0 }
 0x944   :  { %v1612_v23 = vadd.f32 %v4285_v22, %v1611_v25  ;;  %v1625_v26 = vpop.f32.mrf.mxu1  ;;  %v3602_v25 = vld [vmem:[%s5691_s6 + $0xf0] sm:$0xf] }
 0x946   :  { %v1626_v28 = vadd.f32 %v1625_v26, %v1612_v23  ;;  %v4035_v23 = vld [vmem:[%s5691_s6 + $0xf8] sm:$0xf0]  ;;  %v4034_v26 = vld [vmem:[%s5691_s6 + $0xf4] sm:$0xf] }
 0x948   :  { %v1630_v29 = vadd.f32 %v1626_v28, %v5085_v17  ;;  %v3603_v28 = vor.u32 %v4035_v23, %v3602_v25 }
 0x94a   :  { %1634 = vadd.xlane.f32.xlu0 %v1630_v29 }
 0x94b   :  { %v1613_v30 = vpop.f32.mrf.mxu0 }
 0x94c   :  { %v1614_v32 = vadd.f32 %v4285_v22, %v1613_v30  ;;  %v1627_v33 = vpop.f32.mrf.mxu1  ;;  %v3623_v22 = vor.u32 %v4039_v20, %v3622_v3  ;;  %v3610_v30 = vld [vmem:[%s5691_s6 + $0xf8] sm:$0xf] }
 0x94e   :  { %v1628_v34 = vadd.f32 %v1627_v33, %v1614_v32  ;;  %1887 = vmatpush.bf16.msra.mxu0 %v3623_v22  ;;  %v4036_v32 = vld [vmem:[%s5691_s6 + $0x100] sm:$0xf0] }
 0x950   :  { %v1631_v35 = vadd.f32 %v1628_v34, %v5087_v18  ;;  %v3662_v18 = vld [vmem:[%s5691_s6 + $0x168] sm:$0xf]  ;;  %v3611_v34 = vor.u32 %v4036_v32, %v3610_v30 }
 0x951   :  { %v3663_v45 = vor.u32 %v4050_v43, %v3662_v18 }
 0x952   :  { %1636 = vadd.xlane.f32.xlu0 %v1631_v35  ;;  %1888 = vmatpush.bf16.msra.mxu0 %v3611_v34 }
 0x953   :  { %1855 = vmatpush.bf16.msrb.mxu2 %v3663_v45  ;;  %v3578_v45 = vld [vmem:[%s5691_s6 + $0xc0] sm:$0xf] }
 0x954   :  { %v3579_v49 = vor.u32 %v4029_v46, %v3578_v45 }
 0x957   :  { %1856 = vmatpush.bf16.msrb.mxu2 %v3651_v54  ;;  %v3587_v54 = vor.u32 %v4030_v52, %v3586_v51 }
 0x95b   :  { %1857 = vmatpush.bf16.msrb.mxu2 %v3639_v62 }
 0x95f   :  { %1858 = vmatpush.bf16.msrb.mxu2 %v3627_v8  ;;  %v4286_v8 = vld [vmem:[%s5695_s20] ss:$0 sm:$0xff] }
 0x963   :  { %1859 = vmatpush.bf16.msrb.mxu2 %v3615_v63 }
 0x967   :  { %1860 = vmatpush.bf16.msrb.mxu2 %v3603_v28 }
 0x9bd   :  { %v1635_v37 = vpop.xlane.xlu0 %1634 }
 0x9be   :  { %v1638_v38 = vmul.f32 %v1635_v37, %v4710_v24  ;;  %v4032_v37 = vld [vmem:[%s5691_s6 + $0xe0] sm:$0xf0] }
 0x9c0   :  { %v5148_v40 = vsub.f32 %v1630_v29, %v1638_v38  ;;  %v3604_v29 = vld [vmem:[%s5691_s6 + $0xfc] sm:$0xf0]  ;;  %v4031_v38 = vld [vmem:[%s5691_s6 + $0xdc] sm:$0xf] }
 0x9c1   :  { %v3607_v33 = vor.u32 %v4034_v26, %v3604_v29 }
 0x9c2   :  { %v1642_v41 = vmul.f32 %v5148_v40, %v5148_v40 }
 0x9c3   :  { %1874 = vmatpush.bf16.msrb.mxu3 %v3607_v33 }
 0x9c4   :  { %1644 = vadd.xlane.f32.xlu1 %v1642_v41 }
 0x9c5   :  { %v1637_v36 = vpop.xlane.xlu0 %1636 }
 0x9c6   :  { %v1639_v17 = vmul.f32 %v1637_v36, %v4710_v24  ;;  %v3592_v36 = vld [vmem:[%s5691_s6 + $0xe4] sm:$0xf0] }
 0x9c7   :  { %v3595_v43 = vor.u32 %v4031_v38, %v3592_v36 }
 0x9c8   :  { %v5153_v42 = vsub.f32 %v1631_v35, %v1639_v17  ;;  %v3590_v35 = vld [vmem:[%s5691_s6 + $0xd8] sm:$0xf]  ;;  %v3598_v17 = vld [vmem:[%s5691_s6 + $0xe0] sm:$0xf] }
 0x9c9   :  { %v3591_v41 = vor.u32 %v4032_v37, %v3590_v35  ;;  %1875 = vmatpush.bf16.msrb.mxu3 %v3595_v43 }
 0x9ca   :  { %v1643_v39 = vmul.f32 %v5153_v42, %v5153_v42 }
 0x9cb   :  { %1861 = vmatpush.bf16.msrb.mxu2 %v3591_v41 }
 0x9cc   :  { %1646 = vadd.xlane.f32.xlu0 %v1643_v39  ;;  %v4033_v39 = vld [vmem:[%s5691_s6 + $0xe8] sm:$0xf0] }
 0x9cd   :  { %v3599_v44 = vor.u32 %v4033_v39, %v3598_v17  ;;  %1876 = vmatpush.bf16.msrb.mxu3 %v3583_v53 }
 0x9cf   :  { %1889 = vmatpush.bf16.msra.mxu0 %v3599_v44  ;;  %1862 = vmatpush.bf16.msrb.mxu2 %v3579_v49 }
 0x9d3   :  { %1890 = vmatpush.bf16.msra.mxu0 %v3587_v54 }
 0xa37   :  { %v1645_v18 = vpop.xlane.xlu1 %1644 }
 0xa38   :  { %v1648_v48 = vmul.f32 %v1645_v18, %v4710_v24 }
 0xa3a   :  { %v1650_v55 = vadd.f32 1e-12, %v1648_v48 }
 0xa3c   :  { %4346 = vrsqrt.f32 %v1650_v55  ;;  %vm1658_vm0 = vweird.f32 %v1650_v55 }
 0xa3f   :  { %v1647_v56 = vpop.xlane.xlu0 %1646 }
 0xa40   :  { %v1649_v31 = vmul.f32 %v1647_v56, %v4710_v24 }
 0xa42   :  { %v4347_v57 = vpop.eup %4346  ;;  %v1651_v58 = vadd.f32 1e-12, %v1649_v31 }
 0xa43   :  { %v1653_v59 = vmul.f32 %v4347_v57, %v1650_v55  ;;  %vm1659_vm15 = vweird.f32 %v4347_v57 }
 0xa44   :  { %4348 = vrsqrt.f32 %v1651_v58  ;;  %vm1660_vm1 = vmor %vm1658_vm0, %vm1659_vm15  ;;  %vm1668_vm3 = vweird.f32 %v1651_v58 }
 0xa45   :  { %v1654_v60 = vmul.f32 %v4347_v57, %v1653_v59 }
 0xa47   :  { %v1655_v61 = vmul.f32 0.5, %v1654_v60 }
 0xa49   :  { %v1656_v62 = vsub.f32 1.5, %v1655_v61 }
 0xa4a   :  { %v4349_v0 = vpop.eup %4348 }
 0xa4b   :  { %v1657_v1 = vmul.f32 %v4347_v57, %v1656_v62  ;;  %v1663_v2 = vmul.f32 %v4349_v0, %v1651_v58  ;;  %vm1669_vm2 = vweird.f32 %v4349_v0 }
 0xa4c   :  { %vm1670_vm4 = vmor %vm1668_vm3, %vm1669_vm2 }
 0xa4d   :  { %v1664_v6 = vmul.f32 %v4349_v0, %v1663_v2  ;;  %v1661_v7 = vsel %vm1660_vm1, %v4347_v57, %v1657_v1  ;;  %vm3219_vm1 = vcmask 523264  }
 0xa4e   :  { %v1672_v27 = vmul.f32 %v1661_v7, %v5148_v40 }
 0xa4f   :  { %v1665_v4 = vmul.f32 0.5, %v1664_v6 }
 0xa50   :  { %v1677_v12 = vmul.f32 %v4286_v8, %v1672_v27 }
 0xa51   :  { %v1666_v5 = vsub.f32 1.5, %v1665_v4 }
 0xa52   :  { %v5311_v15 = vadd.f32 %v4287_v13, %v1677_v12 }
 0xa53   :  { %v1667_v9 = vmul.f32 %v4349_v0, %v1666_v5 }
 0xa55   :  { %v1671_v10 = vsel %vm1670_vm4, %v4349_v0, %v1667_v9 }
 0xa56   :  { %v1673_v11 = vmul.f32 %v1671_v10, %v5153_v42  ;;  %v5320_v42 = vld [vmem:[%s5646_s8 + $0x3] sm:$0x7] }
 0xa57   :  { %v1721_v63 = vperm.slane %v5320_v42, 0  ;;  %v1722_v19 = vperm.slane %v5320_v42, 1 }
 0xa58   :  { %v1678_v14 = vmul.f32 %v4286_v8, %v1673_v11 }
 0xa5a   :  { %v5313_v16 = vadd.f32 %v4287_v13, %v1678_v14 }
 0xa5c   :  { %v1717_v40 = vpack.c.bf16 %v5313_v16, %v5311_v15 }
 0xa5e   :  { %1863 = vmatmul.bf16.vlgmr.msrb.gmra.mxu2 %v1717_v40  ;;  %1877 = vmatmul.bf16.vlgmr.msrb.gmra.mxu3 %v1717_v40 }
 0xa5f   :  { %1891 = vmatmul.bf16.vlgmr.msra.gmra.mxu0 %v1717_v40 }
 0xae1   :  { %v1864_v3 = vpop.f32.mrf.mxu2  ;;  %v1878_v20 = vpop.f32.mrf.mxu3 }
 0xae2   :  { %v1865_v21 = vadd.f32 %v1864_v3, %v1721_v63  ;;  %v1879_v22 = vadd.f32 %v1878_v20, %v1722_v19 }
 0xae4   :  { %v4192_v25 = vpack.i.bf16 %v1879_v22, %v1865_v21 }
 0xae6   :  { %4193 = vxpose.xlu0.b32.start [1/2] (short) %v4192_v25, 128 }
 0xae9   :  { %v1866_v23 = vpop.f32.mrf.mxu2  ;;  %v1880_v26 = vpop.f32.mrf.mxu3 }
 0xaea   :  { %v1867_v28 = vadd.f32 %v1866_v23, %v1721_v63  ;;  %v1881_v29 = vadd.f32 %v1880_v26, %v1722_v19 }
 0xaec   :  { %v4194_v30 = vpack.i.bf16 %v1881_v29, %v1867_v28 }
 0xaee   :  { %4195 = vxpose.xlu0.b32.end [2/2] (short) %v4194_v30, 128 }
 0xb8a   :  { %v4196_v32 = vpop.trf.xlu0 }
 0xb8b   :  { %v4200_v38 = vunpack.i.h.bf16 %v4196_v32  ;;  %v4197_v52 = vunpack.i.l.bf16 %v4196_v32 }
 0xb8d   :  { %v2009_v43 = vpack.c.bf16 %v4200_v38, %v4200_v38  ;;  %v1993_v55 = vpack.c.bf16 %v4197_v52, %v4197_v52 }
 0xb8f   :  { %v2073_v49 = vunpack.c.l.b16 %v2009_v43  ;;  %v2045_v60 = vunpack.c.l.b16 %v1993_v55 }
 0xb92   :  { %v4201_v33 = vpop.trf.xlu0 }
 0xb93   :  { %v4205_v37 = vunpack.i.h.bf16 %v4201_v33  ;;  %v4202_v50 = vunpack.i.l.bf16 %v4201_v33 }
 0xb95   :  { %v2010_v39 = vpack.c.bf16 %v4205_v37, %v4205_v37  ;;  %v1994_v54 = vpack.c.bf16 %v4202_v50, %v4202_v50 }
 0xb97   :  { %v2074_v47 = vunpack.c.l.b16 %v2010_v39  ;;  %v2046_v59 = vunpack.c.l.b16 %v1994_v54 }
 0xb99   :  { %v2077_v51 = vpack.c.b16 %v2074_v47, %v2073_v49  ;;  %v2049_v0 = vpack.c.b16 %v2046_v59, %v2045_v60 }
 0xb9a   :  { %v4206_v34 = vpop.trf.xlu0 }
 0xb9b   :  { %v4210_v35 = vunpack.i.h.bf16 %v4206_v34  ;;  %v4207_v5 = vunpack.i.l.bf16 %v4206_v34 }
 0xb9d   :  { %v2011_v36 = vpack.c.bf16 %v4210_v35, %v4210_v35  ;;  %v1995_v40 = vpack.c.bf16 %v4207_v5, %v4207_v5 }
 0xb9f   :  { %v2075_v44 = vunpack.c.l.b16 %v2011_v36  ;;  %v2047_v28 = vunpack.c.l.b16 %v1995_v40 }
 0xba2   :  { %v4211_v41 = vpop.trf.xlu0 }
 0xba3   :  { %v4215_v17 = vunpack.i.h.bf16 %v4211_v41  ;;  %v4212_v6 = vunpack.i.l.bf16 %v4211_v41 }
 0xba5   :  { %v2012_v18 = vpack.c.bf16 %v4215_v17, %v4215_v17  ;;  %v1996_v8 = vpack.c.bf16 %v4212_v6, %v4212_v6 }
 0xba7   :  { %v2076_v45 = vunpack.c.l.b16 %v2012_v18  ;;  %v2048_v20 = vunpack.c.l.b16 %v1996_v8 }
 0xba9   :  { %v2078_v46 = vpack.c.b16 %v2076_v45, %v2075_v44  ;;  %v2050_v34 = vpack.c.b16 %v2048_v20, %v2047_v28 }
 0xbaa   :  { %v4216_v48 = vpop.trf.xlu0 }
 0xbab   :  { %2090 = vmatpush.bf16.msra.mxu1 %v2078_v46  ;;  %v4217_v53 = vunpack.i.l.bf16 %v4216_v48  ;;  %v4220_v9 = vunpack.i.h.bf16 %v4216_v48 }
 0xbad   :  { %v1997_v31 = vpack.c.bf16 %v4217_v53, %v4217_v53  ;;  %v2013_v21 = vpack.c.bf16 %v4220_v9, %v4220_v9 }
 0xbaf   :  { %2091 = vmatpush.bf16.msra.mxu1 %v2077_v51  ;;  %v2102_v61 = vunpack.c.l.b16 %v1997_v31  ;;  %v2130_v35 = vunpack.c.l.b16 %v2013_v21 }
 0xbb2   :  { %v4221_v56 = vpop.trf.xlu0 }
 0xbb3   :  { %v4222_v57 = vunpack.i.l.bf16 %v4221_v56  ;;  %v4225_v27 = vunpack.i.h.bf16 %v4221_v56 }
 0xbb5   :  { %v1998_v58 = vpack.c.bf16 %v4222_v57, %v4222_v57  ;;  %v2014_v63 = vpack.c.bf16 %v4225_v27, %v4225_v27 }
 0xbb7   :  { %v2103_v62 = vunpack.c.l.b16 %v1998_v58  ;;  %v2131_v32 = vunpack.c.l.b16 %v2014_v63 }
 0xbb9   :  { %v2106_v1 = vpack.c.b16 %v2103_v62, %v2102_v61  ;;  %v2134_v37 = vpack.c.b16 %v2131_v32, %v2130_v35 }
 0xbba   :  { %v4226_v2 = vpop.trf.xlu0 }
 0xbbb   :  { %4276 = vxpose.binary.xlu0.c.b16.start [1/4] (short) (narrow) %v2106_v1, %v2049_v0, 16  ;;  %v4230_v7 = vunpack.i.h.bf16 %v4226_v2  ;;  %v4227_v4 = vunpack.i.l.bf16 %v4226_v2 }
 0xbbd   :  { %v2015_v10 = vpack.c.bf16 %v4230_v7, %v4230_v7  ;;  %v1999_v11 = vpack.c.bf16 %v4227_v4, %v4227_v4 }
 0xbbf   :  { %v2132_v22 = vunpack.c.l.b16 %v2015_v10  ;;  %v2104_v25 = vunpack.c.l.b16 %v1999_v11 }
 0xbc2   :  { %v4231_v12 = vpop.trf.xlu0 }
 0xbc3   :  { %v4235_v13 = vunpack.i.h.bf16 %v4231_v12  ;;  %v4232_v14 = vunpack.i.l.bf16 %v4231_v12 }
 0xbc5   :  { %v2016_v19 = vpack.c.bf16 %v4235_v13, %v4235_v13  ;;  %v2000_v3 = vpack.c.bf16 %v4232_v14, %v4232_v14 }
 0xbc7   :  { %v2133_v23 = vunpack.c.l.b16 %v2016_v19  ;;  %v2105_v26 = vunpack.c.l.b16 %v2000_v3 }
 0xbc9   :  { %v2135_v29 = vpack.c.b16 %v2133_v23, %v2132_v22  ;;  %v2107_v30 = vpack.c.b16 %v2105_v26, %v2104_v25 }
 0xbca   :  { %v4236_v33 = vpop.trf.xlu0 }
 0xbcb   :  { %2147 = vmatpush.bf16.msra.mxu2 %v2135_v29  ;;  %v4237_v38 = vunpack.i.l.bf16 %v4236_v33  ;;  %v4240_v49 = vunpack.i.h.bf16 %v4236_v33 }
 0xbcc   :  { %4277 = vxpose.binary.xlu0.c.b16.end [2/4] (short) (narrow) %v2107_v30, %v2050_v34, 16 }
 0xbcd   :  { %v2001_v17 = vpack.c.bf16 %v4237_v38, %v4237_v38  ;;  %v2017_v57 = vpack.c.bf16 %v4240_v49, %v4240_v49  ;;  %v4399_v49 = vld [vmem:[%s5694_s4 + $0x8] sm:$0xff] }
 0xbcf   :  { %2148 = vmatpush.bf16.msra.mxu2 %v2134_v37  ;;  %v2159_v43 = vunpack.c.l.b16 %v2001_v17  ;;  %v2187_v6 = vunpack.c.l.b16 %v2017_v57 }
 0xbd2   :  { %v4241_v41 = vpop.trf.xlu0 }
 0xbd3   :  { %v4242_v36 = vunpack.i.l.bf16 %v4241_v41  ;;  %v4245_v48 = vunpack.i.h.bf16 %v4241_v41 }
 0xbd5   :  { %v2002_v39 = vpack.c.bf16 %v4242_v36, %v4242_v36  ;;  %v2018_v55 = vpack.c.bf16 %v4245_v48, %v4245_v48 }
 0xbd7   :  { %v2160_v18 = vunpack.c.l.b16 %v2002_v39  ;;  %v2188_v1 = vunpack.c.l.b16 %v2018_v55 }
 0xbd9   :  { %v2163_v44 = vpack.c.b16 %v2160_v18, %v2159_v43  ;;  %v2191_v7 = vpack.c.b16 %v2188_v1, %v2187_v6 }
 0xbda   :  { %v4246_v45 = vpop.trf.xlu0 }
 0xbdb   :  { %2167 = vxpose.xlu2.c.b16.start [1/2] (short) (narrow) %v2163_v44, 16  ;;  %v4250_v46 = vunpack.i.h.bf16 %v4246_v45  ;;  %v4247_v47 = vunpack.i.l.bf16 %v4246_v45  ;;  %v4398_v45 = vld [vmem:[%s5694_s4] sm:$0xff]  ;;  %s5697_s4 = sld [smem:[#allocation16_spill]] }
 0xbdd   :  { %v2019_v50 = vpack.c.bf16 %v4250_v46, %v4250_v46  ;;  %v2003_v51 = vpack.c.bf16 %v4247_v47, %v4247_v47 }
 0xbdf   :  { %v2189_v58 = vunpack.c.l.b16 %v2019_v50  ;;  %v2161_v60 = vunpack.c.l.b16 %v2003_v51 }
 0xbe2   :  { %v4251_v52 = vpop.trf.xlu0 }
 0xbe3   :  { %v4255_v53 = vunpack.i.h.bf16 %v4251_v52  ;;  %v4252_v54 = vunpack.i.l.bf16 %v4251_v52 }
 0xbe5   :  { %v2020_v56 = vpack.c.bf16 %v4255_v53, %v4255_v53  ;;  %v2004_v31 = vpack.c.bf16 %v4252_v54, %v4252_v54 }
 0xbe7   :  { %v2190_v59 = vunpack.c.l.b16 %v2020_v56  ;;  %v2162_v61 = vunpack.c.l.b16 %v2004_v31 }
 0xbe9   :  { %v2192_v62 = vpack.c.b16 %v2190_v59, %v2189_v58  ;;  %v2164_v0 = vpack.c.b16 %v2162_v61, %v2161_v60  ;;  %v5339_v60 = vpop.f32.mrf.mxu0 }
 0xbea   :  { %v4256_v2 = vpop.trf.xlu0 }
 0xbeb   :  { %2204 = vmatpush.bf16.msra.mxu3 %v2192_v62  ;;  %2168 = vxpose.xlu2.c.b16.end [2/2] (short) (narrow) %v2164_v0, 16  ;;  %v4257_v4 = vunpack.i.l.bf16 %v4256_v2  ;;  %v4260_v63 = vunpack.i.h.bf16 %v4256_v2 }
 0xbed   :  { %v2005_v5 = vpack.c.bf16 %v4257_v4, %v4257_v4  ;;  %v2021_v21 = vpack.c.bf16 %v4260_v63, %v4260_v63 }
 0xbef   :  { %2205 = vmatpush.bf16.msra.mxu3 %v2191_v7  ;;  %v2216_v10 = vunpack.c.l.b16 %v2005_v5  ;;  %v2244_v35 = vunpack.c.l.b16 %v2021_v21 }
 0xbf1   :  { %v5342_v1 = vpop.f32.mrf.mxu0 }
 0xbf2   :  { %v4261_v27 = vpop.trf.xlu0 }
 0xbf3   :  { %v4262_v8 = vunpack.i.l.bf16 %v4261_v27  ;;  %v4265_v19 = vunpack.i.h.bf16 %v4261_v27 }
 0xbf5   :  { %v2006_v9 = vpack.c.bf16 %v4262_v8, %v4262_v8  ;;  %v2022_v22 = vpack.c.bf16 %v4265_v19, %v4265_v19 }
 0xbf7   :  { %v2217_v11 = vunpack.c.l.b16 %v2006_v9  ;;  %v2245_v37 = vunpack.c.l.b16 %v2022_v22 }
 0xbf9   :  { %v2220_v12 = vpack.c.b16 %v2217_v11, %v2216_v10  ;;  %v2248_v36 = vpack.c.b16 %v2245_v37, %v2244_v35 }
 0xbfa   :  { %v4266_v13 = vpop.trf.xlu0 }
 0xbfb   :  { %2224 = vxpose.xlu2.c.b16.start [1/2] (short) (narrow) %v2220_v12, 16  ;;  %v4270_v14 = vunpack.i.h.bf16 %v4266_v13  ;;  %v4267_v40 = vunpack.i.l.bf16 %v4266_v13 }
 0xbfd   :  { %v2023_v3 = vpack.c.bf16 %v4270_v14, %v4270_v14  ;;  %v2007_v20 = vpack.c.bf16 %v4267_v40, %v4267_v40 }
 0xbff   :  { %v2246_v28 = vunpack.c.l.b16 %v2023_v3  ;;  %v2218_v32 = vunpack.c.l.b16 %v2007_v20 }
 0xc02   :  { %v4271_v25 = vpop.trf.xlu0 }
 0xc03   :  { %v4275_v23 = vunpack.i.h.bf16 %v4271_v25  ;;  %v4272_v26 = vunpack.i.l.bf16 %v4271_v25 }
 0xc05   :  { %v2024_v29 = vpack.c.bf16 %v4275_v23, %v4275_v23  ;;  %v2008_v30 = vpack.c.bf16 %v4272_v26, %v4272_v26 }
 0xc07   :  { %v2247_v33 = vunpack.c.l.b16 %v2024_v29  ;;  %v2219_v34 = vunpack.c.l.b16 %v2008_v30 }
 0xc09   :  { %v2221_v38 = vpack.c.b16 %v2219_v34, %v2218_v32  ;;  %v2249_v41 = vpack.c.b16 %v2247_v33, %v2246_v28 }
 0xc0b   :  { %2225 = vxpose.xlu2.c.b16.end [2/2] (short) (narrow) %v2221_v38, 16  ;;  %2261 = vmatpush.bf16.msrb.mxu0 %v2249_v41 }
 0xc0f   :  { %2262 = vmatpush.bf16.msrb.mxu0 %v2248_v36 }
 0xc68   :  { %v4278_v17 = vpop.trf.xlu0 }
 0xc69   :  { %3672 = vmatmul.msk.bf16.vlgmr.msra.gmra.mxu1 %vm674_vm7, %v4278_v17 }
 0xc70   :  { %v4279_v39 = vpop.trf.xlu0 }
 0xc71   :  { %3673 = vmatmul.msk.bf16.vlgmr.msra.gmra.mxu2 %vm674_vm7, %v4279_v39 }
 0xc7c   :  { %v2175_v18 = vpop.trf.xlu2 }
 0xc7d   :  { %3674 = vmatmul.msk.bf16.vlgmr.msra.gmra.mxu3 %vm674_vm7, %v2175_v18 }
 0xc9c   :  { %v2232_v43 = vpop.trf.xlu2 }
 0xc9d   :  { %3675 = vmatmul.msk.bf16.vlgmr.msrb.gmra.mxu0 %vm674_vm7, %v2232_v43 }
 0xce6   :  { %v2093_v44 = vpop.f32.mrf.mxu1 }
 0xce7   :  { %v2094_v46 = vadd.f32 %v4398_v45, %v2093_v44 }
 0xce9   :  { %v2269_v47 = vsel %vm863_vm8, %v2094_v46, -inf }
 0xcea   :  { %2270 = vmax.xlane.f32.xlu2 %v2269_v47 }
 0xcee   :  { %v2095_v48 = vpop.f32.mrf.mxu1 }
 0xcef   :  { %v2096_v50 = vadd.f32 %v4399_v49, %v2095_v48 }
 0xcf1   :  { %v2272_v51 = vsel %vm863_vm8, %v2096_v50, -inf }
 0xcf2   :  { %2273 = vmax.xlane.f32.xlu0 %v2272_v51 }
 0xcf4   :  { %v2150_v52 = vpop.f32.mrf.mxu2 }
 0xcf5   :  { %v2151_v53 = vadd.f32 %v4398_v45, %v2150_v52  ;;  %v1723_v52 = vperm.slane %v5320_v42, 2 }
 0xcf7   :  { %v2275_v54 = vsel %vm863_vm8, %v2151_v53, -inf }
 0xcf8   :  { %2276 = vmax.xlane.f32.xlu1 %v2275_v54  ;;  %v1895_v54 = vadd.f32 %v5342_v1, %v1723_v52 }
 0xcfc   :  { %v2152_v55 = vpop.f32.mrf.mxu2 }
 0xcfd   :  { %v2153_v56 = vadd.f32 %v4399_v49, %v2152_v55 }
 0xcff   :  { %v2278_v31 = vsel %vm863_vm8, %v2153_v56, -inf }
 0xd00   :  { %2279 = vmax.xlane.f32.xlu1 %v2278_v31  ;;  %v2207_v57 = vpop.f32.mrf.mxu3 }
 0xd01   :  { %v2208_v58 = vadd.f32 %v4398_v45, %v2207_v57 }
 0xd03   :  { %v2281_v59 = vsel %vm863_vm8, %v2208_v58, -inf }
 0xd08   :  { %2282 = vmax.xlane.f32.xlu1 %v2281_v59  ;;  %v2209_v61 = vpop.f32.mrf.mxu3 }
 0xd09   :  { %v2210_v62 = vadd.f32 %v4399_v49, %v2209_v61 }
 0xd0b   :  { %v2284_v0 = vsel %vm863_vm8, %v2210_v62, -inf }
 0xd10   :  { %2285 = vmax.xlane.f32.xlu1 %v2284_v0 }
 0xd1a   :  { %v2264_v2 = vpop.f32.mrf.mxu0 }
 0xd1b   :  { %v2265_v6 = vadd.f32 %v4398_v45, %v2264_v2 }
 0xd1d   :  { %v2287_v7 = vsel %vm863_vm8, %v2265_v6, -inf }
 0xd1e   :  { %2288 = vmax.xlane.f32.xlu1 %v2287_v7 }
 0xd22   :  { %v2266_v4 = vpop.f32.mrf.mxu0 }
 0xd23   :  { %v2267_v5 = vadd.f32 %v4399_v49, %v2266_v4 }
 0xd25   :  { %v2290_v27 = vsel %vm863_vm8, %v2267_v5, -inf }
 0xd26   :  { %2291 = vmax.xlane.f32.xlu1 %v2290_v27 }
 0xd5d   :  { %v2271_v8 = vpop.xlane.xlu2 %2270 }
 0xd5e   :  { %v2293_v9 = vsub.f32 %v2094_v46, %v2271_v8 }
 0xd60   :  { %v2301_v10 = vmul.f32 1.442695, %v2293_v9 }
 0xd62   :  { %4350 = vpow2.f32 %v2301_v10 }
 0xd65   :  { %v2274_v11 = vpop.xlane.xlu0 %2273 }
 0xd66   :  { %v2294_v12 = vsub.f32 %v2096_v50, %v2274_v11 }
 0xd68   :  { %v4351_v13 = vpop.eup %4350  ;;  %v2303_v14 = vmul.f32 1.442695, %v2294_v12 }
 0xd69   :  { %v2317_v40 = vsel %vm863_vm8, %v4351_v13, 0.0 }
 0xd6a   :  { %4352 = vpow2.f32 %v2303_v14  ;;  %2318 = vadd.xlane.f32.xlu1 %v2317_v40 }
 0xd6b   :  { %v2277_v63 = vpop.xlane.xlu1 %2276 }
 0xd6c   :  { %v2295_v19 = vsub.f32 %v2151_v53, %v2277_v63  ;;  %v1893_v53 = vadd.f32 %v5339_v60, %v1723_v52 }
 0xd6e   :  { %v2305_v3 = vmul.f32 1.442695, %v2295_v19 }
 0xd70   :  { %v4353_v20 = vpop.eup %4352  ;;  %4354 = vpow2.f32 %v2305_v3 }
 0xd71   :  { %v2320_v21 = vsel %vm863_vm8, %v4353_v20, 0.0 }
 0xd72   :  { %2321 = vadd.xlane.f32.xlu1 %v2320_v21 }
 0xd73   :  { %v2280_v22 = vpop.xlane.xlu1 %2279 }
 0xd74   :  { %v2296_v25 = vsub.f32 %v2153_v56, %v2280_v22 }
 0xd76   :  { %v4355_v23 = vpop.eup %4354  ;;  %v2307_v26 = vmul.f32 1.442695, %v2296_v25 }
 0xd77   :  { %v2323_v28 = vsel %vm863_vm8, %v4355_v23, 0.0 }
 0xd78   :  { %4356 = vpow2.f32 %v2307_v26 }
 0xd7a   :  { %2324 = vadd.xlane.f32.xlu1 %v2323_v28 }
 0xd7b   :  { %v2283_v29 = vpop.xlane.xlu1 %2282 }
 0xd7c   :  { %v2297_v30 = vsub.f32 %v2208_v58, %v2283_v29 }
 0xd7e   :  { %v4357_v32 = vpop.eup %4356  ;;  %v2309_v33 = vmul.f32 1.442695, %v2297_v30 }
 0xd7f   :  { %v2326_v34 = vsel %vm863_vm8, %v4357_v32, 0.0 }
 0xd80   :  { %4358 = vpow2.f32 %v2309_v33 }
 0xd82   :  { %2327 = vadd.xlane.f32.xlu1 %v2326_v34 }
 0xd83   :  { %v2286_v35 = vpop.xlane.xlu1 %2285 }
 0xd84   :  { %v2298_v37 = vsub.f32 %v2210_v62, %v2286_v35 }
 0xd86   :  { %v4359_v38 = vpop.eup %4358  ;;  %v2311_v41 = vmul.f32 1.442695, %v2298_v37 }
 0xd87   :  { %v2329_v36 = vsel %vm863_vm8, %v4359_v38, 0.0 }
 0xd88   :  { %4360 = vpow2.f32 %v2311_v41  ;;  %2330 = vadd.xlane.f32.xlu2 %v2329_v36 }
 0xd8e   :  { %v4361_v17 = vpop.eup %4360 }
 0xd8f   :  { %v2332_v39 = vsel %vm863_vm8, %v4361_v17, 0.0 }
 0xd90   :  { %2333 = vadd.xlane.f32.xlu1 %v2332_v39 }
 0xd91   :  { %v2289_v18 = vpop.xlane.xlu1 %2288 }
 0xd92   :  { %v2299_v43 = vsub.f32 %v2265_v6, %v2289_v18 }
 0xd94   :  { %v2313_v44 = vmul.f32 1.442695, %v2299_v43 }
 0xd96   :  { %4362 = vpow2.f32 %v2313_v44 }
 0xd99   :  { %v2292_v45 = vpop.xlane.xlu1 %2291 }
 0xd9a   :  { %v2300_v46 = vsub.f32 %v2267_v5, %v2292_v45 }
 0xd9c   :  { %v5352_v47 = vpop.eup %4362  ;;  %v2315_v48 = vmul.f32 1.442695, %v2300_v46 }
 0xd9d   :  { %v2335_v49 = vsel %vm863_vm8, %v5352_v47, 0.0 }
 0xd9e   :  { %4364 = vpow2.f32 %v2315_v48  ;;  %2336 = vadd.xlane.f32.xlu1 %v2335_v49 }
 0xda4   :  { %v4365_v50 = vpop.eup %4364 }
 0xda5   :  { %v2338_v51 = vsel %vm863_vm8, %v4365_v50, 0.0 }
 0xda6   :  { %2339 = vadd.xlane.f32.xlu1 %v2338_v51 }
 0xdb1   :  { %1961 = vxpose.xlu2.b32.start [1/2] (short) %v1893_v53, 128 }
 0xdb9   :  { %1962 = vxpose.xlu2.b32.end [2/2] (short) %v1895_v54, 128 }
 0xddd   :  { %v2319_v55 = vpop.xlane.xlu1 %2318 }
 0xdde   :  { %4366 = vrcp.f32 %v2319_v55 }
 0xde4   :  { %v4367_v31 = vpop.eup %4366 }
 0xde5   :  { %v2322_v56 = vpop.xlane.xlu1 %2321  ;;  %v2349_v57 = vmul.f32 %v4367_v31, %v4351_v13 }
 0xde6   :  { %4368 = vrcp.f32 %v2322_v56 }
 0xde7   :  { %v2357_v62 = vpack.c.bf16 %v2349_v57, %v2349_v57 }
 0xde9   :  { %v2377_v2 = vunpack.c.l.b16 %v2357_v62 }
 0xdec   :  { %v4369_v58 = vpop.eup %4368 }
 0xded   :  { %v2350_v59 = vmul.f32 %v4369_v58, %v4353_v20  ;;  %v2325_v61 = vpop.xlane.xlu1 %2324 }
 0xdee   :  { %4370 = vrcp.f32 %v2325_v61 }
 0xdef   :  { %v2358_v0 = vpack.c.bf16 %v2350_v59, %v2350_v59 }
 0xdf1   :  { %v2378_v42 = vunpack.c.l.b16 %v2358_v0 }
 0xdf3   :  { %v2379_v6 = vpack.c.b16 %v2378_v42, %v2377_v2 }
 0xdf4   :  { %v4371_v1 = vpop.eup %4370 }
 0xdf5   :  { %v2328_v60 = vpop.xlane.xlu1 %2327  ;;  %v2387_v7 = vsel %vm863_vm8, %v2379_v6, 0  ;;  %v2351_v4 = vmul.f32 %v4371_v1, %v4355_v23 }
 0xdf6   :  { %4372 = vrcp.f32 %v2328_v60  ;;  %2396 = vmatpush.bf16.xpose.msrb.mxu1 %v2387_v7 }
 0xdf7   :  { %v2359_v9 = vpack.c.bf16 %v2351_v4, %v2351_v4 }
 0xdf9   :  { %v2420_v11 = vunpack.c.l.b16 %v2359_v9 }
 0xdfb   :  { %v2331_v5 = vpop.xlane.xlu2 %2330 }
 0xdfc   :  { %v4373_v27 = vpop.eup %4372  ;;  %4374 = vrcp.f32 %v2331_v5 }
 0xdfd   :  { %v2352_v8 = vmul.f32 %v4373_v27, %v4357_v32 }
 0xdff   :  { %v2360_v10 = vpack.c.bf16 %v2352_v8, %v2352_v8 }
 0xe01   :  { %v2421_v12 = vunpack.c.l.b16 %v2360_v10 }
 0xe02   :  { %v4375_v40 = vpop.eup %4374 }
 0xe03   :  { %v2334_v13 = vpop.xlane.xlu1 %2333  ;;  %v2422_v14 = vpack.c.b16 %v2421_v12, %v2420_v11  ;;  %v2353_v19 = vmul.f32 %v4375_v40, %v4359_v38 }
 0xe04   :  { %4376 = vrcp.f32 %v2334_v13 }
 0xe05   :  { %v2430_v63 = vsel %vm863_vm8, %v2422_v14, 0  ;;  %v2361_v21 = vpack.c.bf16 %v2353_v19, %v2353_v19 }
 0xe06   :  { %2439 = vmatpush.bf16.xpose.msrb.mxu2 %v2430_v63 }
 0xe07   :  { %v2463_v25 = vunpack.c.l.b16 %v2361_v21 }
 0xe0a   :  { %v4377_v3 = vpop.eup %4376 }
 0xe0b   :  { %v2354_v20 = vmul.f32 %v4377_v3, %v4361_v17 }
 0xe0d   :  { %v2362_v22 = vpack.c.bf16 %v2354_v20, %v2354_v20 }
 0xe0f   :  { %v2464_v23 = vunpack.c.l.b16 %v2362_v22 }
 0xe11   :  { %v2337_v26 = vpop.xlane.xlu1 %2336  ;;  %v2465_v28 = vpack.c.b16 %v2464_v23, %v2463_v25 }
 0xe12   :  { %4378 = vrcp.f32 %v2337_v26 }
 0xe13   :  { %v2473_v29 = vsel %vm863_vm8, %v2465_v28, 0 }
 0xe14   :  { %2482 = vmatpush.bf16.xpose.msrb.mxu3 %v2473_v29 }
 0xe18   :  { %v4379_v32 = vpop.eup %4378 }
 0xe19   :  { %v2340_v30 = vpop.xlane.xlu1 %2339  ;;  %v2355_v33 = vmul.f32 %v4379_v32, %v5352_v47 }
 0xe1a   :  { %4380 = vrcp.f32 %v2340_v30 }
 0xe1b   :  { %v2363_v37 = vpack.c.bf16 %v2355_v33, %v2355_v33 }
 0xe1d   :  { %v2506_v41 = vunpack.c.l.b16 %v2363_v37 }
 0xe20   :  { %v4381_v34 = vpop.eup %4380 }
 0xe21   :  { %v2356_v35 = vmul.f32 %v4381_v34, %v4365_v50 }
 0xe23   :  { %v2364_v38 = vpack.c.bf16 %v2356_v35, %v2356_v35 }
 0xe25   :  { %v2507_v36 = vunpack.c.l.b16 %v2364_v38 }
 0xe27   :  { %v2508_v17 = vpack.c.b16 %v2507_v36, %v2506_v41 }
 0xe29   :  { %v2516_v39 = vsel %vm863_vm8, %v2508_v17, 0 }
 0xe2a   :  { %2525 = vmatpush.bf16.xpose.msra.mxu0 %v2516_v39 }
 0xe4a   :  { %v1977_v18 = vpop.trf.xlu2 }
 0xe4b   :  { %v2025_v43 = vpack.c.bf16 %v1977_v18, %v1977_v18 }
 0xe4d   :  { %v2369_v46 = vunpack.c.l.b16 %v2025_v43 }
 0xe52   :  { %v1978_v44 = vpop.trf.xlu2 }
 0xe53   :  { %v2026_v45 = vpack.c.bf16 %v1978_v44, %v1978_v44 }
 0xe55   :  { %v2370_v48 = vunpack.c.l.b16 %v2026_v45 }
 0xe57   :  { %v2373_v49 = vpack.c.b16 %v2370_v48, %v2369_v46 }
 0xe59   :  { %3676 = vmatmul.msk.bf16.vlgmr.msrb.gmra.mxu1 %vm863_vm8, %v2373_v49 }
 0xe5a   :  { %v1979_v47 = vpop.trf.xlu2 }
 0xe5b   :  { %v2027_v51 = vpack.c.bf16 %v1979_v47, %v1979_v47  ;;  %v4059_v47 = vld [vmem:[%s5647_s9 + $0x78] sm:$0xff] }
 0xe5c   :  { %2640 = vmatpush.bf16.msra.mxu1 %v4059_v47 }
 0xe5d   :  { %v2371_v53 = vunpack.c.l.b16 %v2027_v51 }
 0xe62   :  { %v1980_v50 = vpop.trf.xlu2 }
 0xe63   :  { %v2028_v52 = vpack.c.bf16 %v1980_v50, %v1980_v50  ;;  %v4058_v50 = vld [vmem:[%s5647_s9 + $0x70] sm:$0xff] }
 0xe64   :  { %2641 = vmatpush.bf16.msra.mxu1 %v4058_v50 }
 0xe65   :  { %v2372_v54 = vunpack.c.l.b16 %v2028_v52  ;;  %v4057_v52 = vld [vmem:[%s5647_s9 + $0x68] sm:$0xff] }
 0xe67   :  { %v2374_v55 = vpack.c.b16 %v2372_v54, %v2371_v53  ;;  %v4056_v53 = vld [vmem:[%s5647_s9 + $0x60] sm:$0xff] }
 0xe68   :  { %2642 = vmatpush.bf16.msra.mxu1 %v4057_v52  ;;  %v3762_v52 = vld [vmem:[%s5651_s13 + $0x90] sm:$0xf] }
 0xe69   :  { %3677 = vmatmul.msk.bf16.gmra.mxu1 %vm863_vm8, %v2374_v55  ;;  %v4055_v55 = vld [vmem:[%s5647_s9 + $0x58] sm:$0xff] }
 0xe6a   :  { %v1981_v56 = vpop.trf.xlu2 }
 0xe6b   :  { %v2029_v31 = vpack.c.bf16 %v1981_v56, %v1981_v56  ;;  %v4054_v56 = vld [vmem:[%s5647_s9 + $0x50] sm:$0xff] }
 0xe6c   :  { %2643 = vmatpush.bf16.msra.mxu1 %v4056_v53  ;;  %v4063_v53 = vld [vmem:[%s5651_s13 + $0x94] sm:$0xf0] }
 0xe6d   :  { %v2412_v59 = vunpack.c.l.b16 %v2029_v31 }
 0xe70   :  { %2644 = vmatpush.bf16.msra.mxu1 %v4055_v55  ;;  %v3763_v55 = vor.u32 %v4063_v53, %v3762_v52 }
 0xe72   :  { %v1982_v57 = vpop.trf.xlu2 }
 0xe73   :  { %v2030_v58 = vpack.c.bf16 %v1982_v57, %v1982_v57 }
 0xe74   :  { %2645 = vmatpush.bf16.msra.mxu1 %v4054_v56  ;;  %v3764_v56 = vld [vmem:[%s5651_s13 + $0x98] sm:$0xf0] }
 0xe75   :  { %v2413_v61 = vunpack.c.l.b16 %v2030_v58  ;;  %v4053_v58 = vld [vmem:[%s5647_s9 + $0x48] sm:$0xff] }
 0xe77   :  { %v2416_v62 = vpack.c.b16 %v2413_v61, %v2412_v59  ;;  %v4052_v59 = vld [vmem:[%s5647_s9 + $0x40] sm:$0xff] }
 0xe78   :  { %2646 = vmatpush.bf16.msra.mxu1 %v4053_v58  ;;  %v4061_v58 = vld [vmem:[%s5651_s13 + $0x84] sm:$0xf0] }
 0xe79   :  { %3678 = vmatmul.msk.bf16.vlgmr.msrb.gmra.mxu2 %vm863_vm8, %v2416_v62 }
 0xe7a   :  { %v1983_v0 = vpop.trf.xlu2 }
 0xe7b   :  { %v2031_v2 = vpack.c.bf16 %v1983_v0, %v1983_v0 }
 0xe7c   :  { %2647 = vmatpush.bf16.msra.mxu1 %v4052_v59  ;;  %v4060_v59 = vld [vmem:[%s5651_s13 + $0x84] sm:$0xf] }
 0xe7d   :  { %v2414_v60 = vunpack.c.l.b16 %v2031_v2  ;;  %v4288_v2 = vld [vmem:[%s5648_s10 + $0x1] ss:$0 sm:$0xff] }
 0xe82   :  { %v1984_v42 = vpop.trf.xlu2 }
 0xe83   :  { %v2032_v6 = vpack.c.bf16 %v1984_v42, %v1984_v42 }
 0xe85   :  { %v2415_v7 = vunpack.c.l.b16 %v2032_v6 }
 0xe87   :  { %v2417_v1 = vpack.c.b16 %v2415_v7, %v2414_v60 }
 0xe89   :  { %3679 = vmatmul.msk.bf16.gmra.mxu2 %vm863_vm8, %v2417_v1 }
 0xe8a   :  { %v1985_v4 = vpop.trf.xlu2 }
 0xe8b   :  { %v2033_v5 = vpack.c.bf16 %v1985_v4, %v1985_v4 }
 0xe8d   :  { %v2455_v9 = vunpack.c.l.b16 %v2033_v5 }
 0xe92   :  { %v1986_v27 = vpop.trf.xlu2 }
 0xe93   :  { %v2034_v8 = vpack.c.bf16 %v1986_v27, %v1986_v27 }
 0xe95   :  { %v2456_v10 = vunpack.c.l.b16 %v2034_v8 }
 0xe97   :  { %v2459_v11 = vpack.c.b16 %v2456_v10, %v2455_v9 }
 0xe99   :  { %3680 = vmatmul.msk.bf16.vlgmr.msrb.gmra.mxu3 %vm863_vm8, %v2459_v11 }
 0xe9a   :  { %v1987_v12 = vpop.trf.xlu2 }
 0xe9b   :  { %v2035_v13 = vpack.c.bf16 %v1987_v12, %v1987_v12 }
 0xe9d   :  { %v2457_v63 = vunpack.c.l.b16 %v2035_v13  ;;  %v4075_v13 = vld [vmem:[%s5651_s13 + $0xf4] sm:$0xf0] }
 0xea2   :  { %v1988_v14 = vpop.trf.xlu2 }
 0xea3   :  { %v2036_v40 = vpack.c.bf16 %v1988_v14, %v1988_v14  ;;  %v4074_v14 = vld [vmem:[%s5651_s13 + $0xf4] sm:$0xf] }
 0xea5   :  { %v2458_v19 = vunpack.c.l.b16 %v2036_v40 }
 0xea7   :  { %v2460_v3 = vpack.c.b16 %v2458_v19, %v2457_v63  ;;  %v3812_v63 = vld [vmem:[%s5651_s13 + $0xf8] sm:$0xf0] }
 0xea8   :  { %v3815_v19 = vor.u32 %v4074_v14, %v3812_v63 }
 0xea9   :  { %3681 = vmatmul.msk.bf16.gmra.mxu3 %vm863_vm8, %v2460_v3  ;;  %v3802_v3 = vld [vmem:[%s5651_s13 + $0xe0] sm:$0xf] }
 0xeaa   :  { %v1989_v20 = vpop.trf.xlu2  ;;  %2829 = vmatpush.bf16.msra.mxu3 %v3815_v19 }
 0xeab   :  { %v2037_v21 = vpack.c.bf16 %v1989_v20, %v1989_v20  ;;  %v4073_v20 = vld [vmem:[%s5651_s13 + $0xe4] sm:$0xf0] }
 0xead   :  { %v2498_v23 = vunpack.c.l.b16 %v2037_v21  ;;  %v4072_v21 = vld [vmem:[%s5651_s13 + $0xe4] sm:$0xf] }
 0xeb2   :  { %v1990_v22 = vpop.trf.xlu2 }
 0xeb3   :  { %v2038_v25 = vpack.c.bf16 %v1990_v22, %v1990_v22  ;;  %v3803_v22 = vor.u32 %v4073_v20, %v3802_v3  ;;  %v4289_v3 = vld [vmem:[%s5649_s11 + $0x1] ss:$0 sm:$0xff]  ;;  %s5698_s11 = sld [smem:[#allocation18_spill]] }
 0xeb5   :  { %v2499_v26 = vunpack.c.l.b16 %v2038_v25  ;;  %v3804_v25 = vld [vmem:[%s5651_s13 + $0xe8] sm:$0xf0] }
 0xeb7   :  { %v2502_v28 = vpack.c.b16 %v2499_v26, %v2498_v23  ;;  %v3807_v23 = vor.u32 %v4072_v21, %v3804_v25  ;;  %v3794_v26 = vld [vmem:[%s5651_s13 + $0xd0] sm:$0xf] }
 0xeb9   :  { %3682 = vmatmul.msk.bf16.vlgmr.msra.gmra.mxu0 %vm863_vm8, %v2502_v28  ;;  %2830 = vmatpush.bf16.msra.mxu3 %v3807_v23  ;;  %v4071_v28 = vld [vmem:[%s5651_s13 + $0xd4] sm:$0xf0]  ;;  %v4290_v23 = vld [vmem:[%s5650_s12 + $0x1] ss:$0 sm:$0xff] }
 0xeba   :  { %v1991_v29 = vpop.trf.xlu2 }
 0xebb   :  { %v2039_v30 = vpack.c.bf16 %v1991_v29, %v1991_v29  ;;  %v4070_v29 = vld [vmem:[%s5651_s13 + $0xd4] sm:$0xf] }
 0xebd   :  { %v2500_v34 = vunpack.c.l.b16 %v2039_v30  ;;  %v3795_v30 = vor.u32 %v4071_v28, %v3794_v26 }
 0xec2   :  { %v1992_v32 = vpop.trf.xlu2 }
 0xec3   :  { %v2040_v33 = vpack.c.bf16 %v1992_v32, %v1992_v32  ;;  %v3796_v32 = vld [vmem:[%s5651_s13 + $0xd8] sm:$0xf0] }
 0xec5   :  { %v2501_v35 = vunpack.c.l.b16 %v2040_v33  ;;  %v3799_v33 = vor.u32 %v4070_v29, %v3796_v32  ;;  %v4082_v32 = vld [vmem:[%s5653_s15 + $0xb0] sm:$0xff] }
 0xec7   :  { %v2503_v37 = vpack.c.b16 %v2501_v35, %v2500_v34  ;;  %2831 = vmatpush.bf16.msra.mxu3 %v3799_v33  ;;  %v3786_v34 = vld [vmem:[%s5651_s13 + $0xc0] sm:$0xf]  ;;  %v4069_v35 = vld [vmem:[%s5651_s13 + $0xc4] sm:$0xf0]  ;;  %v4090_v33 = vld [vmem:[%s5653_s15 + $0xf0] sm:$0xff] }
 0xec9   :  { %3683 = vmatmul.msk.bf16.gmra.mxu0 %vm863_vm8, %v2503_v37  ;;  %v4068_v37 = vld [vmem:[%s5651_s13 + $0xc4] sm:$0xf] }
 0xed6   :  { %v2398_v38 = vpop.f32.mrf.mxu1 }
 0xed7   :  { %2537 = vxpose.xlu0.b32.start [1/16] (narrow) %v2398_v38, 16  ;;  %v3787_v38 = vor.u32 %v4069_v35, %v3786_v34  ;;  %v4081_v34 = vld [vmem:[%s5653_s15 + $0xa8] sm:$0xff] }
 0xed8   :  { %v4089_v35 = vld [vmem:[%s5653_s15 + $0xe8] sm:$0xff] }
 0xede   :  { %v2400_v41 = vpop.f32.mrf.mxu1 }
 0xedf   :  { %2538 = vxpose.xlu0.b32.cont [2/16] (narrow) %v2400_v41, 16  ;;  %v3788_v41 = vld [vmem:[%s5651_s13 + $0xc8] sm:$0xf0] }
 0xee6   :  { %v2403_v36 = vpop.f32.mrf.mxu1 }
 0xee7   :  { %2539 = vxpose.xlu0.b32.cont [3/16] (narrow) %v2403_v36, 16  ;;  %v3791_v36 = vor.u32 %v4068_v37, %v3788_v41  ;;  %v4080_v37 = vld [vmem:[%s5653_s15 + $0xa0] sm:$0xff]  ;;  %v4079_v41 = vld [vmem:[%s5653_s15 + $0x98] sm:$0xff] }
 0xee9   :  { %2832 = vmatpush.bf16.msra.mxu3 %v3791_v36  ;;  %v4087_v36 = vld [vmem:[%s5653_s15 + $0xd8] sm:$0xff] }
 0xeee   :  { %v2405_v17 = vpop.f32.mrf.mxu1 }
 0xeef   :  { %2540 = vxpose.xlu0.b32.cont [4/16] (narrow) %v2405_v17, 16  ;;  %v3778_v17 = vld [vmem:[%s5651_s13 + $0xb0] sm:$0xf] }
 0xefc   :  { %v2441_v39 = vpop.f32.mrf.mxu2 }
 0xefd   :  { %2541 = vxpose.xlu0.b32.cont [5/16] (narrow) %v2441_v39, 16  ;;  %v4067_v39 = vld [vmem:[%s5651_s13 + $0xb4] sm:$0xf0] }
 0xf04   :  { %v2443_v18 = vpop.f32.mrf.mxu2 }
 0xf05   :  { %2542 = vxpose.xlu0.b32.cont [6/16] (narrow) %v2443_v18, 16  ;;  %v4066_v18 = vld [vmem:[%s5651_s13 + $0xb4] sm:$0xf] }
 0xf0c   :  { %v2446_v43 = vpop.f32.mrf.mxu2 }
 0xf0d   :  { %2543 = vxpose.xlu0.b32.cont [7/16] (narrow) %v2446_v43, 16  ;;  %v3779_v43 = vor.u32 %v4067_v39, %v3778_v17  ;;  %v4078_v17 = vld [vmem:[%s5653_s15 + $0x90] sm:$0xff] }
 0xf0e   :  { %v4086_v39 = vld [vmem:[%s5653_s15 + $0xd0] sm:$0xff] }
 0xf14   :  { %v2448_v44 = vpop.f32.mrf.mxu2 }
 0xf15   :  { %2544 = vxpose.xlu0.b32.cont [8/16] (narrow) %v2448_v44, 16  ;;  %v3780_v44 = vld [vmem:[%s5651_s13 + $0xb8] sm:$0xf0] }
 0xf1c   :  { %v2484_v45 = vpop.f32.mrf.mxu3 }
 0xf1d   :  { %2545 = vxpose.xlu0.b32.cont [9/16] (narrow) %v2484_v45, 16  ;;  %v3783_v45 = vor.u32 %v4066_v18, %v3780_v44  ;;  %v4077_v18 = vld [vmem:[%s5653_s15 + $0x88] sm:$0xff]  ;;  %v3751_v44 = vld [vmem:[%s5652_s14 + $0x2] sm:$0x3] }
 0xf1f   :  { %2833 = vmatpush.bf16.msra.mxu3 %v3783_v45  ;;  %v4076_v45 = vld [vmem:[%s5653_s15 + $0x80] sm:$0xff] }
 0xf24   :  { %v2486_v46 = vpop.f32.mrf.mxu3 }
 0xf25   :  { %2546 = vxpose.xlu0.b32.cont [10/16] (narrow) %v2486_v46, 16  ;;  %v3770_v46 = vld [vmem:[%s5651_s13 + $0xa0] sm:$0xf] }
 0xf2c   :  { %v2489_v48 = vpop.f32.mrf.mxu3 }
 0xf2d   :  { %2547 = vxpose.xlu0.b32.cont [11/16] (narrow) %v2489_v48, 16  ;;  %v4065_v48 = vld [vmem:[%s5651_s13 + $0xa4] sm:$0xf0] }
 0xf2e   :  { %v3771_v47 = vor.u32 %v4065_v48, %v3770_v46  ;;  %v4084_v46 = vld [vmem:[%s5653_s15 + $0xc0] sm:$0xff]  ;;  %v2731_v48 = vperm.slane %v3751_v44, 0 }
 0xf34   :  { %v2491_v49 = vpop.f32.mrf.mxu3 }
 0xf35   :  { %2548 = vxpose.xlu0.b32.cont [12/16] (narrow) %v2491_v49, 16  ;;  %v4064_v49 = vld [vmem:[%s5651_s13 + $0xa4] sm:$0xf] }
 0xf36   :  { %v2527_v51 = vpop.f32.mrf.mxu0 }
 0xf3d   :  { %2549 = vxpose.xlu0.b32.cont [13/16] (narrow) %v2527_v51, 16  ;;  %v3772_v51 = vld [vmem:[%s5651_s13 + $0xa8] sm:$0xf0] }
 0xf3e   :  { %v2529_v54 = vpop.f32.mrf.mxu0  ;;  %v3775_v50 = vor.u32 %v4064_v49, %v3772_v51  ;;  %v2732_v49 = vperm.slane %v3751_v44, 1 }
 0xf40   :  { %2834 = vmatpush.bf16.msra.mxu3 %v3775_v50 }
 0xf45   :  { %2550 = vxpose.xlu0.b32.cont [14/16] (narrow) %v2529_v54, 16  ;;  %v4062_v54 = vld [vmem:[%s5651_s13 + $0x94] sm:$0xf] }
 0xf46   :  { %v2532_v31 = vpop.f32.mrf.mxu0 }
 0xf4d   :  { %2551 = vxpose.xlu0.b32.cont [15/16] (narrow) %v2532_v31, 16  ;;  %v3767_v31 = vor.u32 %v4062_v54, %v3764_v56 }
 0xf4e   :  { %v2534_v57 = vpop.f32.mrf.mxu0 }
 0xf4f   :  { %2835 = vmatpush.bf16.msra.mxu3 %v3767_v31 }
 0xf55   :  { %2552 = vxpose.xlu0.b32.end [16/16] (narrow) %v2534_v57, 16  ;;  %v3754_v57 = vld [vmem:[%s5651_s13 + $0x80] sm:$0xf] }
 0xf81   :  { %v2553_v61 = vpop.trf.xlu0 }
 0xf89   :  { %v2554_v62 = vpop.trf.xlu0 }
 0xf8a   :  { %v2586_v0 = vpack.c.bf16 %v2554_v62, %v2553_v61  ;;  %v3755_v62 = vor.u32 %v4061_v58, %v3754_v57 }
 0xf8c   :  { %2648 = vmatmul.bf16.vlgmr.msra.gmra.mxu1 %v2586_v0  ;;  %v3756_v0 = vld [vmem:[%s5651_s13 + $0x88] sm:$0xf0] }
0x1009   :  { %v2649_v42 = vpop.f32.mrf.mxu1 }
0x100a   :  { %v2650_v6 = vadd.f32 %v4288_v2, %v2649_v42  ;;  %v3759_v42 = vor.u32 %v4060_v59, %v3756_v0 }
0x100c   :  { %v2654_v60 = vadd.f32 %v2650_v6, %v5311_v15  ;;  %2836 = vmatpush.bf16.msra.mxu3 %v3759_v42 }
0x100e   :  { %2660 = vadd.xlane.f32.xlu1 %v2654_v60 }
0x1011   :  { %v2651_v7 = vpop.f32.mrf.mxu1 }
0x1012   :  { %v2652_v1 = vadd.f32 %v4288_v2, %v2651_v7 }
0x1014   :  { %v2655_v4 = vadd.f32 %v2652_v1, %v5313_v16  ;;  %v3810_v16 = vld [vmem:[%s5651_s13 + $0xf0] sm:$0xf] }
0x1015   :  { %v3811_v40 = vor.u32 %v4075_v13, %v3810_v16 }
0x1016   :  { %2662 = vadd.xlane.f32.xlu1 %v2655_v4 }
0x1017   :  { %2815 = vmatpush.bf16.msra.mxu2 %v3811_v40 }
0x101b   :  { %2816 = vmatpush.bf16.msra.mxu2 %v3803_v22 }
0x101f   :  { %2817 = vmatpush.bf16.msra.mxu2 %v3795_v30  ;;  %v4083_v30 = vld [vmem:[%s5653_s15 + $0xb8] sm:$0xff] }
0x1020   :  { %3015 = vmatpush.bf16.msrb.mxu0 %v4083_v30 }
0x1023   :  { %2818 = vmatpush.bf16.msra.mxu2 %v3787_v38  ;;  %v4088_v38 = vld [vmem:[%s5653_s15 + $0xe0] sm:$0xff] }
0x1024   :  { %3016 = vmatpush.bf16.msrb.mxu0 %v4082_v32 }
0x1027   :  { %2819 = vmatpush.bf16.msra.mxu2 %v3779_v43  ;;  %v4085_v43 = vld [vmem:[%s5653_s15 + $0xc8] sm:$0xff] }
0x1028   :  { %3017 = vmatpush.bf16.msrb.mxu0 %v4081_v34  ;;  %v4291_v34 = vld [vmem:[%s5654_s16 + $0x1] ss:$0 sm:$0xff] }
0x102b   :  { %2820 = vmatpush.bf16.msra.mxu2 %v3771_v47 }
0x102c   :  { %3018 = vmatpush.bf16.msrb.mxu0 %v4080_v37 }
0x102f   :  { %2821 = vmatpush.bf16.msra.mxu2 %v3763_v55 }
0x1030   :  { %3019 = vmatpush.bf16.msrb.mxu0 %v4079_v41 }
0x1033   :  { %2822 = vmatpush.bf16.msra.mxu2 %v3755_v62 }
0x1034   :  { %3020 = vmatpush.bf16.msrb.mxu0 %v4078_v17 }
0x1038   :  { %3021 = vmatpush.bf16.msrb.mxu0 %v4077_v18 }
0x103c   :  { %3022 = vmatpush.bf16.msrb.mxu0 %v4076_v45 }
0x1081   :  { %v2661_v5 = vpop.xlane.xlu1 %2660 }
0x1082   :  { %v2664_v27 = vmul.f32 %v2661_v5, %v4710_v24 }
0x1084   :  { %v5403_v8 = vsub.f32 %v2654_v60, %v2664_v27 }
0x1086   :  { %v2668_v9 = vmul.f32 %v5403_v8, %v5403_v8 }
0x1088   :  { %2670 = vadd.xlane.f32.xlu1 %v2668_v9 }
0x1089   :  { %v2663_v10 = vpop.xlane.xlu1 %2662 }
0x108a   :  { %v2665_v11 = vmul.f32 %v2663_v10, %v4710_v24 }
0x108c   :  { %v5408_v12 = vsub.f32 %v2655_v4, %v2665_v11 }
0x108e   :  { %v2669_v15 = vmul.f32 %v5408_v12, %v5408_v12 }
0x1090   :  { %2672 = vadd.xlane.f32.xlu1 %v2669_v15 }
0x10fb   :  { %v2671_v61 = vpop.xlane.xlu1 %2670 }
0x10fc   :  { %v2674_v2 = vmul.f32 %v2671_v61, %v4710_v24 }
0x10fe   :  { %v2676_v6 = vadd.f32 1e-12, %v2674_v2 }
0x1100   :  { %4382 = vrsqrt.f32 %v2676_v6  ;;  %vm2684_vm6 = vweird.f32 %v2676_v6 }
0x1103   :  { %v2673_v60 = vpop.xlane.xlu1 %2672 }
0x1104   :  { %v2675_v7 = vmul.f32 %v2673_v60, %v4710_v24 }
0x1106   :  { %v4383_v1 = vpop.eup %4382  ;;  %v2677_v4 = vadd.f32 1e-12, %v2675_v7 }
0x1107   :  { %v2679_v5 = vmul.f32 %v4383_v1, %v2676_v6  ;;  %vm2685_vm5 = vweird.f32 %v4383_v1 }
0x1108   :  { %4384 = vrsqrt.f32 %v2677_v4  ;;  %vm2686_vm7 = vmor %vm2684_vm6, %vm2685_vm5  ;;  %vm2694_vm9 = vweird.f32 %v2677_v4 }
0x1109   :  { %v2680_v27 = vmul.f32 %v4383_v1, %v2679_v5 }
0x110b   :  { %v2681_v9 = vmul.f32 0.5, %v2680_v27 }
0x110d   :  { %v2682_v10 = vsub.f32 1.5, %v2681_v9 }
0x110e   :  { %v4385_v11 = vpop.eup %4384 }
0x110f   :  { %v2683_v15 = vmul.f32 %v4383_v1, %v2682_v10  ;;  %v2689_v16 = vmul.f32 %v4385_v11, %v2677_v4  ;;  %vm2695_vm8 = vweird.f32 %v4385_v11 }
0x1110   :  { %vm2696_vm10 = vmor %vm2694_vm9, %vm2695_vm8 }
0x1111   :  { %v2690_v13 = vmul.f32 %v4385_v11, %v2689_v16  ;;  %v2687_v14 = vsel %vm2686_vm7, %v4383_v1, %v2683_v15 }
0x1112   :  { %v2698_v19 = vmul.f32 %v2687_v14, %v5403_v8 }
0x1113   :  { %v2691_v40 = vmul.f32 0.5, %v2690_v13 }
0x1114   :  { %v2703_v25 = vmul.f32 %v4289_v3, %v2698_v19 }
0x1115   :  { %v2692_v63 = vsub.f32 1.5, %v2691_v40 }
0x1116   :  { %v5518_v28 = vadd.f32 %v4290_v23, %v2703_v25 }
0x1117   :  { %v2693_v20 = vmul.f32 %v4385_v11, %v2692_v63 }
0x1119   :  { %v2697_v21 = vsel %vm2696_vm10, %v4385_v11, %v2693_v20 }
0x111a   :  { %v2699_v22 = vmul.f32 %v2697_v21, %v5408_v12  ;;  %v4091_v12 = vld [vmem:[%s5653_s15 + $0xf8] sm:$0xff] }
0x111b   :  { %3029 = vmatpush.bf16.msrb.mxu1 %v4091_v12 }
0x111c   :  { %v2704_v26 = vmul.f32 %v4289_v3, %v2699_v22 }
0x111e   :  { %v5520_v29 = vadd.f32 %v4290_v23, %v2704_v26 }
0x111f   :  { %3030 = vmatpush.bf16.msrb.mxu1 %v4090_v33 }
0x1120   :  { %v2727_v8 = vpack.c.bf16 %v5520_v29, %v5518_v28 }
0x1122   :  { %2823 = vmatmul.bf16.vlgmr.msra.gmra.mxu2 %v2727_v8  ;;  %2837 = vmatmul.bf16.vlgmr.msra.gmra.mxu3 %v2727_v8 }
0x1123   :  { %3031 = vmatpush.bf16.msrb.mxu1 %v4089_v35 }
0x1127   :  { %3032 = vmatpush.bf16.msrb.mxu1 %v4088_v38 }
0x112b   :  { %3033 = vmatpush.bf16.msrb.mxu1 %v4087_v36 }
0x112f   :  { %3034 = vmatpush.bf16.msrb.mxu1 %v4086_v39 }
0x1133   :  { %3035 = vmatpush.bf16.msrb.mxu1 %v4085_v43 }
0x1137   :  { %3036 = vmatpush.bf16.msrb.mxu1 %v4084_v46 }
0x11a5   :  { %v2824_v47 = vpop.f32.mrf.mxu2  ;;  %v2838_v51 = vpop.f32.mrf.mxu3 }
0x11a6   :  { %v2825_v50 = vadd.f32 %v2824_v47, %v2731_v48  ;;  %v2839_v52 = vadd.f32 %v2838_v51, %v2732_v49 }
0x11a8   :  { %v2847_v53 = vmul.f32 0.044715, %v2825_v50  ;;  %v2848_v54 = vmul.f32 0.044715, %v2839_v52  ;;  %v2843_v3 = vmul.f32 0.5, %v2825_v50  ;;  %v2844_v22 = vmul.f32 0.5, %v2839_v52 }
0x11aa   :  { %v2851_v55 = vmul.f32 %v2847_v53, %v2825_v50  ;;  %v2852_v56 = vmul.f32 %v2848_v54, %v2839_v52  ;;  %v4097_v53 = vld [vmem:[%s5697_s4 + $0x28] sm:$0xff]  ;;  %v4096_v54 = vld [vmem:[%s5697_s4 + $0x20] sm:$0xff] }
0x11ac   :  { %v2855_v31 = vmul.f32 %v2851_v55, %v2825_v50  ;;  %v2856_v57 = vmul.f32 %v2852_v56, %v2839_v52  ;;  %v4095_v55 = vld [vmem:[%s5697_s4 + $0x18] sm:$0xff]  ;;  %v4094_v56 = vld [vmem:[%s5697_s4 + $0x10] sm:$0xff] }
0x11ad   :  { %v2826_v58 = vpop.f32.mrf.mxu2  ;;  %v2840_v59 = vpop.f32.mrf.mxu3 }
0x11ae   :  { %v2859_v61 = vadd.f32 %v2855_v31, %v2825_v50  ;;  %v2827_v62 = vadd.f32 %v2826_v58, %v2731_v48  ;;  %v2841_v0 = vadd.f32 %v2840_v59, %v2732_v49  ;;  %v2860_v2 = vadd.f32 %v2856_v57, %v2839_v52  ;;  %v4093_v31 = vld [vmem:[%s5697_s4 + $0x8] sm:$0xff]  ;;  %v4092_v59 = vld [vmem:[%s5697_s4] sm:$0xff] }
0x11b0   :  { %v2849_v42 = vmul.f32 0.044715, %v2827_v62  ;;  %v2850_v6 = vmul.f32 0.044715, %v2841_v0  ;;  %v2863_v60 = vmul.f32 0.7978846, %v2859_v61 }
0x11b1   :  { %v2864_v1 = vmul.f32 0.7978846, %v2860_v2  ;;  %v2845_v20 = vmul.f32 0.5, %v2827_v62  ;;  %v2846_v25 = vmul.f32 0.5, %v2841_v0 }
0x11b2   :  { %v2853_v7 = vmul.f32 %v2849_v42, %v2827_v62  ;;  %v2854_v4 = vmul.f32 %v2850_v6, %v2841_v0  ;;  %4386 = vtanh.f32 %v2863_v60 }
0x11b3   :  { %4388 = vtanh.f32 %v2864_v1 }
0x11b4   :  { %v2857_v5 = vmul.f32 %v2853_v7, %v2827_v62  ;;  %v2858_v27 = vmul.f32 %v2854_v4, %v2841_v0 }
0x11b6   :  { %v2861_v9 = vadd.f32 %v2857_v5, %v2827_v62  ;;  %v2862_v10 = vadd.f32 %v2858_v27, %v2841_v0  ;;  %v4103_v62 = vld [vmem:[%s5698_s11 + $0x18] sm:$0xff] }
0x11b7   :  { %3227 = vmatpush.bf16.msrb.mxu3 %v4103_v62 }
0x11b8   :  { %v2865_v11 = vmul.f32 0.7978846, %v2861_v9  ;;  %v2866_v15 = vmul.f32 0.7978846, %v2862_v10  ;;  %v4387_v16 = vpop.eup %4386 }
0x11b9   :  { %v4389_v13 = vpop.eup %4388  ;;  %v2871_v14 = vadd.f32 1.0, %v4387_v16 }
0x11ba   :  { %4390 = vtanh.f32 %v2865_v11  ;;  %v2872_v63 = vadd.f32 1.0, %v4389_v13  ;;  %v4292_v13 = vld [vmem:[%s5695_s20 + $0x1] ss:$0 sm:$0xff] }
0x11bb   :  { %4392 = vtanh.f32 %v2866_v15  ;;  %v2875_v26 = vmul.f32 %v2871_v14, %v2843_v3  ;;  %v4293_v3 = vld [vmem:[%s5696_s25 + $0x1] ss:$0 sm:$0xff] }
0x11bc   :  { %v2876_v30 = vmul.f32 %v2872_v63, %v2844_v22 }
0x11c0   :  { %v4391_v40 = vpop.eup %4390 }
0x11c1   :  { %v4393_v19 = vpop.eup %4392  ;;  %v2873_v21 = vadd.f32 1.0, %v4391_v40 }
0x11c2   :  { %v2874_v23 = vadd.f32 1.0, %v4393_v19 }
0x11c3   :  { %v2877_v8 = vmul.f32 %v2873_v21, %v2845_v20 }
0x11c4   :  { %v2878_v12 = vmul.f32 %v2874_v23, %v2846_v25  ;;  %v4102_v23 = vld [vmem:[%s5698_s11 + $0x10] sm:$0xff] }
0x11c5   :  { %v2912_v32 = vpack.c.bf16 %v2877_v8, %v2875_v26  ;;  %3228 = vmatpush.bf16.msrb.mxu3 %v4102_v23  ;;  %v4101_v26 = vld [vmem:[%s5698_s11 + $0x8] sm:$0xff]  ;;  %v4100_v8 = vld [vmem:[%s5698_s11] sm:$0xff] }
0x11c6   :  { %v2913_v33 = vpack.c.bf16 %v2878_v12, %v2876_v30  ;;  %v4294_v12 = vld [vmem:[%s5699_s24] ss:$0 sm:$0xff] }
0x11c7   :  { %3023 = vmatmul.bf16.vlgmr.msrb.gmra.mxu0 %v2912_v32 }
0x11c8   :  { %3037 = vmatmul.bf16.vlgmr.msrb.gmra.mxu1 %v2913_v33 }
0x11c9   :  { %3229 = vmatpush.bf16.msrb.mxu3 %v4101_v26 }
0x11cd   :  { %3230 = vmatpush.bf16.msrb.mxu3 %v4100_v8 }
0x1244   :  { %v3024_v35 = vpop.f32.mrf.mxu0 }
0x1245   :  { %v3025_v37 = vadd.f32 %v4291_v34, %v3024_v35  ;;  %v3038_v38 = vpop.f32.mrf.mxu1 }
0x1247   :  { %v3039_v41 = vadd.f32 %v3038_v38, %v3025_v37  ;;  %v4295_v37 = vld [vmem:[%s5700_s1] ss:$0 sm:$0xff] }
0x1249   :  { %v3043_v36 = vadd.f32 %v3039_v41, %v5518_v28  ;;  %v4099_v28 = vld [vmem:[%s5697_s4 + $0x38] sm:$0xff] }
0x124a   :  { %3168 = vmatpush.bf16.msrb.mxu2 %v4099_v28 }
0x124b   :  { %3049 = vadd.xlane.f32.xlu2 %v3043_v36 }
0x124c   :  { %v3026_v17 = vpop.f32.mrf.mxu0 }
0x124d   :  { %v3027_v39 = vadd.f32 %v4291_v34, %v3026_v17  ;;  %v3040_v18 = vpop.f32.mrf.mxu1 }
0x124f   :  { %v3041_v43 = vadd.f32 %v3040_v18, %v3027_v39 }
0x1251   :  { %v3044_v44 = vadd.f32 %v3041_v43, %v5520_v29  ;;  %v4098_v29 = vld [vmem:[%s5697_s4 + $0x30] sm:$0xff] }
0x1252   :  { %3169 = vmatpush.bf16.msrb.mxu2 %v4098_v29 }
0x1253   :  { %3051 = vadd.xlane.f32.xlu1 %v3044_v44 }
0x1256   :  { %3170 = vmatpush.bf16.msrb.mxu2 %v4097_v53 }
0x125a   :  { %3171 = vmatpush.bf16.msrb.mxu2 %v4096_v54 }
0x125e   :  { %3172 = vmatpush.bf16.msrb.mxu2 %v4095_v55 }
0x1262   :  { %3173 = vmatpush.bf16.msrb.mxu2 %v4094_v56 }
0x1266   :  { %3174 = vmatpush.bf16.msrb.mxu2 %v4093_v31 }
0x126a   :  { %3175 = vmatpush.bf16.msrb.mxu2 %v4092_v59 }
0x12be   :  { %v3050_v45 = vpop.xlane.xlu2 %3049 }
0x12bf   :  { %v3053_v46 = vmul.f32 %v3050_v45, %v4710_v24 }
0x12c1   :  { %v3055_v48 = vsub.f32 %v3043_v36, %v3053_v46 }
0x12c3   :  { %v3057_v49 = vmul.f32 %v3055_v48, %v3055_v48 }
0x12c5   :  { %3059 = vadd.xlane.f32.xlu1 %v3057_v49 }
0x12c6   :  { %v3052_v47 = vpop.xlane.xlu1 %3051 }
0x12c7   :  { %v3054_v51 = vmul.f32 %v3052_v47, %v4710_v24 }
0x12c9   :  { %v3056_v50 = vsub.f32 %v3044_v44, %v3054_v51 }
0x12cb   :  { %v3058_v52 = vmul.f32 %v3056_v50, %v3056_v50 }
0x12cd   :  { %3061 = vadd.xlane.f32.xlu1 %v3058_v52 }
0x1338   :  { %v3060_v57 = vpop.xlane.xlu1 %3059 }
0x1339   :  { %v3063_v58 = vmul.f32 %v3060_v57, %v4710_v24 }
0x133b   :  { %v3065_v61 = vadd.f32 1e-12, %v3063_v58 }
0x133d   :  { %4394 = vrsqrt.f32 %v3065_v61  ;;  %vm3073_vm12 = vweird.f32 %v3065_v61 }
0x1340   :  { %v3062_v0 = vpop.xlane.xlu1 %3061 }
0x1341   :  { %v3064_v2 = vmul.f32 %v3062_v0, %v4710_v24 }
0x1343   :  { %v4395_v42 = vpop.eup %4394  ;;  %v3066_v6 = vadd.f32 1e-12, %v3064_v2 }
0x1344   :  { %v3068_v60 = vmul.f32 %v4395_v42, %v3065_v61  ;;  %vm3074_vm11 = vweird.f32 %v4395_v42 }
0x1345   :  { %4396 = vrsqrt.f32 %v3066_v6  ;;  %vm3075_vm13 = vmor %vm3073_vm12, %vm3074_vm11  ;;  %vm3083_vm15 = vweird.f32 %v3066_v6 }
0x1346   :  { %v3069_v7 = vmul.f32 %v4395_v42, %v3068_v60 }
0x1348   :  { %v3070_v1 = vmul.f32 0.5, %v3069_v7 }
0x134a   :  { %v3071_v4 = vsub.f32 1.5, %v3070_v1 }
0x134b   :  { %v4397_v5 = vpop.eup %4396 }
0x134c   :  { %v3072_v27 = vmul.f32 %v4395_v42, %v3071_v4  ;;  %v3078_v9 = vmul.f32 %v4397_v5, %v3066_v6  ;;  %vm3084_vm14 = vweird.f32 %v4397_v5 }
0x134d   :  { %vm3085_vm0 = vmor %vm3083_vm15, %vm3084_vm14 }
0x134e   :  { %v3079_v10 = vmul.f32 %v4397_v5, %v3078_v9  ;;  %v3076_v11 = vsel %vm3075_vm13, %v4395_v42, %v3072_v27 }
0x134f   :  { %v3087_v24 = vmul.f32 %v3076_v11, %v3055_v48 }
0x1350   :  { %v3080_v15 = vmul.f32 0.5, %v3079_v10 }
0x1351   :  { %v3092_v19 = vmul.f32 %v4292_v13, %v3087_v24 }
0x1352   :  { %v3081_v16 = vsub.f32 1.5, %v3080_v15 }
0x1353   :  { %v3097_v21 = vadd.f32 %v4293_v3, %v3092_v19 }
0x1354   :  { %v3082_v14 = vmul.f32 %v4397_v5, %v3081_v16 }
0x1356   :  { %v3086_v40 = vsel %vm3085_vm0, %v4397_v5, %v3082_v14 }
0x1357   :  { %v3088_v63 = vmul.f32 %v3086_v40, %v3056_v50 }
0x1359   :  { %v3093_v20 = vmul.f32 %v4292_v13, %v3088_v63 }
0x135b   :  { %v3098_v22 = vadd.f32 %v4293_v3, %v3093_v20 }
0x135d   :  { %v3115_v25 = vpack.c.bf16 %v3098_v22, %v3097_v21 }
0x135f   :  { %3176 = vmatmul.bf16.vlgmr.msrb.gmra.mxu2 %v3115_v25 }
0x13e2   :  { %v3177_v30 = vpop.f32.mrf.mxu2 }
0x13e3   :  { %v3178_v33 = vadd.f32 %v4294_v12, %v3177_v30 }
0x13ea   :  { %v3179_v32 = vpop.f32.mrf.mxu2 }
0x13eb   :  { %v3180_v34 = vadd.f32 %v4294_v12, %v3179_v32 }
0x13ed   :  { %v3190_v35 = vpack.c.bf16 %v3180_v34, %v3178_v33 }
0x13ef   :  { %3963 = vmatmul.msk.bf16.vlgmr.msrb.gmra.mxu3 %vm3219_vm1, %v3190_v35 }
0x1472   :  { %v3232_v38 = vpop.f32.mrf.mxu3 }
0x1473   :  { %v3233_v41 = vadd.f32 %v4295_v37, %v3232_v38 }
0x1475   :  { %3237 = vst [vmem:[%s5701_s19] sm:$0xff] %v3233_v41 }
0x147a   :  { %v3234_v36 = vpop.f32.mrf.mxu3 }
0x147b   :  { %v3235_v17 = vadd.f32 %v4295_v37, %v3234_v36 }
0x147d   :  { %3238 = vst [vmem:[%s5701_s19 + $0x8] sm:$0xff] %v3235_v17 }
0x147e   :  { %3243 = vsyncpa [#allocation4], 1 }

</bundles_post_ra>
